<compile_context>
chip_gen: v5e
topology: v5e:2x2
jax: 0.10.0
libtpu: 0.0.40
codegen_flags: <defaults>
</compile_context>

<pallas_src>
import jax
import jax.numpy as jnp
from jax.experimental import pallas as pl
from jax.experimental.pallas import tpu as pltpu


_SQRT1_2 = 0.7071067811865476


def _erf_approx(x):
    # Abramowitz & Stegun 7.1.26 (|err| < 1.5e-7): exp + basic VPU ops only, so it
    # lowers cleanly in Mosaic and matches PyTorch's exact-erf F.gelu closely.
    p = 0.3275911
    a1, a2, a3, a4, a5 = (0.254829592, -0.284496736, 1.421413741,
                          -1.453152027, 1.061405429)
    sgn = jnp.where(x >= 0.0, 1.0, -1.0)
    ax = jnp.abs(x)
    # EUP reciprocal (off the 4-wide VALU slots; this kernel is VALU-heaviest here).
    t = pl.reciprocal(1.0 + p * ax, approx=True)
    poly = ((((a5 * t + a4) * t + a3) * t + a2) * t + a1) * t
    return sgn * (1.0 - poly * jnp.exp(-ax * ax))


def _gelu_exact(x):
    return 0.5 * x * (1.0 + _erf_approx(x * _SQRT1_2))


def _vmem_budget_bytes():
    """Generation-aware VMEM limit: ~62% of physical (40 MiB v7x, 80 MiB v5e/v6e)."""
    cap = 64 * 1024 * 1024
    try:
        cap = int(pltpu.get_tpu_info().vmem_capacity_bytes)
    except Exception:
        pass
    return max(min(int(cap * 0.625), 100 * 1024 * 1024), 32 * 1024 * 1024)


def _pick_row_strip(bsz, h, w, c, c2, budget_bytes, itemsize):
    """Largest H-strip (divisor of H) whose per-step footprint fits the budget,
    preferring >=2 total grid steps so both v7x TensorCores get work."""
    def footprint(th):
        io = 2 * ((th + 2) * w * c + th * w * c) * itemsize      # in+out blocks, x2 buffers
        wts = 2 * (c * c2 + 9 * c2 + 2 * c2 + (c2 // 2) * c + c) * itemsize
        scratch = (th + 2) * (w + 2) * c2 * 4                    # halo-padded f32 scratch
        temps = 4 * th * w * c2 * 4                              # acc + live f32 temps
        return io + wts + scratch + temps

    fallback = 1
    for th in range(h, 0, -1):
        if h % th:
            continue
        if footprint(th) > budget_bytes:
            continue
        if fallback == 1:
            fallback = th                      # largest strip that fits
        if bsz * (h // th) >= 2:
            return th                          # largest strip that fits AND >= 2 steps
    return fallback


# ------------------------------ fused kernel --------------------------------


def _ffn_fused_kernel(x_top_ref, x_mid_ref, x_bot_ref,
                      w_in_ref, b_in_ref, w_dw_ref, b_dw_ref,
                      w_out_ref, b_out_ref, o_ref, y_pad):
    s = pl.program_id(1)
    ns = pl.num_programs(1)
    _, th, w, c = x_mid_ref.shape
    c2 = w_in_ref.shape[1]
    hid = c2 // 2

    w_in = w_in_ref[...].astype(jnp.float32)      # (C, 2*hid)
    b_in = b_in_ref[...].astype(jnp.float32)      # (1, 2*hid)

    # Zero the halo-padded scratch: provides the zero left/right columns and the
    # zero top/bottom rows at image borders (Conv2d padding=1, 'zeros').
    y_pad[...] = jnp.zeros_like(y_pad)

    # --- project_in (1x1 conv) on the strip rows: one wide (th*W, C)@(C, 2*hid) dot.
    x_mid = x_mid_ref[0].reshape(th * w, c).astype(jnp.float32)
    y_mid = jnp.dot(x_mid, w_in, preferred_element_type=jnp.float32) + b_in
    y_pad[1:th + 1, 1:w + 1, :] = y_mid.reshape(th, w, c2)

    # --- project_in on the 1-row halos (recomputed per strip; stays zero at image
    #     borders, which is exactly the dwconv's zero padding of project_in output).
    @pl.when(s > 0)
    def _():
        xt = x_top_ref[0, 0].astype(jnp.float32)                       # (W, C)
        yt = jnp.dot(xt, w_in, preferred_element_type=jnp.float32) + b_in
        y_pad[0:1, 1:w + 1, :] = yt.reshape(1, w, c2)

    @pl.when(s < ns - 1)
    def _():
        xb = x_bot_ref[0, 0].astype(jnp.float32)                       # (W, C)
        yb = jnp.dot(xb, w_in, preferred_element_type=jnp.float32) + b_in
        y_pad[th + 1:th + 2, 1:w + 1, :] = yb.reshape(1, w, c2)

    # --- 3x3 depthwise conv (+bias) as 9 shifted VPU MACs; windows are read
    #     directly off the scratch ref (no materialized value-slice copies).
    acc = jnp.zeros((th, w, c2), jnp.float32)
    for dh in range(3):
        for dw in range(3):
            tap = dh * 3 + dw
            win = y_pad[dh:dh + th, dw:dw + w, :]                      # (th, W, 2*hid)
            acc = acc + win * w_dw_ref[tap:tap + 1, :].astype(jnp.float32)
    acc = acc + b_dw_ref[...].astype(jnp.float32)

    # --- exact-erf GELU gate (chunk(2, dim=channels)).
    z1 = acc[:, :, :hid]
    z2 = acc[:, :, hid:]
    g = _gelu_exact(z1) * z2                                           # (th, W, hid)

    # --- project_out (1x1 conv).
    w_out = w_out_ref[...].astype(jnp.float32)                         # (hid, C)
    b_out = b_out_ref[...].astype(jnp.float32)                         # (1, C)
    o = jnp.dot(g.reshape(th * w, hid), w_out,
                preferred_element_type=jnp.float32) + b_out
    o_ref[0] = o.reshape(th, w, c).astype(o_ref.dtype)


# ------------------------------ module forward ------------------------------


def feed_forward(x, w_in, b_in, w_dw, b_dw, w_out, b_out, row_strip=None):
    """Restormer FeedForward forward.

    x:     (B, C, H, W) NCHW (like the PyTorch module)
    w_in:  (2*hid, C, 1, 1),  b_in:  (2*hid,)
    w_dw:  (2*hid, 1, 3, 3),  b_dw:  (2*hid,)   # depthwise, groups = 2*hid
    w_out: (C, hid, 1, 1),    b_out: (C,)
    row_strip: optional explicit H-strip height (must divide H); None = auto.
    """
    bsz, c, h, w = x.shape
    c2 = w_in.shape[0]
    hid = c2 // 2

    # Repack the tiny conv weights into matmul / tap layouts (negligible traffic).
    w_in_m = w_in.reshape(c2, c).T            # (C, 2*hid)
    b_in_m = b_in.reshape(1, c2)
    w_dw_m = w_dw.reshape(c2, 9).T            # (9, 2*hid), row = 3*dh + dw
    b_dw_m = b_dw.reshape(1, c2)
    w_out_m = w_out.reshape(c, hid).T         # (hid, C)
    b_out_m = b_out.reshape(1, c)

    # NCHW -> NHWC once (single HBM pass each way).
    xt = jnp.transpose(x, (0, 2, 3, 1))       # (B, H, W, C)

    budget = _vmem_budget_bytes()
    if row_strip is None:
        th = _pick_row_strip(bsz, h, w, c, c2, budget // 2, x.dtype.itemsize)
    else:
        assert h % row_strip == 0
        th = row_strip
    n_strips = h // th

    out = pl.pallas_call(
        _ffn_fused_kernel,
        out_shape=jax.ShapeDtypeStruct((bsz, h, w, c), x.dtype),
        grid_spec=pltpu.PrefetchScalarGridSpec(
            num_scalar_prefetch=0,
            grid=(bsz, n_strips),
            in_specs=[
                # top halo row (clamped at the image border; zeroed via pl.when)
                pl.BlockSpec((1, 1, w, c),
                             lambda b, s: (b, jnp.maximum(s * th - 1, 0), 0, 0)),
                # strip rows
                pl.BlockSpec((1, th, w, c), lambda b, s: (b, s, 0, 0)),
                # bottom halo row
                pl.BlockSpec((1, 1, w, c),
                             lambda b, s: (b, jnp.minimum((s + 1) * th, h - 1), 0, 0)),
                # weights / biases: tiny, resident across the grid
                pl.BlockSpec((c, c2), lambda b, s: (0, 0)),
                pl.BlockSpec((1, c2), lambda b, s: (0, 0)),
                pl.BlockSpec((9, c2), lambda b, s: (0, 0)),
                pl.BlockSpec((1, c2), lambda b, s: (0, 0)),
                pl.BlockSpec((hid, c), lambda b, s: (0, 0)),
                pl.BlockSpec((1, c), lambda b, s: (0, 0)),
            ],
            out_specs=pl.BlockSpec((1, th, w, c), lambda b, s: (b, s, 0, 0)),
            scratch_shapes=[pltpu.VMEM((th + 2, w + 2, c2), jnp.float32)],
        ),
        compiler_params=pltpu.CompilerParams(
            dimension_semantics=("parallel", "parallel"),
            vmem_limit_bytes=budget,
        ),
    )(xt, xt, xt, w_in_m, b_in_m, w_dw_m, b_dw_m, w_out_m, b_out_m)

    return jnp.transpose(out, (0, 3, 1, 2))   # back to NCHW


# ------------------------------ reference ------------------------------------


def _reference(x, w_in, b_in, w_dw, b_dw, w_out, b_out):
    dn = ("NCHW", "OIHW", "NCHW")
    hp = jax.lax.Precision.HIGHEST
    c2 = w_dw.shape[0]
    hid = c2 // 2
    y = jax.lax.conv_general_dilated(x, w_in, (1, 1), "VALID",
                                     dimension_numbers=dn, precision=hp)
    y = y + b_in[None, :, None, None]
    z = jax.lax.conv_general_dilated(y, w_dw, (1, 1), ((1, 1), (1, 1)),
                                     dimension_numbers=dn,
                                     feature_group_count=c2, precision=hp)
    z = z + b_dw[None, :, None, None]
    x1, x2 = z[:, :hid], z[:, hid:]
    g = jax.nn.gelu(x1, approximate=False) * x2
    o = jax.lax.conv_general_dilated(g, w_out, (1, 1), "VALID",
                                     dimension_numbers=dn, precision=hp)
    return o + b_out[None, :, None, None]


if __name__ == "__main__":
    key = jax.random.PRNGKey(0)
    B, dim, H, W = 2, 8, 16, 16
    ffn_expansion_factor = 2.66
    hid = int(dim * ffn_expansion_factor)        # 21 (matches the PyTorch int())
    c2 = 2 * hid

    ks = jax.random.split(key, 7)
    x = jax.random.normal(ks[0], (B, dim, H, W), dtype=jnp.float32)
    w_in = jax.random.normal(ks[1], (c2, dim, 1, 1), jnp.float32) * (1.0 / dim) ** 0.5
    b_in = jax.random.normal(ks[2], (c2,), jnp.float32) * 0.1
    w_dw = jax.random.normal(ks[3], (c2, 1, 3, 3), jnp.float32) * (1.0 / 9.0)
    b_dw = jax.random.normal(ks[4], (c2,), jnp.float32) * 0.1
    w_out = jax.random.normal(ks[5], (dim, hid, 1, 1), jnp.float32) * (1.0 / hid) ** 0.5
    b_out = jax.random.normal(ks[6], (dim,), jnp.float32) * 0.1

    y_ref = _reference(x, w_in, b_in, w_dw, b_dw, w_out, b_out)

    # Run twice: auto strip height (single whole-image strip at this tiny size) and a
    # forced 2-strip tiling, so the interior halo-row path is exercised at runtime.
    for rs in (None, 8):
        y = feed_forward(x, w_in, b_in, w_dw, b_dw, w_out, b_out, row_strip=rs)
        y = jax.block_until_ready(y)
        assert y.shape == x.shape
        err = float(jnp.max(jnp.abs(y - y_ref)))
        # Headroom for the A&S erf approximation, the EUP approx reciprocal and MXU
        # pass-precision differences vs the HIGHEST-precision XLA reference; any
        # structural bug (wrong tap/halo/bias) shows up as O(0.1) error.
        assert err < 5e-3, (rs, err)
    print("KERNEL_OK")
</pallas_src>

<mosaic_0001>
module attributes {stable_mosaic.version = 11 : i64} {
  func.func @_ffn_fused_kernel(%arg0: i32, %arg1: i32, %arg2: memref<1x1x16x8xf32, #tpu.memory_space<vmem>>, %arg3: memref<1x16x16x8xf32, #tpu.memory_space<vmem>>, %arg4: memref<1x1x16x8xf32, #tpu.memory_space<vmem>>, %arg5: memref<8x42xf32, #tpu.memory_space<vmem>>, %arg6: memref<1x42xf32, #tpu.memory_space<vmem>>, %arg7: memref<9x42xf32, #tpu.memory_space<vmem>>, %arg8: memref<1x42xf32, #tpu.memory_space<vmem>>, %arg9: memref<21x8xf32, #tpu.memory_space<vmem>>, %arg10: memref<1x8xf32, #tpu.memory_space<vmem>>, %arg11: memref<1x16x16x8xf32, #tpu.memory_space<vmem>>, %arg12: memref<18x18x42xf32, #tpu.memory_space<vmem>>) attributes {dimension_semantics = [#tpu.dimension_semantics<parallel>, #tpu.dimension_semantics<parallel>], iteration_bounds = array<i64: 2, 1>, scalar_prefetch = 0 : i64, scratch_operands = 1 : i64, tpu.core_type = #tpu.core_type<tc>, window_params = [{transform_indices = @transform_0, window_bounds = array<i64: 1, 1, 16, 8>}, {transform_indices = @transform_1, window_bounds = array<i64: 1, 16, 16, 8>}, {transform_indices = @transform_2, window_bounds = array<i64: 1, 1, 16, 8>}, {pipeline_mode = #tpu.pipeline_mode<synchronous>, transform_indices = @transform_3, window_bounds = array<i64: 8, 42>}, {pipeline_mode = #tpu.pipeline_mode<synchronous>, transform_indices = @transform_4, window_bounds = array<i64: 1, 42>}, {pipeline_mode = #tpu.pipeline_mode<synchronous>, transform_indices = @transform_5, window_bounds = array<i64: 9, 42>}, {pipeline_mode = #tpu.pipeline_mode<synchronous>, transform_indices = @transform_6, window_bounds = array<i64: 1, 42>}, {pipeline_mode = #tpu.pipeline_mode<synchronous>, transform_indices = @transform_7, window_bounds = array<i64: 21, 8>}, {pipeline_mode = #tpu.pipeline_mode<synchronous>, transform_indices = @transform_8, window_bounds = array<i64: 1, 8>}, {transform_indices = @transform_9, window_bounds = array<i64: 1, 16, 16, 8>}]} {
    %c0 = arith.constant 0 : index
    %c0_0 = arith.constant 0 : index
    %0 = vector.load %arg5[%c0, %c0_0] : memref<8x42xf32, #tpu.memory_space<vmem>>, vector<8x42xf32>
    %c0_1 = arith.constant 0 : index
    %c0_2 = arith.constant 0 : index
    %1 = vector.load %arg6[%c0_1, %c0_2] : memref<1x42xf32, #tpu.memory_space<vmem>>, vector<1x42xf32>
    %cst = arith.constant 0.000000e+00 : f32
    %2 = vector.broadcast %cst : f32 to vector<18x18x42xf32>
    %c0_3 = arith.constant 0 : index
    %c0_4 = arith.constant 0 : index
    %c0_5 = arith.constant 0 : index
    %3 = vector.load %arg12[%c0_3, %c0_4, %c0_5] : memref<18x18x42xf32, #tpu.memory_space<vmem>>, vector<18x18x42xf32>
    tpu.vector_store %arg12[%c0_3, %c0_4, %c0_5], %2 {strides = array<i32>} : memref<18x18x42xf32, #tpu.memory_space<vmem>>, vector<18x18x42xf32>,
    %c0_6 = arith.constant 0 : index
    %c0_7 = arith.constant 0 : index
    %c0_8 = arith.constant 0 : index
    %c0_9 = arith.constant 0 : index
    %4 = vector.load %arg3[%c0_6, %c0_7, %c0_8, %c0_9] : memref<1x16x16x8xf32, #tpu.memory_space<vmem>>, vector<1x16x16x8xf32>
    %5 = vector.shape_cast %4 : vector<1x16x16x8xf32> to vector<16x16x8xf32>
    %6 = vector.shape_cast %5 : vector<16x16x8xf32> to vector<256x8xf32>
    %cst_10 = arith.constant dense<0.000000e+00> : vector<256x42xf32>
    %7 = tpu.matmul %6, %0, %cst_10 {dimension_numbers = #tpu.dot_dimension_numbers<[1], [0], [0], [1], [0, 0, 1, 1], [], []>} : vector<256x8xf32>, vector<8x42xf32>, vector<256x42xf32> -> vector<256x42xf32>
    %8 = vector.broadcast %1 : vector<1x42xf32> to vector<256x42xf32>
    %9 = arith.addf %7, %8 : vector<256x42xf32>
    %10 = vector.shape_cast %9 : vector<256x42xf32> to vector<16x16x42xf32>
    %c1 = arith.constant 1 : index
    %c1_11 = arith.constant 1 : index
    %c0_12 = arith.constant 0 : index
    %11 = vector.load %arg12[%c1, %c1_11, %c0_12] : memref<18x18x42xf32, #tpu.memory_space<vmem>>, vector<16x16x42xf32>
    tpu.vector_store %arg12[%c1, %c1_11, %c0_12], %10 {strides = array<i32>} : memref<18x18x42xf32, #tpu.memory_space<vmem>>, vector<16x16x42xf32>,
    %c0_i32 = arith.constant 0 : i32
    %12 = arith.cmpi sgt, %arg1, %c0_i32 : i32
    %13 = arith.extui %12 : i1 to i32
    %c0_i32_13 = arith.constant 0 : i32
    %14 = arith.cmpi ne, %13, %c0_i32_13 : i32
    scf.if %14 {
      %c0_81 = arith.constant 0 : index
      %c0_82 = arith.constant 0 : index
      %c0_83 = arith.constant 0 : index
      %c0_84 = arith.constant 0 : index
      %130 = vector.load %arg2[%c0_81, %c0_82, %c0_83, %c0_84] : memref<1x1x16x8xf32, #tpu.memory_space<vmem>>, vector<1x1x16x8xf32>
      %131 = vector.shape_cast %130 : vector<1x1x16x8xf32> to vector<16x8xf32>
      %cst_85 = arith.constant dense<0.000000e+00> : vector<16x42xf32>
      %132 = tpu.matmul %131, %0, %cst_85 {dimension_numbers = #tpu.dot_dimension_numbers<[1], [0], [0], [1], [0, 0, 1, 1], [], []>} : vector<16x8xf32>, vector<8x42xf32>, vector<16x42xf32> -> vector<16x42xf32>
      %133 = vector.broadcast %1 : vector<1x42xf32> to vector<16x42xf32>
      %134 = arith.addf %132, %133 : vector<16x42xf32>
      %135 = vector.shape_cast %134 : vector<16x42xf32> to vector<1x16x42xf32>
      %c0_86 = arith.constant 0 : index
      %c1_87 = arith.constant 1 : index
      %c0_88 = arith.constant 0 : index
      %136 = vector.load %arg12[%c0_86, %c1_87, %c0_88] : memref<18x18x42xf32, #tpu.memory_space<vmem>>, vector<1x16x42xf32>
      tpu.vector_store %arg12[%c0_86, %c1_87, %c0_88], %135 {strides = array<i32>} : memref<18x18x42xf32, #tpu.memory_space<vmem>>, vector<1x16x42xf32>,
    } else {
    }
    %c0_i32_14 = arith.constant 0 : i32
    %15 = arith.cmpi slt, %arg1, %c0_i32_14 : i32
    %16 = arith.extui %15 : i1 to i32
    %c0_i32_15 = arith.constant 0 : i32
    %17 = arith.cmpi ne, %16, %c0_i32_15 : i32
    scf.if %17 {
      %c0_81 = arith.constant 0 : index
      %c0_82 = arith.constant 0 : index
      %c0_83 = arith.constant 0 : index
      %c0_84 = arith.constant 0 : index
      %130 = vector.load %arg4[%c0_81, %c0_82, %c0_83, %c0_84] : memref<1x1x16x8xf32, #tpu.memory_space<vmem>>, vector<1x1x16x8xf32>
      %131 = vector.shape_cast %130 : vector<1x1x16x8xf32> to vector<16x8xf32>
      %cst_85 = arith.constant dense<0.000000e+00> : vector<16x42xf32>
      %132 = tpu.matmul %131, %0, %cst_85 {dimension_numbers = #tpu.dot_dimension_numbers<[1], [0], [0], [1], [0, 0, 1, 1], [], []>} : vector<16x8xf32>, vector<8x42xf32>, vector<16x42xf32> -> vector<16x42xf32>
      %133 = vector.broadcast %1 : vector<1x42xf32> to vector<16x42xf32>
      %134 = arith.addf %132, %133 : vector<16x42xf32>
      %135 = vector.shape_cast %134 : vector<16x42xf32> to vector<1x16x42xf32>
      %c17 = arith.constant 17 : index
      %c1_86 = arith.constant 1 : index
      %c0_87 = arith.constant 0 : index
      %136 = vector.load %arg12[%c17, %c1_86, %c0_87] : memref<18x18x42xf32, #tpu.memory_space<vmem>>, vector<1x16x42xf32>
      tpu.vector_store %arg12[%c17, %c1_86, %c0_87], %135 {strides = array<i32>} : memref<18x18x42xf32, #tpu.memory_space<vmem>>, vector<1x16x42xf32>,
    } else {
    }
    %cst_16 = arith.constant 0.000000e+00 : f32
    %18 = vector.broadcast %cst_16 : f32 to vector<16x16x42xf32>
    %c0_17 = arith.constant 0 : index
    %c0_18 = arith.constant 0 : index
    %c0_19 = arith.constant 0 : index
    %19 = vector.load %arg12[%c0_17, %c0_18, %c0_19] : memref<18x18x42xf32, #tpu.memory_space<vmem>>, vector<16x16x42xf32>
    %c0_20 = arith.constant 0 : index
    %c0_21 = arith.constant 0 : index
    %20 = vector.load %arg7[%c0_20, %c0_21] : memref<9x42xf32, #tpu.memory_space<vmem>>, vector<1x42xf32>
    %21 = vector.shape_cast %20 : vector<1x42xf32> to vector<1x1x42xf32>
    %22 = vector.broadcast %21 : vector<1x1x42xf32> to vector<16x16x42xf32>
    %23 = arith.mulf %19, %22 : vector<16x16x42xf32>
    %24 = arith.addf %18, %23 : vector<16x16x42xf32>
    %c0_22 = arith.constant 0 : index
    %c1_23 = arith.constant 1 : index
    %c0_24 = arith.constant 0 : index
    %25 = vector.load %arg12[%c0_22, %c1_23, %c0_24] : memref<18x18x42xf32, #tpu.memory_space<vmem>>, vector<16x16x42xf32>
    %c1_25 = arith.constant 1 : index
    %c0_26 = arith.constant 0 : index
    %26 = vector.load %arg7[%c1_25, %c0_26] : memref<9x42xf32, #tpu.memory_space<vmem>>, vector<1x42xf32>
    %27 = vector.shape_cast %26 : vector<1x42xf32> to vector<1x1x42xf32>
    %28 = vector.broadcast %27 : vector<1x1x42xf32> to vector<16x16x42xf32>
    %29 = arith.mulf %25, %28 : vector<16x16x42xf32>
    %30 = arith.addf %24, %29 : vector<16x16x42xf32>
    %c0_27 = arith.constant 0 : index
    %c2 = arith.constant 2 : index
    %c0_28 = arith.constant 0 : index
    %31 = vector.load %arg12[%c0_27, %c2, %c0_28] : memref<18x18x42xf32, #tpu.memory_space<vmem>>, vector<16x16x42xf32>
    %c2_29 = arith.constant 2 : index
    %c0_30 = arith.constant 0 : index
    %32 = vector.load %arg7[%c2_29, %c0_30] : memref<9x42xf32, #tpu.memory_space<vmem>>, vector<1x42xf32>
    %33 = vector.shape_cast %32 : vector<1x42xf32> to vector<1x1x42xf32>
    %34 = vector.broadcast %33 : vector<1x1x42xf32> to vector<16x16x42xf32>
    %35 = arith.mulf %31, %34 : vector<16x16x42xf32>
    %36 = arith.addf %30, %35 : vector<16x16x42xf32>
    %c1_31 = arith.constant 1 : index
    %c0_32 = arith.constant 0 : index
    %c0_33 = arith.constant 0 : index
    %37 = vector.load %arg12[%c1_31, %c0_32, %c0_33] : memref<18x18x42xf32, #tpu.memory_space<vmem>>, vector<16x16x42xf32>
    %c3 = arith.constant 3 : index
    %c0_34 = arith.constant 0 : index
    %38 = vector.load %arg7[%c3, %c0_34] : memref<9x42xf32, #tpu.memory_space<vmem>>, vector<1x42xf32>
    %39 = vector.shape_cast %38 : vector<1x42xf32> to vector<1x1x42xf32>
    %40 = vector.broadcast %39 : vector<1x1x42xf32> to vector<16x16x42xf32>
    %41 = arith.mulf %37, %40 : vector<16x16x42xf32>
    %42 = arith.addf %36, %41 : vector<16x16x42xf32>
    %c1_35 = arith.constant 1 : index
    %c1_36 = arith.constant 1 : index
    %c0_37 = arith.constant 0 : index
    %43 = vector.load %arg12[%c1_35, %c1_36, %c0_37] : memref<18x18x42xf32, #tpu.memory_space<vmem>>, vector<16x16x42xf32>
    %c4 = arith.constant 4 : index
    %c0_38 = arith.constant 0 : index
    %44 = vector.load %arg7[%c4, %c0_38] : memref<9x42xf32, #tpu.memory_space<vmem>>, vector<1x42xf32>
    %45 = vector.shape_cast %44 : vector<1x42xf32> to vector<1x1x42xf32>
    %46 = vector.broadcast %45 : vector<1x1x42xf32> to vector<16x16x42xf32>
    %47 = arith.mulf %43, %46 : vector<16x16x42xf32>
    %48 = arith.addf %42, %47 : vector<16x16x42xf32>
    %c1_39 = arith.constant 1 : index
    %c2_40 = arith.constant 2 : index
    %c0_41 = arith.constant 0 : index
    %49 = vector.load %arg12[%c1_39, %c2_40, %c0_41] : memref<18x18x42xf32, #tpu.memory_space<vmem>>, vector<16x16x42xf32>
    %c5 = arith.constant 5 : index
    %c0_42 = arith.constant 0 : index
    %50 = vector.load %arg7[%c5, %c0_42] : memref<9x42xf32, #tpu.memory_space<vmem>>, vector<1x42xf32>
    %51 = vector.shape_cast %50 : vector<1x42xf32> to vector<1x1x42xf32>
    %52 = vector.broadcast %51 : vector<1x1x42xf32> to vector<16x16x42xf32>
    %53 = arith.mulf %49, %52 : vector<16x16x42xf32>
    %54 = arith.addf %48, %53 : vector<16x16x42xf32>
    %c2_43 = arith.constant 2 : index
    %c0_44 = arith.constant 0 : index
    %c0_45 = arith.constant 0 : index
    %55 = vector.load %arg12[%c2_43, %c0_44, %c0_45] : memref<18x18x42xf32, #tpu.memory_space<vmem>>, vector<16x16x42xf32>
    %c6 = arith.constant 6 : index
    %c0_46 = arith.constant 0 : index
    %56 = vector.load %arg7[%c6, %c0_46] : memref<9x42xf32, #tpu.memory_space<vmem>>, vector<1x42xf32>
    %57 = vector.shape_cast %56 : vector<1x42xf32> to vector<1x1x42xf32>
    %58 = vector.broadcast %57 : vector<1x1x42xf32> to vector<16x16x42xf32>
    %59 = arith.mulf %55, %58 : vector<16x16x42xf32>
    %60 = arith.addf %54, %59 : vector<16x16x42xf32>
    %c2_47 = arith.constant 2 : index
    %c1_48 = arith.constant 1 : index
    %c0_49 = arith.constant 0 : index
    %61 = vector.load %arg12[%c2_47, %c1_48, %c0_49] : memref<18x18x42xf32, #tpu.memory_space<vmem>>, vector<16x16x42xf32>
    %c7 = arith.constant 7 : index
    %c0_50 = arith.constant 0 : index
    %62 = vector.load %arg7[%c7, %c0_50] : memref<9x42xf32, #tpu.memory_space<vmem>>, vector<1x42xf32>
    %63 = vector.shape_cast %62 : vector<1x42xf32> to vector<1x1x42xf32>
    %64 = vector.broadcast %63 : vector<1x1x42xf32> to vector<16x16x42xf32>
    %65 = arith.mulf %61, %64 : vector<16x16x42xf32>
    %66 = arith.addf %60, %65 : vector<16x16x42xf32>
    %c2_51 = arith.constant 2 : index
    %c2_52 = arith.constant 2 : index
    %c0_53 = arith.constant 0 : index
    %67 = vector.load %arg12[%c2_51, %c2_52, %c0_53] : memref<18x18x42xf32, #tpu.memory_space<vmem>>, vector<16x16x42xf32>
    %c8 = arith.constant 8 : index
    %c0_54 = arith.constant 0 : index
    %68 = vector.load %arg7[%c8, %c0_54] : memref<9x42xf32, #tpu.memory_space<vmem>>, vector<1x42xf32>
    %69 = vector.shape_cast %68 : vector<1x42xf32> to vector<1x1x42xf32>
    %70 = vector.broadcast %69 : vector<1x1x42xf32> to vector<16x16x42xf32>
    %71 = arith.mulf %67, %70 : vector<16x16x42xf32>
    %72 = arith.addf %66, %71 : vector<16x16x42xf32>
    %c0_55 = arith.constant 0 : index
    %c0_56 = arith.constant 0 : index
    %73 = vector.load %arg8[%c0_55, %c0_56] : memref<1x42xf32, #tpu.memory_space<vmem>>, vector<1x42xf32>
    %74 = vector.shape_cast %73 : vector<1x42xf32> to vector<1x1x42xf32>
    %75 = vector.broadcast %74 : vector<1x1x42xf32> to vector<16x16x42xf32>
    %76 = arith.addf %72, %75 : vector<16x16x42xf32>
    %77 = vector.extract_strided_slice %76 {offsets = [0, 0, 0], sizes = [16, 16, 21], strides = [1, 1, 1]} : vector<16x16x42xf32> to vector<16x16x21xf32>
    %78 = vector.extract_strided_slice %76 {offsets = [0, 0, 21], sizes = [16, 16, 21], strides = [1, 1, 1]} : vector<16x16x42xf32> to vector<16x16x21xf32>
    %cst_57 = arith.constant 5.000000e-01 : f32
    %79 = vector.broadcast %cst_57 : f32 to vector<16x16x21xf32>
    %80 = arith.mulf %79, %77 : vector<16x16x21xf32>
    %cst_58 = arith.constant 0.707106769 : f32
    %81 = vector.broadcast %cst_58 : f32 to vector<16x16x21xf32>
    %82 = arith.mulf %77, %81 : vector<16x16x21xf32>
    %cst_59 = arith.constant 0.000000e+00 : f32
    %83 = vector.broadcast %cst_59 : f32 to vector<16x16x21xf32>
    %84 = arith.cmpf oge, %82, %83 : vector<16x16x21xf32>
    %cst_60 = arith.constant 1.000000e+00 : f32
    %cst_61 = arith.constant -1.000000e+00 : f32
    %85 = vector.broadcast %cst_60 : f32 to vector<16x16x21xf32>
    %86 = vector.broadcast %cst_61 : f32 to vector<16x16x21xf32>
    %87 = arith.select %84, %85, %86 : vector<16x16x21xi1>, vector<16x16x21xf32>
    %88 = math.absf %82 : vector<16x16x21xf32>
    %cst_62 = arith.constant 0.327591091 : f32
    %89 = vector.broadcast %cst_62 : f32 to vector<16x16x21xf32>
    %90 = arith.mulf %89, %88 : vector<16x16x21xf32>
    %cst_63 = arith.constant 1.000000e+00 : f32
    %91 = vector.broadcast %cst_63 : f32 to vector<16x16x21xf32>
    %92 = arith.addf %91, %90 : vector<16x16x21xf32>
    %93 = tpu.reciprocal %92 {approx = true} : vector<16x16x21xf32> -> vector<16x16x21xf32>
    %cst_64 = arith.constant 1.06140542 : f32
    %94 = vector.broadcast %cst_64 : f32 to vector<16x16x21xf32>
    %95 = arith.mulf %94, %93 : vector<16x16x21xf32>
    %cst_65 = arith.constant -1.45315206 : f32
    %96 = vector.broadcast %cst_65 : f32 to vector<16x16x21xf32>
    %97 = arith.addf %95, %96 : vector<16x16x21xf32>
    %98 = arith.mulf %97, %93 : vector<16x16x21xf32>
    %cst_66 = arith.constant 1.42141378 : f32
    %99 = vector.broadcast %cst_66 : f32 to vector<16x16x21xf32>
    %100 = arith.addf %98, %99 : vector<16x16x21xf32>
    %101 = arith.mulf %100, %93 : vector<16x16x21xf32>
    %cst_67 = arith.constant -0.284496725 : f32
    %102 = vector.broadcast %cst_67 : f32 to vector<16x16x21xf32>
    %103 = arith.addf %101, %102 : vector<16x16x21xf32>
    %104 = arith.mulf %103, %93 : vector<16x16x21xf32>
    %cst_68 = arith.constant 0.254829586 : f32
    %105 = vector.broadcast %cst_68 : f32 to vector<16x16x21xf32>
    %106 = arith.addf %104, %105 : vector<16x16x21xf32>
    %107 = arith.mulf %106, %93 : vector<16x16x21xf32>
    %cst_69 = arith.constant 0.000000e+00 : f32
    %108 = vector.broadcast %cst_69 : f32 to vector<16x16x21xf32>
    %109 = arith.subf %108, %88 : vector<16x16x21xf32>
    %110 = arith.mulf %109, %88 : vector<16x16x21xf32>
    %111 = math.exp %110 : vector<16x16x21xf32>
    %112 = arith.mulf %107, %111 : vector<16x16x21xf32>
    %cst_70 = arith.constant 1.000000e+00 : f32
    %113 = vector.broadcast %cst_70 : f32 to vector<16x16x21xf32>
    %114 = arith.subf %113, %112 : vector<16x16x21xf32>
    %115 = arith.mulf %87, %114 : vector<16x16x21xf32>
    %cst_71 = arith.constant 1.000000e+00 : f32
    %116 = vector.broadcast %cst_71 : f32 to vector<16x16x21xf32>
    %117 = arith.addf %116, %115 : vector<16x16x21xf32>
    %118 = arith.mulf %80, %117 : vector<16x16x21xf32>
    %119 = arith.mulf %118, %78 : vector<16x16x21xf32>
    %c0_72 = arith.constant 0 : index
    %c0_73 = arith.constant 0 : index
    %120 = vector.load %arg9[%c0_72, %c0_73] : memref<21x8xf32, #tpu.memory_space<vmem>>, vector<21x8xf32>
    %c0_74 = arith.constant 0 : index
    %c0_75 = arith.constant 0 : index
    %121 = vector.load %arg10[%c0_74, %c0_75] : memref<1x8xf32, #tpu.memory_space<vmem>>, vector<1x8xf32>
    %122 = vector.shape_cast %119 : vector<16x16x21xf32> to vector<256x21xf32>
    %cst_76 = arith.constant dense<0.000000e+00> : vector<256x8xf32>
    %123 = tpu.matmul %122, %120, %cst_76 {dimension_numbers = #tpu.dot_dimension_numbers<[1], [0], [0], [1], [0, 0, 1, 1], [], []>} : vector<256x21xf32>, vector<21x8xf32>, vector<256x8xf32> -> vector<256x8xf32>
    %124 = vector.broadcast %121 : vector<1x8xf32> to vector<256x8xf32>
    %125 = arith.addf %123, %124 : vector<256x8xf32>
    %126 = vector.shape_cast %125 : vector<256x8xf32> to vector<16x16x8xf32>
    %c0_77 = arith.constant 0 : index
    %c0_78 = arith.constant 0 : index
    %c0_79 = arith.constant 0 : index
    %c0_80 = arith.constant 0 : index
    %127 = vector.load %arg11[%c0_77, %c0_78, %c0_79, %c0_80] : memref<1x16x16x8xf32, #tpu.memory_space<vmem>>, vector<1x16x16x8xf32>
    %128 = vector.shape_cast %127 : vector<1x16x16x8xf32> to vector<16x16x8xf32>
    %129 = vector.shape_cast %126 : vector<16x16x8xf32> to vector<1x16x16x8xf32>
    tpu.vector_store %arg11[%c0_77, %c0_78, %c0_79, %c0_80], %129 {strides = array<i32>} : memref<1x16x16x8xf32, #tpu.memory_space<vmem>>, vector<1x16x16x8xf32>,
    return
  }
  func.func @transform_0(%arg0: i32, %arg1: i32) -> (i32, i32, i32, i32) {
    %c16_i32 = arith.constant 16 : i32
    %0 = arith.muli %arg1, %c16_i32 : i32
    %c1_i32 = arith.constant 1 : i32
    %1 = arith.subi %0, %c1_i32 : i32
    %c0_i32 = arith.constant 0 : i32
    %2 = arith.maxsi %1, %c0_i32 : i32
    %c0_i32_0 = arith.constant 0 : i32
    %c0_i32_1 = arith.constant 0 : i32
    %c0_i32_2 = arith.constant 0 : i32
    return %arg0, %2, %c0_i32_0, %c0_i32_1 : i32, i32, i32, i32
  }
  func.func @transform_1(%arg0: i32, %arg1: i32) -> (i32, i32, i32, i32) {
    %c0_i32 = arith.constant 0 : i32
    %c0_i32_0 = arith.constant 0 : i32
    %c0_i32_1 = arith.constant 0 : i32
    return %arg0, %arg1, %c0_i32, %c0_i32_0 : i32, i32, i32, i32
  }
  func.func @transform_2(%arg0: i32, %arg1: i32) -> (i32, i32, i32, i32) {
    %c1_i32 = arith.constant 1 : i32
    %0 = arith.addi %arg1, %c1_i32 : i32
    %c16_i32 = arith.constant 16 : i32
    %1 = arith.muli %0, %c16_i32 : i32
    %c15_i32 = arith.constant 15 : i32
    %2 = arith.minsi %1, %c15_i32 : i32
    %c0_i32 = arith.constant 0 : i32
    %c0_i32_0 = arith.constant 0 : i32
    %c0_i32_1 = arith.constant 0 : i32
    return %arg0, %2, %c0_i32, %c0_i32_0 : i32, i32, i32, i32
  }
  func.func @transform_3(%arg0: i32, %arg1: i32) -> (i32, i32) {
    %c0_i32 = arith.constant 0 : i32
    %c0_i32_0 = arith.constant 0 : i32
    %c0_i32_1 = arith.constant 0 : i32
    return %c0_i32, %c0_i32_0 : i32, i32
  }
  func.func @transform_4(%arg0: i32, %arg1: i32) -> (i32, i32) {
    %c0_i32 = arith.constant 0 : i32
    %c0_i32_0 = arith.constant 0 : i32
    %c0_i32_1 = arith.constant 0 : i32
    return %c0_i32, %c0_i32_0 : i32, i32
  }
  func.func @transform_5(%arg0: i32, %arg1: i32) -> (i32, i32) {
    %c0_i32 = arith.constant 0 : i32
    %c0_i32_0 = arith.constant 0 : i32
    %c0_i32_1 = arith.constant 0 : i32
    return %c0_i32, %c0_i32_0 : i32, i32
  }
  func.func @transform_6(%arg0: i32, %arg1: i32) -> (i32, i32) {
    %c0_i32 = arith.constant 0 : i32
    %c0_i32_0 = arith.constant 0 : i32
    %c0_i32_1 = arith.constant 0 : i32
    return %c0_i32, %c0_i32_0 : i32, i32
  }
  func.func @transform_7(%arg0: i32, %arg1: i32) -> (i32, i32) {
    %c0_i32 = arith.constant 0 : i32
    %c0_i32_0 = arith.constant 0 : i32
    %c0_i32_1 = arith.constant 0 : i32
    return %c0_i32, %c0_i32_0 : i32, i32
  }
  func.func @transform_8(%arg0: i32, %arg1: i32) -> (i32, i32) {
    %c0_i32 = arith.constant 0 : i32
    %c0_i32_0 = arith.constant 0 : i32
    %c0_i32_1 = arith.constant 0 : i32
    return %c0_i32, %c0_i32_0 : i32, i32
  }
  func.func @transform_9(%arg0: i32, %arg1: i32) -> (i32, i32, i32, i32) {
    %c0_i32 = arith.constant 0 : i32
    %c0_i32_0 = arith.constant 0 : i32
    %c0_i32_1 = arith.constant 0 : i32
    return %arg0, %arg1, %c0_i32, %c0_i32_0 : i32, i32, i32, i32
  }
}

</mosaic_0001>

<bundles_post_ra>
// kernel: tpu_custom_call.1
= control target key start
LH: loop header
LB: loop body
LE: loop exit
PB: predicated region body
PF: predicated region fallthrough
CT: control target
= control target key end

     0   :  { %s3560_s28 = smov 0   ;;  %s3562_s29 = smov 0   ;;  %s5725_s0 = inlined_call_operand.vmem [shape: f32[2,16,16,8], index: 0, kind: input, shape index: {}]   ;;  %s5726_s1 = inlined_call_operand.vmem [shape: f32[2,16,16,8], index: 1, kind: input, shape index: {}]   ;;  %s5727_s2 = inlined_call_operand.vmem [shape: f32[2,16,16,8], index: 2, kind: input, shape index: {}]   ;;  %s5728_s3 = inlined_call_operand.vmem [shape: f32[8,42], index: 3, kind: input, shape index: {}]   ;;  %s5729_s4 = inlined_call_operand.vmem [shape: f32[1,42], index: 4, kind: input, shape index: {}]   ;;  %s5730_s5 = inlined_call_operand.vmem [shape: f32[9,42], index: 5, kind: input, shape index: {}]   ;;  %s5731_s6 = inlined_call_operand.vmem [shape: f32[1,42], index: 6, kind: input, shape index: {}]   ;;  %s5732_s7 = inlined_call_operand.vmem [shape: f32[21,8], index: 7, kind: input, shape index: {}]   ;;  %s5733_s8 = inlined_call_operand.vmem [shape: f32[1,8], index: 8, kind: input, shape index: {}]   ;;  %s5734_s9 = inlined_call_operand.vmem [shape: f32[2,16,16,8], index: 9, kind: output, shape index: {}]  }
   0x1   :  { %s3564_s30 = smov 0  }
   0x2 LB: > { %s31_s10 = sadd.s32 1, %s3501_s29  ;;  %p3218_p0 = scmp.ge.s32.totalorder %s3505_s30, 1  ;;  %s3505_s30 = sphi %s3564_s30, %s19_s30   ;;  %s3501_s29 = sphi %s3562_s29, %s6163_s29   ;;  %s3497_s28 = sphi %s3560_s28, %s6162_s28  }
   0x3   : > { %p33_p1 = scmp.ge.s32.totalorder %s31_s10, 2  ;;  %p373_p2 = scmp.lt.s32.totalorder %s3505_s30, 3 }
   0x5   : > { %s6165_s10 = smov (%p33_p1, %s31_s10), 0  ;;  %p374_p3 = pnand %p3218_p0, %p373_p2 }
   0x7   : > { %377 = sbr.rel (%p374_p3) target bundleno = 700 (0x2bc), region = 56 }
   0xc   : > { %v501_v0 = vld [vmem:[%s5728_s3] sm:$0xff]  ;;  %p463_p4 = scmp.lt.s32.totalorder %s3497_s28, 1  ;;  %vm594_vm0 = vcmask 64512   ;;  %vm503_vm1 = vcmask 343040   ;;  %v3507_v23 = vmov 0.0   ;;  %vm506_vm2 = vcmask 336896  }
   0xd   : > { %706 = vmatpush.msra.mxu0 %v501_v0  ;;  %3303 = vmatpush.msra.mxu3 %v501_v0  ;;  %508 = vst.msk [vmem:[#allocation2 + $0x18] sm:$0xff] %vm503_vm1, %v3507_v23  ;;  %v502_v31 = vld [vmem:[%s5729_s4] sm:$0x1]  ;;  %v3766_v41 = vld [vmem:[%s5730_s5 + $0x1] ss:$0 sm:$0xff]  ;;  %s3508_s23 = smov 107  }
   0xe   : > { %s6167_s28 = smov (!%p463_p4, %s3497_s28), 1  ;;  %509 = vst.msk [vmem:[#allocation2 + $0x20] sm:$0xff] %vm503_vm1, %v3507_v23  ;;  %v3719_v33 = vperm.slane %v502_v31, 0  ;;  %v3761_v40 = vld [vmem:[%s5730_s5] ss:$0 sm:$0xff]  ;;  %vm2927_vm3 = vcmask 1044480  }
   0xf   : > { %s3299_s13 = sshll.u32 %s6167_s28, 8  ;;  %504 = vst.msk [vmem:[#allocation2] sm:$0xff] %vm503_vm1, %v3507_v23  ;;  %v3779_v47 = vld [vmem:[%s5730_s5 + $0x2] ss:$0 sm:$0xff]  ;;  %v3797_v57 = vld [vmem:[%s5730_s5 + $0x3] ss:$0 sm:$0xff] }
  0x10   : > { %s3589_s16 = scalar_lea.vmem %s5726_s1, %s3299_s13  ;;  %505 = vst.msk [vmem:[#allocation2 + $0x8] sm:$0xff] %vm503_vm1, %v3507_v23  ;;  %vm2830_vm9 = vcmask 171008  }
  0x11   : > { %v559_v1 = vld [vmem:[%s3589_s16] sm:$0xff]  ;;  %v560_v2 = vld [vmem:[%s3589_s16 + $0x8] sm:$0xff]  ;;  %v561_v4 = vld [vmem:[%s3589_s16 + $0x10] sm:$0xff]  ;;  %511 = vst.msk [vmem:[#allocation2 + $0x30] sm:$0xff] %vm503_vm1, %v3507_v23 }
  0x12   : > { %3227 = vmatmul.msk.f32.vlgmr.msra.gmra.mxu0 %vm594_vm0, %v559_v1  ;;  %v576_v3 = vld [vmem:[%s3589_s16 + $0x88] sm:$0xff]  ;;  %v577_v5 = vld [vmem:[%s3589_s16 + $0x90] sm:$0xff]  ;;  %v562_v6 = vld [vmem:[%s3589_s16 + $0x18] sm:$0xff]  ;;  %512 = vst.msk [vmem:[#allocation2 + $0x38] sm:$0xff] %vm503_vm1, %v3507_v23 }
  0x13   : > { %3244 = vmatmul.msk.f32.vlgmr.msra.gmra.mxu3 %vm594_vm0, %v576_v3  ;;  %v578_v7 = vld [vmem:[%s3589_s16 + $0x98] sm:$0xff]  ;;  %v563_v8 = vld [vmem:[%s3589_s16 + $0x20] sm:$0xff]  ;;  %v564_v10 = vld [vmem:[%s3589_s16 + $0x28] sm:$0xff]  ;;  %514 = vst.msk [vmem:[#allocation2 + $0x48] sm:$0xff] %vm503_vm1, %v3507_v23 }
  0x14   : > { %v579_v9 = vld [vmem:[%s3589_s16 + $0xa0] sm:$0xff]  ;;  %v580_v11 = vld [vmem:[%s3589_s16 + $0xa8] sm:$0xff]  ;;  %v565_v12 = vld [vmem:[%s3589_s16 + $0x30] sm:$0xff]  ;;  %515 = vst.msk [vmem:[#allocation2 + $0x50] sm:$0xff] %vm503_vm1, %v3507_v23 }
  0x15   : > { %v581_v13 = vld [vmem:[%s3589_s16 + $0xb0] sm:$0xff]  ;;  %v566_v14 = vld [vmem:[%s3589_s16 + $0x38] sm:$0xff]  ;;  %v567_v16 = vld [vmem:[%s3589_s16 + $0x40] sm:$0xff]  ;;  %517 = vst.msk [vmem:[#allocation2 + $0x60] sm:$0xff] %vm503_vm1, %v3507_v23 }
  0x16   : > { %v582_v15 = vld [vmem:[%s3589_s16 + $0xb8] sm:$0xff]  ;;  %v568_v17 = vld [vmem:[%s3589_s16 + $0x48] sm:$0xff]  ;;  %v583_v18 = vld [vmem:[%s3589_s16 + $0xc0] sm:$0xff]  ;;  %518 = vst.msk [vmem:[#allocation2 + $0x68] sm:$0xff] %vm503_vm1, %v3507_v23 }
  0x17   : > { %v569_v19 = vld [vmem:[%s3589_s16 + $0x50] sm:$0xff]  ;;  %v584_v20 = vld [vmem:[%s3589_s16 + $0xc8] sm:$0xff]  ;;  %v570_v21 = vld [vmem:[%s3589_s16 + $0x58] sm:$0xff]  ;;  %520 = vst.msk [vmem:[#allocation2 + $0x78] sm:$0xff] %vm503_vm1, %v3507_v23 }
  0x18   : > { %v585_v22 = vld [vmem:[%s3589_s16 + $0xd0] sm:$0xff]  ;;  %v571_v24 = vld [vmem:[%s3589_s16 + $0x60] sm:$0xff]  ;;  %v586_v25 = vld [vmem:[%s3589_s16 + $0xd8] sm:$0xff]  ;;  %521 = vst.msk [vmem:[#allocation2 + $0x80] sm:$0xff] %vm503_vm1, %v3507_v23 }
  0x19   : > { %v572_v26 = vld [vmem:[%s3589_s16 + $0x68] sm:$0xff]  ;;  %523 = vst.msk [vmem:[#allocation2 + $0x90] sm:$0xff] %vm503_vm1, %v3507_v23  ;;  %v587_v27 = vld [vmem:[%s3589_s16 + $0xe0] sm:$0xff]  ;;  %v573_v28 = vld [vmem:[%s3589_s16 + $0x70] sm:$0xff] }
  0x1a   : > { %3228 = vmatmul.msk.f32.gmra.mxu0 %vm594_vm0, %v560_v2  ;;  %524 = vst.msk [vmem:[#allocation2 + $0x98] sm:$0xff] %vm503_vm1, %v3507_v23  ;;  %v588_v29 = vld [vmem:[%s3589_s16 + $0xe8] sm:$0xff]  ;;  %v574_v30 = vld [vmem:[%s3589_s16 + $0x78] sm:$0xff]  ;;  %v589_v32 = vld [vmem:[%s3589_s16 + $0xf0] sm:$0xff] }
  0x1b   : > { %3245 = vmatmul.msk.f32.gmra.mxu3 %vm594_vm0, %v577_v5  ;;  %526 = vst.msk [vmem:[#allocation2 + $0xa8] sm:$0xff] %vm503_vm1, %v3507_v23  ;;  %v575_v35 = vld [vmem:[%s3589_s16 + $0x80] sm:$0xff]  ;;  %v590_v37 = vld [vmem:[%s3589_s16 + $0xf8] sm:$0xff]  ;;  %v913_v44 = vld [vmem:[#allocation2 + $0x8] sm:$0xff]  ;;  %s5614_s16 = scalar_lea.vmem %s5734_s9, %s3299_s13 }
  0x1c   : > { %527 = vst.msk [vmem:[#allocation2 + $0xb0] sm:$0xff] %vm503_vm1, %v3507_v23  ;;  %v912_v42 = vld [vmem:[#allocation2] sm:$0xff]  ;;  %v947_v51 = vmul.f32 %v3761_v40, %v913_v44 }
  0x1d   : > { %529 = vst.msk [vmem:[#allocation2 + $0xc0] sm:$0xff] %vm503_vm1, %v3507_v23  ;;  %v1010_v43 = vld [vmem:[#allocation2 + $0x1] sm:$0xff]  ;;  %v946_v48 = vmul.f32 %v3761_v40, %v912_v42 }
  0x1e   : > { %530 = vst.msk [vmem:[#allocation2 + $0xc8] sm:$0xff] %vm503_vm1, %v3507_v23  ;;  %v1044_v49 = vmul.f32 %v3766_v41, %v1010_v43  ;;  %v1108_v53 = vld [vmem:[#allocation2 + $0x2] sm:$0xff] }
  0x1f   : > { %532 = vst.msk [vmem:[#allocation2 + $0xd8] sm:$0xff] %vm503_vm1, %v3507_v23  ;;  %v1142_v59 = vmul.f32 %v3779_v47, %v1108_v53 }
  0x20   : > { %533 = vst.msk [vmem:[#allocation2 + $0xe0] sm:$0xff] %vm503_vm1, %v3507_v23  ;;  %v1076_v58 = vadd.f32 %v1044_v49, %v946_v48 }
  0x21   : > { %535 = vst.msk [vmem:[#allocation2 + $0xf0] sm:$0xff] %vm503_vm1, %v3507_v23 }
  0x22   : > { %3229 = vmatmul.msk.f32.gmra.mxu0 %vm594_vm0, %v561_v4  ;;  %536 = vst.msk [vmem:[#allocation2 + $0xf8] sm:$0xff] %vm503_vm1, %v3507_v23  ;;  %v1174_v1 = vadd.f32 %v1142_v59, %v1076_v58 }
  0x23   : > { %3246 = vmatmul.msk.f32.gmra.mxu3 %vm594_vm0, %v578_v7  ;;  %538 = vst.msk [vmem:[#allocation2 + $0x108] sm:$0xff] %vm503_vm1, %v3507_v23  ;;  %v3813_v7 = vld [vmem:[%s5730_s5 + $0x5] ss:$0 sm:$0xff] }
  0x24   : > { %539 = vst.msk [vmem:[#allocation2 + $0x110] sm:$0xff] %vm503_vm1, %v3507_v23 }
  0x25   : > { %541 = vst.msk [vmem:[#allocation2 + $0x120] sm:$0xff] %vm503_vm1, %v3507_v23 }
  0x26   : > { %542 = vst.msk [vmem:[#allocation2 + $0x128] sm:$0xff] %vm503_vm1, %v3507_v23 }
  0x27   : > { %544 = vst.msk [vmem:[#allocation2 + $0x138] sm:$0xff] %vm503_vm1, %v3507_v23 }
  0x28   : > { %545 = vst.msk [vmem:[#allocation2 + $0x140] sm:$0xff] %vm503_vm1, %v3507_v23 }
  0x29   : > { %547 = vst.msk [vmem:[#allocation2 + $0x150] sm:$0xff] %vm503_vm1, %v3507_v23 }
  0x2a   : > { %3230 = vmatmul.msk.f32.gmra.mxu0 %vm594_vm0, %v562_v6  ;;  %548 = vst.msk [vmem:[#allocation2 + $0x158] sm:$0xff] %vm503_vm1, %v3507_v23  ;;  %v3808_v6 = vld [vmem:[%s5730_s5 + $0x4] ss:$0 sm:$0xff] }
  0x2b   : > { %3247 = vmatmul.msk.f32.gmra.mxu3 %vm594_vm0, %v579_v9  ;;  %550 = vst.msk [vmem:[#allocation2 + $0x168] sm:$0xff] %vm503_vm1, %v3507_v23 }
  0x2c   : > { %551 = vst.msk [vmem:[#allocation2 + $0x170] sm:$0xff] %vm503_vm1, %v3507_v23 }
  0x2d   : > { %553 = vst.msk [vmem:[#allocation2 + $0x180] sm:$0xff] %vm503_vm1, %v3507_v23 }
  0x2e   : > { %554 = vst.msk [vmem:[#allocation2 + $0x188] sm:$0xff] %vm503_vm1, %v3507_v23 }
  0x2f   : > { %556 = vst.msk [vmem:[#allocation2 + $0x198] sm:$0xff] %vm503_vm1, %v3507_v23 }
  0x30   : > { %557 = vst.msk [vmem:[#allocation2 + $0x1a0] sm:$0xff] %vm503_vm1, %v3507_v23 }
  0x31   : > { %510 = vst.msk [vmem:[#allocation2 + $0x28] sm:$0x3] %vm506_vm2, %v3507_v23 }
  0x32   : > { %3231 = vmatmul.msk.f32.gmra.mxu0 %vm594_vm0, %v563_v8  ;;  %507 = vst.msk [vmem:[#allocation2 + $0x10] sm:$0x3] %vm506_vm2, %v3507_v23 }
  0x33   : > { %3248 = vmatmul.msk.f32.gmra.mxu3 %vm594_vm0, %v580_v11  ;;  %513 = vst.msk [vmem:[#allocation2 + $0x40] sm:$0x3] %vm506_vm2, %v3507_v23 }
  0x34   : > { %516 = vst.msk [vmem:[#allocation2 + $0x58] sm:$0x3] %vm506_vm2, %v3507_v23 }
  0x35   : > { %519 = vst.msk [vmem:[#allocation2 + $0x70] sm:$0x3] %vm506_vm2, %v3507_v23 }
  0x36   : > { %522 = vst.msk [vmem:[#allocation2 + $0x88] sm:$0x3] %vm506_vm2, %v3507_v23 }
  0x37   : > { %525 = vst.msk [vmem:[#allocation2 + $0xa0] sm:$0x3] %vm506_vm2, %v3507_v23 }
  0x38   : > { %528 = vst.msk [vmem:[#allocation2 + $0xb8] sm:$0x3] %vm506_vm2, %v3507_v23 }
  0x39   : > { %531 = vst.msk [vmem:[#allocation2 + $0xd0] sm:$0x3] %vm506_vm2, %v3507_v23  ;;  %v1011_v45 = vld [vmem:[#allocation2 + $0x9] sm:$0xff] }
  0x3a   : > { %3232 = vmatmul.msk.f32.gmra.mxu0 %vm594_vm0, %v564_v10  ;;  %534 = vst.msk [vmem:[#allocation2 + $0xe8] sm:$0x3] %vm506_vm2, %v3507_v23  ;;  %v1045_v52 = vmul.f32 %v3766_v41, %v1011_v45  ;;  %v1109_v54 = vld [vmem:[#allocation2 + $0xa] sm:$0xff] }
  0x3b   : > { %3249 = vmatmul.msk.f32.gmra.mxu3 %vm594_vm0, %v581_v13  ;;  %537 = vst.msk [vmem:[#allocation2 + $0x100] sm:$0x3] %vm506_vm2, %v3507_v23  ;;  %v1143_v61 = vmul.f32 %v3779_v47, %v1109_v54 }
  0x3c   : > { %540 = vst.msk [vmem:[#allocation2 + $0x118] sm:$0x3] %vm506_vm2, %v3507_v23  ;;  %v1077_v60 = vadd.f32 %v1045_v52, %v947_v51 }
  0x3d   : > { %543 = vst.msk [vmem:[#allocation2 + $0x130] sm:$0x3] %vm506_vm2, %v3507_v23 }
  0x3e   : > { %546 = vst.msk [vmem:[#allocation2 + $0x148] sm:$0x3] %vm506_vm2, %v3507_v23  ;;  %v1175_v4 = vadd.f32 %v1143_v61, %v1077_v60  ;;  %v3866_v61 = vld [vmem:[%s5731_s6] ss:$0 sm:$0xff] }
  0x3f   : > { %549 = vst.msk [vmem:[#allocation2 + $0x160] sm:$0x3] %vm506_vm2, %v3507_v23 }
  0x40   : > { %552 = vst.msk [vmem:[#allocation2 + $0x178] sm:$0x3] %vm506_vm2, %v3507_v23 }
  0x41   : > { %555 = vst.msk [vmem:[#allocation2 + $0x190] sm:$0x3] %vm506_vm2, %v3507_v23 }
  0x42   : > { %3233 = vmatmul.msk.f32.gmra.mxu0 %vm594_vm0, %v565_v12  ;;  %558 = vst.msk [vmem:[#allocation2 + $0x1a8] sm:$0x3] %vm506_vm2, %v3507_v23  ;;  %v3820_v12 = vld [vmem:[%s5730_s5 + $0x6] ss:$0 sm:$0xff] }
  0x43   : > { %3250 = vmatmul.msk.f32.gmra.mxu3 %vm594_vm0, %v582_v15 }
  0x4a   : > { %3234 = vmatmul.msk.f32.gmra.mxu0 %vm594_vm0, %v566_v14 }
  0x4b   : > { %3251 = vmatmul.msk.f32.gmra.mxu3 %vm594_vm0, %v583_v18 }
  0x52   : > { %3235 = vmatmul.msk.f32.gmra.mxu0 %vm594_vm0, %v567_v16 }
  0x53   : > { %3252 = vmatmul.msk.f32.gmra.mxu3 %vm594_vm0, %v584_v20 }
  0x5a   : > { %3236 = vmatmul.msk.f32.gmra.mxu0 %vm594_vm0, %v568_v17 }
  0x5b   : > { %3253 = vmatmul.msk.f32.gmra.mxu3 %vm594_vm0, %v585_v22 }
  0x62   : > { %3237 = vmatmul.msk.f32.gmra.mxu0 %vm594_vm0, %v569_v19 }
  0x63   : > { %3254 = vmatmul.msk.f32.gmra.mxu3 %vm594_vm0, %v586_v25 }
  0x6a   : > { %3238 = vmatmul.msk.f32.gmra.mxu0 %vm594_vm0, %v570_v21 }
  0x6b   : > { %3255 = vmatmul.msk.f32.gmra.mxu3 %vm594_vm0, %v587_v27 }
  0x72   : > { %3239 = vmatmul.msk.f32.gmra.mxu0 %vm594_vm0, %v571_v24 }
  0x73   : > { %3256 = vmatmul.msk.f32.gmra.mxu3 %vm594_vm0, %v588_v29  ;;  %v3841_v29 = vld [vmem:[%s5730_s5 + $0x8] ss:$0 sm:$0xff] }
  0x7a   : > { %3240 = vmatmul.msk.f32.gmra.mxu0 %vm594_vm0, %v572_v26 }
  0x7b   : > { %3257 = vmatmul.msk.f32.gmra.mxu3 %vm594_vm0, %v589_v32 }
  0x82   : > { %3241 = vmatmul.msk.f32.gmra.mxu0 %vm594_vm0, %v573_v28  ;;  %v3836_v28 = vld [vmem:[%s5730_s5 + $0x7] ss:$0 sm:$0xff] }
  0x83   : > { %3258 = vmatmul.msk.f32.gmra.mxu3 %vm594_vm0, %v590_v37 }
  0x8a   : > { %3242 = vmatmul.msk.f32.gmra.mxu0 %vm594_vm0, %v574_v30 }
  0x8f   : > { %v708_v34 = vpop.f32.mrf.mxu0 }
  0x90   : > { %v709_v36 = vadd.f32 %v708_v34, %v3719_v33 }
  0x92   : > { %805 = vst.msk [vmem:[#allocation2 + $0x19] sm:$0xff] %vm503_vm1, %v709_v36  ;;  %3243 = vmatmul.msk.f32.gmra.mxu0 %vm594_vm0, %v575_v35 }
  0x96   : > { %v759_v55 = vpop.f32.mrf.mxu3 }
  0x97   : > { %v711_v38 = vpop.f32.mrf.mxu0  ;;  %v760_v56 = vadd.f32 %v759_v55, %v3719_v33 }
  0x98   : > { %v712_v39 = vadd.f32 %v711_v38, %v3719_v33 }
  0x99   : > { %v1206_v62 = vld [vmem:[#allocation2 + $0x18] sm:$0xff]  ;;  %822 = vst.msk [vmem:[#allocation2 + $0xe1] sm:$0xff] %vm503_vm1, %v760_v56 }
  0x9a   : > { %806 = vst.msk [vmem:[#allocation2 + $0x21] sm:$0xff] %vm503_vm1, %v712_v39  ;;  %v1240_v2 = vmul.f32 %v3797_v57, %v1206_v62  ;;  %v1304_v9 = vld [vmem:[#allocation2 + $0x19] sm:$0xff]  ;;  %v948_v24 = vmul.f32 %v3761_v40, %v1206_v62 }
  0x9b   : > { %v1338_v17 = vmul.f32 %v3808_v6, %v1304_v9  ;;  %v1046_v25 = vmul.f32 %v3766_v41, %v1304_v9 }
  0x9c   : > { %v1272_v14 = vadd.f32 %v1240_v2, %v1174_v1 }
  0x9d   : > { %v1078_v43 = vadd.f32 %v1046_v25, %v948_v24 }
  0x9e   : > { %v762_v8 = vpop.f32.mrf.mxu3  ;;  %v1370_v22 = vadd.f32 %v1338_v17, %v1272_v14 }
  0x9f   : > { %v714_v46 = vpop.f32.mrf.mxu0  ;;  %v763_v11 = vadd.f32 %v762_v8, %v3719_v33 }
  0xa0   : > { %v715_v50 = vadd.f32 %v714_v46, %v3719_v33 }
  0xa1   : > { %v1207_v63 = vld [vmem:[#allocation2 + $0x20] sm:$0xff]  ;;  %823 = vst.msk [vmem:[#allocation2 + $0xf1] sm:$0xff] %vm503_vm1, %v763_v11 }
  0xa2   : > { %807 = vst.msk [vmem:[#allocation2 + $0x31] sm:$0xff] %vm503_vm1, %v715_v50  ;;  %v1241_v5 = vmul.f32 %v3797_v57, %v1207_v63  ;;  %v1402_v10 = vld [vmem:[#allocation2 + $0x1a] sm:$0xff]  ;;  %v1403_v21 = vld [vmem:[#allocation2 + $0x22] sm:$0xff]  ;;  %v949_v46 = vmul.f32 %v3761_v40, %v1207_v63 }
  0xa3   : > { %v1305_v13 = vld [vmem:[#allocation2 + $0x21] sm:$0xff]  ;;  %v1436_v18 = vmul.f32 %v3813_v7, %v1402_v10  ;;  %v1437_v34 = vmul.f32 %v3813_v7, %v1403_v21  ;;  %v1144_v38 = vmul.f32 %v3779_v47, %v1402_v10  ;;  %v1145_v1 = vmul.f32 %v3779_v47, %v1403_v21 }
  0xa4   : > { %v1273_v15 = vadd.f32 %v1241_v5, %v1175_v4  ;;  %v1339_v19 = vmul.f32 %v3808_v6, %v1305_v13  ;;  %v1047_v48 = vmul.f32 %v3766_v41, %v1305_v13 }
  0xa5   : > { %v1468_v31 = vadd.f32 %v1436_v18, %v1370_v22  ;;  %v1176_v53 = vadd.f32 %v1144_v38, %v1078_v43 }
  0xa6   : > { %v1371_v27 = vadd.f32 %v1339_v19, %v1273_v15  ;;  %v765_v32 = vpop.f32.mrf.mxu3  ;;  %v1079_v60 = vadd.f32 %v1047_v48, %v949_v46 }
  0xa7   : > { %v717_v0 = vpop.f32.mrf.mxu0  ;;  %v766_v39 = vadd.f32 %v765_v32, %v3719_v33 }
  0xa8   : > { %v718_v3 = vadd.f32 %v717_v0, %v3719_v33  ;;  %v1469_v44 = vadd.f32 %v1437_v34, %v1371_v27  ;;  %v1177_v14 = vadd.f32 %v1145_v1, %v1079_v60 }
  0xa9   : > { %v3822_v16 = vld [vmem:[#allocation2 + $0x30] sm:$0xff]  ;;  %824 = vst.msk [vmem:[#allocation2 + $0xf9] sm:$0xff] %vm503_vm1, %v766_v39 }
  0xaa   : > { %808 = vst.msk [vmem:[#allocation2 + $0x39] sm:$0xff] %vm503_vm1, %v718_v3  ;;  %v1535_v23 = vmul.f32 %v3820_v12, %v3822_v16  ;;  %v1599_v36 = vld [vmem:[#allocation2 + $0x31] sm:$0xff]  ;;  %v1242_v45 = vmul.f32 %v3797_v57, %v3822_v16 }
  0xab   : > { %v1633_v50 = vmul.f32 %v3836_v28, %v1599_v36  ;;  %v1340_v4 = vmul.f32 %v3808_v6, %v1599_v36  ;;  %v1048_v43 = vmul.f32 %v3766_v41, %v1599_v36 }
  0xac   : > { %v1567_v42 = vadd.f32 %v1535_v23, %v1468_v31  ;;  %v1274_v59 = vadd.f32 %v1242_v45, %v1176_v53  ;;  %v950_v31 = vmul.f32 %v3761_v40, %v3822_v16 }
  0xae   : > { %v1665_v55 = vadd.f32 %v1633_v50, %v1567_v42  ;;  %v768_v2 = vpop.f32.mrf.mxu3  ;;  %v1372_v11 = vadd.f32 %v1340_v4, %v1274_v59 }
  0xaf   : > { %v720_v20 = vpop.f32.mrf.mxu0  ;;  %v769_v9 = vadd.f32 %v768_v2, %v3719_v33 }
  0xb0   : > { %v721_v26 = vadd.f32 %v720_v20, %v3719_v33 }
  0xb1   : > { %v3843_v30 = vld [vmem:[#allocation2 + $0x38] sm:$0xff]  ;;  %825 = vst.msk [vmem:[#allocation2 + $0x109] sm:$0xff] %vm503_vm1, %v769_v9 }
  0xb2   : > { %809 = vst.msk [vmem:[#allocation2 + $0x49] sm:$0xff] %vm503_vm1, %v721_v26  ;;  %v1536_v35 = vmul.f32 %v3820_v12, %v3843_v30  ;;  %v3849_v37 = vld [vmem:[#allocation2 + $0x32] sm:$0xff]  ;;  %v1698_v62 = vld [vmem:[#allocation2 + $0x3a] sm:$0xff]  ;;  %v1243_v8 = vmul.f32 %v3797_v57, %v3843_v30 }
  0xb3   : > { %v1600_v49 = vld [vmem:[#allocation2 + $0x39] sm:$0xff]  ;;  %v1731_v51 = vmul.f32 %v3841_v29, %v3849_v37  ;;  %v1438_v5 = vmul.f32 %v3813_v7, %v3849_v37  ;;  %v1732_v10 = vmul.f32 %v3841_v29, %v1698_v62  ;;  %v1439_v46 = vmul.f32 %v3813_v7, %v1698_v62 }
  0xb4   : > { %v1568_v52 = vadd.f32 %v1536_v35, %v1469_v44  ;;  %v1634_v58 = vmul.f32 %v3836_v28, %v1600_v49  ;;  %v1275_v19 = vadd.f32 %v1243_v8, %v1177_v14  ;;  %v1341_v24 = vmul.f32 %v3808_v6, %v1600_v49 }
  0xb5   : > { %v1763_v63 = vadd.f32 %v1731_v51, %v1665_v55  ;;  %v1470_v18 = vadd.f32 %v1438_v5, %v1372_v11  ;;  %v951_v44 = vmul.f32 %v3761_v40, %v3843_v30  ;;  %v1049_v16 = vmul.f32 %v3766_v41, %v1600_v49 }
  0xb6   : > { %v1666_v3 = vadd.f32 %v1634_v58, %v1568_v52  ;;  %v771_v32 = vpop.f32.mrf.mxu3  ;;  %v1373_v39 = vadd.f32 %v1341_v24, %v1275_v19  ;;  %v1146_v51 = vmul.f32 %v3779_v47, %v3849_v37  ;;  %v1080_v49 = vadd.f32 %v1048_v43, %v950_v31 }
  0xb7   : > { %v723_v54 = vpop.f32.mrf.mxu0  ;;  %v3883_v15 = vadd.f32 %v3866_v61, %v1763_v63  ;;  %v772_v42 = vadd.f32 %v771_v32, %v3719_v33  ;;  %v1147_v1 = vmul.f32 %v3779_v47, %v1698_v62 }
  0xb8   : > { %v724_v56 = vadd.f32 %v723_v54, %v3719_v33  ;;  %v1764_v17 = vadd.f32 %v1732_v10, %v1666_v3  ;;  %v1471_v53 = vadd.f32 %v1439_v46, %v1373_v39  ;;  %v1178_v63 = vadd.f32 %v1146_v51, %v1080_v49  ;;  %v3958_v49 = vld [vmem:[#allocation2 + $0xf1] sm:$0xff] }
  0xb9   : > { %v3868_v0 = vld [vmem:[#allocation2 + $0x48] sm:$0xff]  ;;  %5882 = vst [vmem:[#allocation3_spill] sm:$0xff] %v3883_v15  ;;  %v3888_v25 = vmul.f32 0.70710677, %v3883_v15 }
  0xba   : > { %810 = vst.msk [vmem:[#allocation2 + $0x51] sm:$0xff] %vm503_vm1, %v724_v56  ;;  %v1537_v13 = vmul.f32 %v3820_v12, %v3868_v0  ;;  %v1601_v21 = vld [vmem:[#allocation2 + $0x49] sm:$0xff]  ;;  %v3894_v34 = vadd.f32 %v3866_v61, %v1764_v17  ;;  %v1244_v55 = vmul.f32 %v3797_v57, %v3868_v0  ;;  %v1081_v56 = vadd.f32 %v1049_v16, %v951_v44 }
  0xbb   : > { %5883 = vst [vmem:[#allocation4_spill] sm:$0xff] %v3888_v25  ;;  %v1635_v35 = vmul.f32 %v3836_v28, %v1601_v21  ;;  %v1959_v50 = vand.u32 2147483647, %v3888_v25  ;;  %v1342_v62 = vmul.f32 %v3808_v6, %v1601_v21  ;;  %v952_v14 = vmul.f32 %v3761_v40, %v3868_v0 }
  0xbc   : > { %v1569_v23 = vadd.f32 %v1537_v13, %v1470_v18  ;;  %5884 = vst [vmem:[#allocation5_spill] sm:$0xff] %v3894_v34  ;;  %v3910_v52 = vmul.f32 0.70710677, %v3894_v34  ;;  %v1276_v10 = vadd.f32 %v1244_v55, %v1178_v63  ;;  %v1179_v11 = vadd.f32 %v1147_v1, %v1081_v56 }
  0xbd   : > { %826 = vst.msk [vmem:[#allocation2 + $0x111] sm:$0xff] %vm503_vm1, %v772_v42  ;;  %v1991_v60 = vmul.f32 0.3275911, %v1959_v50  ;;  %v2375_v18 = vsub.f32 0.0, %v1959_v50 }
  0xbe   : > { %v1667_v45 = vadd.f32 %v1635_v35, %v1569_v23  ;;  %5885 = vst [vmem:[#allocation6_spill] sm:$0xff] %v3910_v52  ;;  %v774_v2 = vpop.f32.mrf.mxu3  ;;  %v1960_v3 = vand.u32 2147483647, %v3910_v52  ;;  %v1374_v35 = vadd.f32 %v1342_v62, %v1276_v10 }
  0xbf   : > { %v726_v20 = vpop.f32.mrf.mxu0  ;;  %v775_v8 = vadd.f32 %v774_v2, %v3719_v33  ;;  %v2023_v17 = vadd.f32 1.0, %v1991_v60 }
  0xc0   : > { %v727_v22 = vadd.f32 %v726_v20, %v3719_v33  ;;  %v1050_v20 = vmul.f32 %v3766_v41, %v1601_v21  ;;  %v2376_v23 = vsub.f32 0.0, %v1960_v3 }
  0xc1   : > { %v1699_v26 = vld [vmem:[#allocation2 + $0x4a] sm:$0xff]  ;;  %v1700_v9 = vld [vmem:[#allocation2 + $0x52] sm:$0xff]  ;;  %827 = vst.msk [vmem:[#allocation2 + $0x121] sm:$0xff] %vm503_vm1, %v775_v8  ;;  %3345 = vrcp.f32 %v2023_v17 }
  0xc2   : > { %v1504_v27 = vld [vmem:[#allocation2 + $0x50] sm:$0xff]  ;;  %811 = vst.msk [vmem:[#allocation2 + $0x61] sm:$0xff] %vm503_vm1, %v727_v22  ;;  %v1733_v38 = vmul.f32 %v3841_v29, %v1699_v26  ;;  %v1992_v22 = vmul.f32 0.3275911, %v1960_v3  ;;  %v1734_v31 = vmul.f32 %v3841_v29, %v1700_v9  ;;  %v1148_v42 = vmul.f32 %v3779_v47, %v1699_v26 }
  0xc3   : > { %v1538_v48 = vmul.f32 %v3820_v12, %v1504_v27  ;;  %v1602_v54 = vld [vmem:[#allocation2 + $0x51] sm:$0xff]  ;;  %v1245_v37 = vmul.f32 %v3797_v57, %v1504_v27  ;;  %v953_v44 = vmul.f32 %v3761_v40, %v1504_v27  ;;  %v1441_v56 = vmul.f32 %v3813_v7, %v1700_v9 }
  0xc4   : > { %v1765_v36 = vadd.f32 %v1733_v38, %v1667_v45  ;;  %v1636_v5 = vmul.f32 %v3836_v28, %v1602_v54  ;;  %v1440_v38 = vmul.f32 %v3813_v7, %v1699_v26  ;;  %v1343_v0 = vmul.f32 %v3808_v6, %v1602_v54  ;;  %v3976_v8 = vld [vmem:[#allocation2 + $0xf2] sm:$0xff] }
  0xc5   : > { %v1570_v59 = vadd.f32 %v1538_v48, %v1471_v53  ;;  %v1277_v19 = vadd.f32 %v1245_v37, %v1179_v11  ;;  %v1051_v16 = vmul.f32 %v3766_v41, %v1602_v54  ;;  %v3941_v45 = vmul.f32 %v2375_v18, %v1959_v50  ;;  %v3956_v54 = vld [vmem:[#allocation2 + $0xf0] sm:$0xff] }
  0xc6   : > { %v3920_v4 = vadd.f32 %v3866_v61, %v1765_v36  ;;  %v1082_v48 = vadd.f32 %v1050_v20, %v952_v14  ;;  %v777_v51 = vpop.f32.mrf.mxu3  ;;  %v3944_v36 = vadd.f32 1.0, %v1992_v22  ;;  %v3946_v53 = vmul.f32 %v2376_v23, %v1960_v3  ;;  %v3972_v3 = vld [vmem:[#allocation2 + $0xf8] sm:$0xff]  ;;  %v3994_v23 = vld [vmem:[#allocation2 + $0x108] sm:$0xff] }
  0xc7   : > { %v729_v30 = vpop.f32.mrf.mxu0  ;;  %v1668_v13 = vadd.f32 %v1636_v5, %v1570_v59  ;;  %5888 = vst [vmem:[#allocation9_spill] sm:$0xff] %v3941_v45  ;;  %v1375_v46 = vadd.f32 %v1343_v0, %v1277_v19  ;;  %v778_v50 = vadd.f32 %v777_v51, %v3719_v33  ;;  %v1472_v55 = vadd.f32 %v1440_v38, %v1374_v35  ;;  %v3974_v5 = vld [vmem:[#allocation2 + $0xf9] sm:$0xff]  ;;  %v3990_v19 = vpop.eup %3345 }
  0xc8   : > { %v730_v58 = vadd.f32 %v729_v30, %v3719_v33  ;;  %5886 = vst [vmem:[#allocation7_spill] sm:$0xff] %v3920_v4  ;;  %v3930_v24 = vmul.f32 0.70710677, %v3920_v4  ;;  %v1083_v37 = vadd.f32 %v1051_v16, %v953_v44  ;;  %v1149_v2 = vmul.f32 %v3779_v47, %v1700_v9  ;;  %v3992_v22 = vld [vmem:[#allocation2 + $0xfa] sm:$0xff]  ;;  %v4007_v44 = vld [vmem:[#allocation2 + $0x109] sm:$0xff]  ;;  %v4041_v52 = vld [vmem:[#allocation2 + $0x112] sm:$0xff] }
  0xc9   : > { %v3934_v39 = vld [vmem:[#allocation2 + $0x60] sm:$0xff]  ;;  %v1766_v21 = vadd.f32 %v1734_v31, %v1668_v13  ;;  %5889 = vst [vmem:[#allocation10_spill] sm:$0xff] %v3946_v53  ;;  %v966_v10 = vmul.f32 %v3761_v40, %v3956_v54  ;;  %v1064_v11 = vmul.f32 %v3766_v41, %v3958_v49  ;;  %v1473_v62 = vadd.f32 %v1441_v56, %v1375_v46 }
  0xca   : > { %812 = vst.msk [vmem:[#allocation2 + $0x69] sm:$0xff] %vm503_vm1, %v730_v58  ;;  %v3949_v26 = vand.u32 2147483647, %v3930_v24  ;;  %v3951_v30 = vld [vmem:[#allocation2 + $0x61] sm:$0xff]  ;;  %v1246_v27 = vmul.f32 %v3797_v57, %v3934_v39  ;;  %v1180_v58 = vadd.f32 %v1148_v42, %v1082_v48  ;;  %v1539_v60 = vmul.f32 %v3820_v12, %v3934_v39 }
  0xcb   : > { %5887 = vst [vmem:[#allocation8_spill] sm:$0xff] %v3930_v24  ;;  %v3962_v59 = vadd.f32 %v3866_v61, %v1766_v21  ;;  %v1637_v13 = vmul.f32 %v3836_v28, %v3951_v30  ;;  %v1344_v18 = vmul.f32 %v3808_v6, %v3951_v30  ;;  %v1096_v31 = vadd.f32 %v1064_v11, %v966_v10  ;;  %v4025_v10 = vld [vmem:[#allocation2 + $0x10a] sm:$0xff]  ;;  %v4043_v45 = vld [vmem:[#allocation2 + $0x120] sm:$0xff] }
  0xcc   : > { %828 = vst.msk [vmem:[#allocation2 + $0x129] sm:$0xff] %vm503_vm1, %v778_v50  ;;  %v3985_v9 = vmul.f32 0.3275911, %v3949_v26  ;;  %v1278_v17 = vadd.f32 %v1246_v27, %v1180_v58  ;;  %v967_v35 = vmul.f32 %v3761_v40, %v3972_v3  ;;  %v1065_v38 = vmul.f32 %v3766_v41, %v3974_v5  ;;  %v4016_v50 = vld [vmem:[#allocation2 + $0x110] sm:$0xff] }
  0xcd   : > { %5890 = vst [vmem:[#allocation11_spill] sm:$0xff] %v3962_v59  ;;  %v1571_v42 = vadd.f32 %v1539_v60, %v1472_v55  ;;  %v1260_v46 = vmul.f32 %v3797_v57, %v3994_v23  ;;  %v1163_v51 = vmul.f32 %v3779_v47, %v3992_v22  ;;  %v4019_v55 = vmul.f32 0.70710677, %v3962_v59 }
  0xce   : > { %5891 = vst [vmem:[#allocation12_spill] sm:$0xff] %v3990_v19  ;;  %v1097_v48 = vadd.f32 %v1065_v38, %v967_v35  ;;  %v1376_v58 = vadd.f32 %v1344_v18, %v1278_v17  ;;  %v4033_v38 = vld [vmem:[#allocation2 + $0x111] sm:$0xff]  ;;  %v954_v15 = vmul.f32 %v3761_v40, %v3934_v39  ;;  %3347 = vrcp.f32 %v3944_v36 }
  0xcf   : > { %v732_v32 = vpop.f32.mrf.mxu0  ;;  %5892 = vst [vmem:[#allocation13_spill] sm:$0xff] %v3992_v22  ;;  %v968_v36 = vmul.f32 %v3761_v40, %v3994_v23 }
  0xd0   : > { %v733_v43 = vadd.f32 %v732_v32, %v3719_v33  ;;  %5893 = vst [vmem:[#allocation14_spill] sm:$0xff] %v3994_v23  ;;  %v1162_v32 = vmul.f32 %v3779_v47, %v3976_v8 }
  0xd1   : > { %v3966_v63 = vld [vmem:[#allocation2 + $0x62] sm:$0xff]  ;;  %5894 = vst [vmem:[#allocation15_spill] sm:$0xff] %v4007_v44 }
  0xd2   : > { %813 = vst.msk [vmem:[#allocation2 + $0x79] sm:$0xff] %vm503_vm1, %v733_v43  ;;  %v3968_v1 = vld [vmem:[#allocation2 + $0x68] sm:$0xff]  ;;  %v1442_v21 = vmul.f32 %v3813_v7, %v3966_v63  ;;  %v1194_v16 = vadd.f32 %v1162_v32, %v1096_v31  ;;  %v1735_v56 = vmul.f32 %v3841_v29, %v3966_v63  ;;  %v1195_v31 = vadd.f32 %v1163_v51, %v1097_v48  ;;  %v780_v51 = vpop.f32.mrf.mxu3 }
  0xd3   : > { %v1540_v43 = vmul.f32 %v3820_v12, %v3968_v1  ;;  %5896 = vst [vmem:[#allocation17_spill] sm:$0xff] %v4016_v50  ;;  %v1261_v32 = vmul.f32 %v3797_v57, %v4016_v50  ;;  %v4031_v35 = vld [vmem:[#allocation2 + $0x69] sm:$0xff]  ;;  %v1247_v18 = vmul.f32 %v3797_v57, %v3968_v1  ;;  %v1359_v48 = vmul.f32 %v3808_v6, %v4033_v38 }
  0xd4   : > { %5897 = vst [vmem:[#allocation18_spill] sm:$0xff] %v4019_v55  ;;  %v1292_v11 = vadd.f32 %v1260_v46, %v1194_v16  ;;  %v1474_v17 = vadd.f32 %v1442_v21, %v1376_v58  ;;  %v1456_v16 = vmul.f32 %v3813_v7, %v4025_v10  ;;  %v781_v58 = vadd.f32 %v780_v51, %v3719_v33  ;;  %v4071_v51 = vld [vmem:[#allocation2 + $0x122] sm:$0xff]  ;;  %v4087_v24 = vld [vmem:[#allocation2 + $0x12a] sm:$0xff] }
  0xd5   : > { %5898 = vst [vmem:[#allocation19_spill] sm:$0xff] %v4025_v10  ;;  %v1572_v14 = vadd.f32 %v1540_v43, %v1473_v62  ;;  %v1293_v46 = vadd.f32 %v1261_v32, %v1195_v31  ;;  %v1181_v43 = vadd.f32 %v1149_v2, %v1083_v37  ;;  %v4052_v32 = vld [vmem:[#allocation2 + $0x6a] sm:$0xff]  ;;  %v1459_v23 = vmul.f32 %v3813_v7, %v4087_v24 }
  0xd6   : > { %5899 = vst [vmem:[#allocation20_spill] sm:$0xff] %v4033_v38 }
  0xd7   : > { %v735_v20 = vpop.f32.mrf.mxu0  ;;  %5900 = vst [vmem:[#allocation21_spill] sm:$0xff] %v4041_v52  ;;  %v1391_v31 = vadd.f32 %v1359_v48, %v1293_v46  ;;  %v1279_v2 = vadd.f32 %v1247_v18, %v1181_v43  ;;  %v4073_v18 = vld [vmem:[#allocation2 + $0x129] sm:$0xff] }
  0xd8   : > { %v736_v0 = vadd.f32 %v735_v20, %v3719_v33  ;;  %v1358_v20 = vmul.f32 %v3808_v6, %v4007_v44  ;;  %829 = vst.msk [vmem:[#allocation2 + $0x139] sm:$0xff] %vm503_vm1, %v781_v58 }
  0xd9   : > { %v4013_v27 = vld [vmem:[#allocation2 + $0x78] sm:$0xff] }
  0xda   : > { %5895 = vst [vmem:[#allocation16_spill] sm:$0xff] %v4013_v27  ;;  %v1541_v60 = vmul.f32 %v3820_v12, %v4013_v27  ;;  %v1390_v25 = vadd.f32 %v1358_v20, %v1292_v11  ;;  %v1555_v20 = vmul.f32 %v3820_v12, %v4043_v45 }
  0xdb   : > { %814 = vst.msk [vmem:[#allocation2 + $0x81] sm:$0xff] %vm503_vm1, %v736_v0  ;;  %v1669_v0 = vadd.f32 %v1637_v13, %v1571_v42  ;;  %v1638_v13 = vmul.f32 %v3836_v28, %v4031_v35  ;;  %v4047_v42 = vld [vmem:[#allocation2 + $0x79] sm:$0xff] }
  0xdc   : > { %v1573_v62 = vadd.f32 %v1541_v60, %v1474_v17  ;;  %v1488_v11 = vadd.f32 %v1456_v16, %v1390_v25  ;;  %v1457_v60 = vmul.f32 %v3813_v7, %v4041_v52  ;;  %v1639_v46 = vmul.f32 %v3836_v28, %v4047_v42 }
  0xdd   : > { %v1767_v53 = vadd.f32 %v1735_v56, %v1669_v0  ;;  %v4055_v56 = vld [vmem:[#allocation2 + $0x121] sm:$0xff]  ;;  %v1670_v37 = vadd.f32 %v1638_v13, %v1572_v14  ;;  %v1736_v13 = vmul.f32 %v3841_v29, %v4052_v32 }
  0xde   : > { %v4059_v0 = vld [vmem:[#allocation2 + $0x128] sm:$0xff]  ;;  %v1587_v25 = vadd.f32 %v1555_v20, %v1488_v11  ;;  %v1653_v17 = vmul.f32 %v3836_v28, %v4055_v56  ;;  %v1489_v14 = vadd.f32 %v1457_v60, %v1391_v31  ;;  %v1751_v11 = vmul.f32 %v3841_v29, %v4071_v51 }
  0xdf   : > { %v738_v21 = vpop.f32.mrf.mxu0  ;;  %v1556_v16 = vmul.f32 %v3820_v12, %v4059_v0  ;;  %v1671_v20 = vadd.f32 %v1639_v46, %v1573_v62  ;;  %v1768_v59 = vadd.f32 %v1736_v13, %v1670_v37  ;;  %v4092_v34 = vadd.f32 %v3866_v61, %v1767_v53  ;;  %v783_v46 = vpop.f32.mrf.mxu3 }
  0xe0   : > { %v739_v19 = vadd.f32 %v738_v21, %v3719_v33  ;;  %v1345_v21 = vmul.f32 %v3808_v6, %v4031_v35  ;;  %v1685_v58 = vadd.f32 %v1653_v17, %v1587_v25  ;;  %v1752_v25 = vmul.f32 %v3841_v29, %v4087_v24 }
  0xe1   : > { %v1588_v60 = vadd.f32 %v1556_v16, %v1489_v14  ;;  %5902 = vst [vmem:[#allocation23_spill] sm:$0xff] %v4092_v34  ;;  %v1052_v62 = vmul.f32 %v3766_v41, %v3951_v30  ;;  %v1443_v37 = vmul.f32 %v3813_v7, %v4052_v32  ;;  %v784_v53 = vadd.f32 %v783_v46, %v3719_v33 }
  0xe2   : > { %v4068_v48 = vld [vmem:[#allocation2 + $0x7a] sm:$0xff]  ;;  %815 = vst.msk [vmem:[#allocation2 + $0x91] sm:$0xff] %vm503_vm1, %v739_v19  ;;  %v1654_v19 = vmul.f32 %v3836_v28, %v4073_v18  ;;  %v1377_v4 = vadd.f32 %v1345_v21, %v1279_v2  ;;  %v1783_v22 = vadd.f32 %v1751_v11, %v1685_v58  ;;  %v2025_v14 = vadd.f32 1.0, %v3985_v9 }
  0xe3   : > { %v1737_v43 = vmul.f32 %v3841_v29, %v4068_v48  ;;  %v4085_v31 = vld [vmem:[#allocation2 + $0x80] sm:$0xff]  ;;  %v4106_v13 = vand.u32 2147483647, %v4019_v55  ;;  %v4110_v21 = vadd.f32 %v3866_v61, %v1768_v59  ;;  %830 = vst.msk [vmem:[#allocation2 + $0x141] sm:$0xff] %vm503_vm1, %v784_v53  ;;  %v5904_v11 = vsub.f32 0.0, %v3949_v26 }
  0xe4   : > { %5901 = vst [vmem:[#allocation22_spill] sm:$0xff] %v4085_v31  ;;  %v1686_v16 = vadd.f32 %v1654_v19, %v1588_v60  ;;  %v1542_v2 = vmul.f32 %v3820_v12, %v4085_v31  ;;  %v1475_v58 = vadd.f32 %v1443_v37, %v1377_v4  ;;  %v1066_v9 = vmul.f32 %v3766_v41, %v4007_v44  ;;  %v4125_v60 = vld [vmem:[#allocation2 + $0x81] sm:$0xff] }
  0xe5   : > { %v1769_v17 = vadd.f32 %v1737_v43, %v1671_v20  ;;  %5903 = vst [vmem:[#allocation24_spill] sm:$0xff] %v4110_v21  ;;  %v4116_v19 = vmul.f32 %v5904_v11, %v3949_v26  ;;  %v4129_v4 = vadd.f32 %v3866_v61, %v1783_v22  ;;  %v4132_v59 = vmul.f32 0.70710677, %v4092_v34  ;;  %v4160_v11 = vld [vmem:[#allocation2 + $0x82] sm:$0xff] }
  0xe6   : > { %v1784_v43 = vadd.f32 %v1752_v25, %v1686_v16  ;;  %5907 = vst [vmem:[#allocation27_spill] sm:$0xff] %v4125_v60  ;;  %v1574_v26 = vadd.f32 %v1542_v2, %v1475_v58  ;;  %v4134_v25 = vadd.f32 %v1052_v62, %v954_v15  ;;  %v1098_v16 = vadd.f32 %v1066_v9, %v968_v36  ;;  %v4151_v62 = vpop.eup %3347 }
  0xe7   : > { %v741_v39 = vpop.f32.mrf.mxu0  ;;  %5905 = vst [vmem:[#allocation25_spill] sm:$0xff] %v4116_v19  ;;  %v4123_v20 = vadd.f32 %v3866_v61, %v1769_v17  ;;  %v1164_v17 = vmul.f32 %v3779_v47, %v4025_v10  ;;  %v969_v37 = vmul.f32 %v3761_v40, %v4016_v50  ;;  %v4145_v22 = vmul.f32 0.70710677, %v4110_v21  ;;  %v786_v36 = vpop.f32.mrf.mxu3 }
  0xe8   : > { %v742_v30 = vadd.f32 %v741_v39, %v3719_v33  ;;  %5908 = vst [vmem:[#allocation28_spill] sm:$0xff] %v4129_v4  ;;  %v4137_v46 = vadd.f32 %v3866_v61, %v1784_v43  ;;  %v1994_v39 = vmul.f32 0.3275911, %v4106_v13  ;;  %v1067_v2 = vmul.f32 %v3766_v41, %v4033_v38 }
  0xe9   : > { %5906 = vst [vmem:[#allocation26_spill] sm:$0xff] %v4123_v20  ;;  %v1640_v15 = vmul.f32 %v3836_v28, %v4125_v60  ;;  %v1196_v53 = vadd.f32 %v1164_v17, %v1098_v16  ;;  %v4156_v43 = vmul.f32 0.70710677, %v4123_v20  ;;  %v1165_v58 = vmul.f32 %v3779_v47, %v4041_v52 }
  0xea   : > { %816 = vst.msk [vmem:[#allocation2 + $0x99] sm:$0xff] %vm503_vm1, %v742_v30  ;;  %v1262_v30 = vmul.f32 %v3797_v57, %v4043_v45  ;;  %v4163_v9 = vmul.f32 0.70710677, %v4129_v4  ;;  %v4166_v55 = vand.u32 2147483647, %v4132_v59  ;;  %v787_v19 = vadd.f32 %v786_v36, %v3719_v33 }
  0xeb   : > { %5909 = vst [vmem:[#allocation29_spill] sm:$0xff] %v4132_v59  ;;  %v1672_v16 = vadd.f32 %v1640_v15, %v1574_v26  ;;  %v4170_v20 = vmul.f32 0.70710677, %v4137_v46  ;;  %v1360_v34 = vmul.f32 %v3808_v6, %v4055_v56  ;;  %v4176_v4 = vand.u32 2147483647, %v4145_v22 }
  0xec   : > { %5910 = vst [vmem:[#allocation30_spill] sm:$0xff] %v4137_v46  ;;  %v1294_v21 = vadd.f32 %v1262_v30, %v1196_v53  ;;  %v4184_v15 = vand.u32 2147483647, %v4156_v43  ;;  %v1263_v53 = vmul.f32 %v3797_v57, %v4059_v0  ;;  %3349 = vrcp.f32 %v2025_v14  ;;  %v4202_v14 = vld [vmem:[#allocation2 + $0x139] sm:$0xff] }
  0xed   : > { %5911 = vst [vmem:[#allocation31_spill] sm:$0xff] %v4145_v22  ;;  %v2026_v30 = vadd.f32 1.0, %v1994_v39  ;;  %v1361_v59 = vmul.f32 %v3808_v6, %v4073_v18  ;;  %v4213_v46 = vld [vmem:[#allocation2 + $0x13a] sm:$0xff] }
  0xee   : > { %5912 = vst [vmem:[#allocation32_spill] sm:$0xff] %v4151_v62  ;;  %v1099_v62 = vadd.f32 %v1067_v2, %v969_v37  ;;  %v1738_v37 = vmul.f32 %v3841_v29, %v4160_v11  ;;  %v1392_v26 = vadd.f32 %v1360_v34, %v1294_v21  ;;  %v1458_v2 = vmul.f32 %v3813_v7, %v4071_v51 }
  0xef   : > { %5913 = vst [vmem:[#allocation33_spill] sm:$0xff] %v4156_v43  ;;  %v744_v17 = vpop.f32.mrf.mxu0  ;;  %v1995_v34 = vmul.f32 0.3275911, %v4166_v55  ;;  %v4196_v21 = vand.u32 2147483647, %v4170_v20  ;;  %v2378_v43 = vsub.f32 0.0, %v4106_v13  ;;  %3351 = vrcp.f32 %v2026_v30 }
  0xf0   : > { %5914 = vst [vmem:[#allocation34_spill] sm:$0xff] %v4160_v11  ;;  %v745_v52 = vadd.f32 %v744_v17, %v3719_v33  ;;  %v1197_v10 = vadd.f32 %v1165_v58, %v1099_v62  ;;  %v4190_v62 = vand.u32 2147483647, %v4163_v9  ;;  %v4192_v58 = vld [vmem:[#allocation2 + $0x138] sm:$0xff]  ;;  %v1490_v36 = vadd.f32 %v1458_v2, %v1392_v26  ;;  %v789_v2 = vpop.f32.mrf.mxu3 }
  0xf1   : > { %5915 = vst [vmem:[#allocation35_spill] sm:$0xff] %v4163_v9  ;;  %v1557_v17 = vmul.f32 %v3820_v12, %v4192_v58  ;;  %v1150_v26 = vmul.f32 %v3779_v47, %v3966_v63  ;;  %v2379_v9 = vsub.f32 0.0, %v4166_v55  ;;  %v2012_v38 = vmul.f32 0.3275911, %v4196_v21 }
  0xf2   : > { %5916 = vst [vmem:[#allocation36_spill] sm:$0xff] %v4170_v20  ;;  %v1295_v39 = vadd.f32 %v1263_v53, %v1197_v10  ;;  %v1997_v20 = vmul.f32 0.3275911, %v4184_v15  ;;  %v2011_v22 = vmul.f32 0.3275911, %v4190_v62  ;;  %v1248_v63 = vmul.f32 %v3797_v57, %v4013_v27  ;;  %v4222_v44 = vpop.eup %3349 }
  0xf3   : > { %831 = vst.msk [vmem:[#allocation2 + $0x151] sm:$0xff] %vm503_vm1, %v787_v19  ;;  %v1770_v19 = vadd.f32 %v1738_v37, %v1672_v16  ;;  %v1589_v16 = vadd.f32 %v1557_v17, %v1490_v36  ;;  %v1655_v37 = vmul.f32 %v3836_v28, %v4202_v14  ;;  %v790_v36 = vadd.f32 %v789_v2, %v3719_v33 }
  0xf4   : > { %817 = vst.msk [vmem:[#allocation2 + $0xa9] sm:$0xff] %vm503_vm1, %v745_v52  ;;  %v1996_v52 = vmul.f32 0.3275911, %v4176_v4  ;;  %v2027_v17 = vadd.f32 1.0, %v1995_v34  ;;  %v1393_v11 = vadd.f32 %v1361_v59, %v1295_v39  ;;  %v1753_v34 = vmul.f32 %v3841_v29, %v4213_v46 }
  0xf5   : > { %5917 = vst [vmem:[#allocation37_spill] sm:$0xff] %v4192_v58  ;;  %v4216_v10 = vadd.f32 %v3866_v61, %v1770_v19  ;;  %v1687_v19 = vadd.f32 %v1655_v37, %v1589_v16  ;;  %v2029_v2 = vadd.f32 1.0, %v1997_v20  ;;  %v1182_v27 = vadd.f32 %v1150_v26, %v4134_v25 }
  0xf6   : > { %5918 = vst [vmem:[#allocation38_spill] sm:$0xff] %v4196_v21  ;;  %v2028_v50 = vadd.f32 1.0, %v1996_v52  ;;  %v4230_v21 = vld [vmem:[#allocation2 + $0x140] sm:$0xff]  ;;  %v2380_v52 = vsub.f32 0.0, %v4176_v4  ;;  %v2381_v59 = vsub.f32 0.0, %v4184_v15  ;;  %v4240_v16 = vmul.f32 %v2378_v43, %v4106_v13 }
  0xf7   : > { %5919 = vst [vmem:[#allocation39_spill] sm:$0xff] %v4202_v14  ;;  %v747_v53 = vpop.f32.mrf.mxu0  ;;  %v4237_v39 = vmul.f32 0.70710677, %v4216_v10  ;;  %3353 = vrcp.f32 %v2027_v17  ;;  %v2044_v37 = vadd.f32 1.0, %v2012_v38  ;;  %v1280_v20 = vadd.f32 %v1248_v63, %v1182_v27  ;;  %v4251_v13 = vld [vmem:[#allocation2 + $0x141] sm:$0xff] }
  0xf8   : > { %5920 = vst [vmem:[#allocation40_spill] sm:$0xff] %v4213_v46  ;;  %v748_v30 = vadd.f32 %v747_v53, %v3719_v33  ;;  %v4242_v53 = vpop.eup %3351  ;;  %v4245_v25 = vmul.f32 %v2379_v9, %v4166_v55  ;;  %3355 = vrcp.f32 %v2028_v50  ;;  %v1558_v26 = vmul.f32 %v3820_v12, %v4230_v21  ;;  %v792_v55 = vpop.f32.mrf.mxu3  ;;  %v1419_v43 = vld [vmem:[#allocation2 + $0xe2] sm:$0xff] }
  0xf9   : > { %5921 = vst [vmem:[#allocation41_spill] sm:$0xff] %v4216_v10  ;;  %v1785_v10 = vadd.f32 %v1753_v34, %v1687_v19  ;;  %3357 = vrcp.f32 %v2029_v2  ;;  %v1346_v27 = vmul.f32 %v3808_v6, %v4047_v42  ;;  %v1444_v38 = vmul.f32 %v3813_v7, %v4068_v48  ;;  %v4273_v2 = vld [vmem:[#allocation2 + $0x142] sm:$0xff] }
  0xfa   : > { %5922 = vst [vmem:[#allocation42_spill] sm:$0xff] %v4222_v44  ;;  %v2043_v44 = vadd.f32 1.0, %v2011_v22  ;;  %v1491_v22 = vadd.f32 %v1459_v23, %v1393_v11  ;;  %v4258_v23 = vmul.f32 %v2380_v52, %v4176_v4  ;;  %v4261_v50 = vmul.f32 %v2381_v59, %v4184_v15 }
  0xfb   : > { %832 = vst.msk [vmem:[#allocation2 + $0x159] sm:$0xff] %vm503_vm1, %v790_v36  ;;  %v4249_v36 = vld [vmem:[#allocation2 + $0x90] sm:$0xff]  ;;  %v1966_v11 = vand.u32 2147483647, %v4237_v39  ;;  %v793_v17 = vadd.f32 %v792_v55, %v3719_v33  ;;  %v1378_v63 = vadd.f32 %v1346_v27, %v1280_v20  ;;  %v1656_v15 = vmul.f32 %v3836_v28, %v4251_v13 }
  0xfc   : > { %5923 = vst [vmem:[#allocation43_spill] sm:$0xff] %v4230_v21  ;;  %3359 = vrcp.f32 %v2043_v44  ;;  %v1543_v19 = vmul.f32 %v3820_v12, %v4249_v36  ;;  %v1590_v4 = vadd.f32 %v1558_v26, %v1491_v22  ;;  %v4279_v59 = vmul.f32 %v3813_v7, %v1419_v43 }
  0xfd   : > { %818 = vst.msk [vmem:[#allocation2 + $0xb1] sm:$0xff] %vm503_vm1, %v748_v30  ;;  %v1321_v30 = vld [vmem:[#allocation2 + $0xe1] sm:$0xff]  ;;  %3361 = vrcp.f32 %v2044_v37  ;;  %v4275_v52 = vpop.eup %3353  ;;  %v4282_v37 = vadd.f32 %v3866_v61, %v1785_v10  ;;  %v970_v20 = vmul.f32 %v3761_v40, %v4043_v45  ;;  %v1476_v27 = vadd.f32 %v1444_v38, %v1378_v63  ;;  %v4296_v10 = vld [vmem:[#allocation2 + $0x92] sm:$0xff] }
  0xfe   : > { %5924 = vst [vmem:[#allocation44_spill] sm:$0xff] %v4237_v39  ;;  %v4269_v44 = vmul.f32 %v3808_v6, %v1321_v30  ;;  %v4286_v22 = vpop.eup %3355  ;;  %v4290_v26 = vmul.f32 %v3766_v41, %v1321_v30  ;;  %v1998_v55 = vmul.f32 0.3275911, %v1966_v11  ;;  %v4294_v39 = vld [vmem:[#allocation2 + $0x91] sm:$0xff]  ;;  %v4301_v45 = vmul.f32 %v3779_v47, %v1419_v43 }
  0xff   : > { %5925 = vst [vmem:[#allocation45_spill] sm:$0xff] %v4240_v16  ;;  %v750_v9 = vpop.f32.mrf.mxu0  ;;  %v1754_v38 = vmul.f32 %v3841_v29, %v4273_v2  ;;  %v1166_v30 = vmul.f32 %v3779_v47, %v4071_v51  ;;  %v1575_v63 = vadd.f32 %v1543_v19, %v1476_v27  ;;  %v4316_v43 = vmul.f32 0.70710677, %v4282_v37 }
 0x100   : > { %5926 = vst [vmem:[#allocation46_spill] sm:$0xff] %v4242_v53  ;;  %v751_v34 = vadd.f32 %v750_v9, %v3719_v33  ;;  %v2382_v9 = vsub.f32 0.0, %v1966_v11  ;;  %v1264_v53 = vmul.f32 %v3797_v57, %v4192_v58  ;;  %v1641_v51 = vmul.f32 %v3836_v28, %v4294_v39  ;;  %v795_v27 = vpop.f32.mrf.mxu3 }
 0x101   : > { %5927 = vst [vmem:[#allocation47_spill] sm:$0xff] %v4245_v25  ;;  %v1688_v25 = vadd.f32 %v1656_v15, %v1590_v4  ;;  %v1739_v19 = vmul.f32 %v3841_v29, %v4296_v10  ;;  %v4324_v4 = vadd.f32 1.0, %v1998_v55  ;;  %v1362_v55 = vmul.f32 %v3808_v6, %v4202_v14 }
 0x102   : > { %5928 = vst [vmem:[#allocation48_spill] sm:$0xff] %v4251_v13 }
 0x103   : > { %5929 = vst [vmem:[#allocation49_spill] sm:$0xff] %v4258_v23  ;;  %v1673_v23 = vadd.f32 %v1641_v51, %v1575_v63  ;;  %v4354_v63 = vmul.f32 %v3841_v29, %v3976_v8  ;;  %v4373_v51 = vmul.f32 %v3797_v57, %v3972_v3  ;;  %3363 = vrcp.f32 %v4324_v4 }
 0x104   : > { %5930 = vst [vmem:[#allocation50_spill] sm:$0xff] %v4261_v50  ;;  %v4298_v50 = vpop.eup %3357 }
 0x105   : > { %5931 = vst [vmem:[#allocation51_spill] sm:$0xff] %v4273_v2 }
 0x106   : > { %5932 = vst [vmem:[#allocation52_spill] sm:$0xff] %v4275_v52  ;;  %v955_v52 = vmul.f32 %v3761_v40, %v3968_v1  ;;  %v4326_v1 = vmul.f32 %v2382_v9, %v1966_v11  ;;  %v796_v9 = vadd.f32 %v795_v27, %v3719_v33 }
 0x107   : > { %833 = vst.msk [vmem:[#allocation2 + $0x169] sm:$0xff] %vm503_vm1, %v793_v17  ;;  %v1068_v17 = vmul.f32 %v3766_v41, %v4055_v56 }
 0x108   : > { %5933 = vst [vmem:[#allocation53_spill] sm:$0xff] %v4282_v37 }
 0x109   : > { %5934 = vst [vmem:[#allocation54_spill] sm:$0xff] %v4286_v22  ;;  %v1100_v56 = vadd.f32 %v1068_v17, %v970_v20  ;;  %v753_v20 = vpop.f32.mrf.mxu0  ;;  %v4332_v17 = vmul.f32 %v3820_v12, %v3972_v3 }
 0x10a   : > { %819 = vst.msk [vmem:[#allocation2 + $0xc1] sm:$0xff] %vm503_vm1, %v751_v34  ;;  %v4307_v34 = vpop.eup %3359  ;;  %v754_v11 = vadd.f32 %v753_v20, %v3719_v33 }
 0x10b   : > { %5935 = vst [vmem:[#allocation55_spill] sm:$0xff] %v4298_v50  ;;  %v1053_v50 = vmul.f32 %v3766_v41, %v4031_v35  ;;  %v4313_v16 = vpop.eup %3361  ;;  %v1198_v15 = vadd.f32 %v1166_v30, %v1100_v56  ;;  %v1151_v35 = vmul.f32 %v3779_v47, %v4052_v32  ;;  %v1786_v30 = vadd.f32 %v1754_v38, %v1688_v25 }
 0x10c   : > { %5936 = vst [vmem:[#allocation56_spill] sm:$0xff] %v4307_v34  ;;  %v4344_v56 = vmul.f32 %v3836_v28, %v3958_v49  ;;  %v1460_v34 = vmul.f32 %v3813_v7, %v4213_v46  ;;  %v4358_v25 = vmul.f32 %v3797_v57, %v3956_v54  ;;  %v4369_v38 = vmul.f32 %v3813_v7, %v3976_v8 }
 0x10d   : > { %5937 = vst [vmem:[#allocation57_spill] sm:$0xff] %v4313_v16  ;;  %v4336_v16 = vmul.f32 %v3820_v12, %v3956_v54  ;;  %v1085_v32 = vadd.f32 %v1053_v50, %v955_v52  ;;  %v1296_v22 = vadd.f32 %v1264_v53, %v1198_v15  ;;  %v4362_v50 = vmul.f32 %v3808_v6, %v3958_v49  ;;  %v4364_v52 = vld [vmem:[#allocation2 + $0x150] sm:$0xff] }
 0x10e   : > { %5938 = vst [vmem:[#allocation58_spill] sm:$0xff] %v4316_v43  ;;  %v1771_v53 = vadd.f32 %v1739_v19, %v1673_v23  ;;  %v4378_v49 = vmul.f32 %v3836_v28, %v3974_v5  ;;  %v4381_v20 = vadd.f32 %v3866_v61, %v1786_v30  ;;  %v1249_v19 = vmul.f32 %v3797_v57, %v4085_v31  ;;  %v4473_v31 = vld [vmem:[#allocation2 + $0x99] sm:$0xff] }
 0x10f   : > { %5939 = vst [vmem:[#allocation59_spill] sm:$0xff] %v4326_v1  ;;  %v4347_v1 = vand.u32 2147483647, %v4316_v43  ;;  %v1394_v15 = vadd.f32 %v1362_v55, %v1296_v22  ;;  %v1183_v23 = vadd.f32 %v1151_v35, %v1085_v32  ;;  %v4387_v8 = vmul.f32 %v3808_v6, %v3974_v5  ;;  %v4392_v55 = vld [vmem:[#allocation2 + $0x151] sm:$0xff]  ;;  %v5944_v32 = vld [vmem:[#allocation13_spill] sm:$0xff] }
 0x110   : > { %820 = vst.msk [vmem:[#allocation2 + $0xc9] sm:$0xff] %vm503_vm1, %v754_v11  ;;  %v1559_v22 = vmul.f32 %v3820_v12, %v4364_v52  ;;  %v4395_v11 = vadd.f32 %v3866_v61, %v1771_v53  ;;  %v971_v35 = vmul.f32 %v3761_v40, %v4059_v0  ;;  %v4403_v54 = vmul.f32 %v3841_v29, %v5944_v32 }
 0x111   : > { %5940 = vst [vmem:[#allocation60_spill] sm:$0xff] %v4364_v52  ;;  %v2013_v3 = vmul.f32 0.3275911, %v4347_v1  ;;  %v1492_v27 = vadd.f32 %v1460_v34, %v1394_v15  ;;  %v1281_v30 = vadd.f32 %v1249_v19, %v1183_v23  ;;  %v756_v5 = vpop.f32.mrf.mxu0  ;;  %v928_v34 = vld [vmem:[#allocation2 + $0xc0] sm:$0xff]  ;;  %v798_v15 = vpop.f32.mrf.mxu3  ;;  %v4407_v43 = vmul.f32 %v3813_v7, %v5944_v32  ;;  %v4421_v52 = vld [vmem:[#allocation2 + $0x98] sm:$0xff] }
 0x112   : > { %834 = vst.msk [vmem:[#allocation2 + $0x171] sm:$0xff] %vm503_vm1, %v796_v9  ;;  %v1069_v9 = vmul.f32 %v3766_v41, %v4073_v18  ;;  %v1167_v53 = vmul.f32 %v3779_v47, %v4087_v24  ;;  %v1347_v40 = vmul.f32 %v3808_v6, %v4125_v60  ;;  %v757_v41 = vadd.f32 %v756_v5, %v3719_v33  ;;  %v1026_v0 = vld [vmem:[#allocation2 + $0xc1] sm:$0xff]  ;;  %v4425_v24 = vld [vmem:[#allocation2 + $0x152] sm:$0xff] }
 0x113   : > { %5941 = vst [vmem:[#allocation61_spill] sm:$0xff] %v4381_v20  ;;  %v5945_v18 = vld [vmem:[#allocation14_spill] sm:$0xff]  ;;  %v4419_v19 = vmul.f32 0.70710677, %v4381_v20  ;;  %v1591_v14 = vadd.f32 %v1559_v22, %v1492_v27  ;;  %v1657_v47 = vmul.f32 %v3836_v28, %v4392_v55  ;;  %v1265_v5 = vmul.f32 %v3797_v57, %v4230_v21  ;;  %v4439_v27 = vld [vmem:[%s5730_s5 + $0x1] ss:$0 sm:$0xff] }
 0x114   : > { %5942 = vst [vmem:[#allocation62_spill] sm:$0xff] %v4392_v55  ;;  %v4416_v23 = vmul.f32 %v3820_v12, %v5945_v18  ;;  %v1101_v37 = vadd.f32 %v1069_v9, %v971_v35  ;;  %v1379_v58 = vadd.f32 %v1347_v40, %v1281_v30  ;;  %v4433_v35 = vld [vmem:[%s5730_s5] ss:$0 sm:$0xff]  ;;  %v1060_v40 = vmul.f32 %v4439_v27, %v1026_v0  ;;  %v5949_v20 = vld [vmem:[#allocation34_spill] sm:$0xff] }
 0x115   : > { %5943 = vst [vmem:[#allocation63_spill] sm:$0xff] %v4395_v11  ;;  %v962_v18 = vmul.f32 %v4433_v35, %v928_v34  ;;  %v1445_v21 = vmul.f32 %v3813_v7, %v5949_v20  ;;  %v4449_v55 = vadd.f32 1.0, %v2013_v3  ;;  %v1755_v60 = vmul.f32 %v3841_v29, %v4425_v24  ;;  %v4471_v20 = vld [vmem:[#allocation2 + $0x158] sm:$0xff] }
 0x116   : > { %5946 = vst [vmem:[#allocation13_spill] sm:$0xff] %v4419_v19  ;;  %v1199_v30 = vadd.f32 %v1167_v53, %v1101_v37  ;;  %v1363_v34 = vmul.f32 %v3808_v6, %v4251_v13  ;;  %v1689_v0 = vadd.f32 %v1657_v47, %v1591_v14  ;;  %v1461_v3 = vmul.f32 %v3813_v7, %v4273_v2  ;;  %v5955_v47 = vld [vmem:[#allocation15_spill] sm:$0xff] }
 0x117   : > { %5947 = vst [vmem:[#allocation14_spill] sm:$0xff] %v4421_v52  ;;  %v929_v32 = vld [vmem:[#allocation2 + $0xc8] sm:$0xff]  ;;  %v4469_v6 = vmul.f32 0.70710677, %v4395_v11  ;;  %v1092_v14 = vadd.f32 %v1060_v40, %v962_v18  ;;  %v4479_v7 = vmul.f32 %v3836_v28, %v5955_v47  ;;  %v4493_v40 = vld [vmem:[#allocation2 + $0x159] sm:$0xff]  ;;  %3365 = vrcp.f32 %v4449_v55 }
 0x118   : > { %v1027_v46 = vld [vmem:[#allocation2 + $0xc9] sm:$0xff]  ;;  %5948 = vst [vmem:[#allocation64_spill] sm:$0xff] %v4425_v24  ;;  %v963_v9 = vmul.f32 %v4433_v35, %v929_v32  ;;  %v1544_v32 = vmul.f32 %v3820_v12, %v4421_v52  ;;  %v1477_v52 = vadd.f32 %v1445_v21, %v1379_v58  ;;  %v4482_v21 = vand.u32 2147483647, %v4419_v19 }
 0x119   : > { %821 = vst.msk [vmem:[#allocation2 + $0xd9] sm:$0xff] %vm503_vm1, %v757_v41  ;;  %v1061_v22 = vmul.f32 %v4439_v27, %v1027_v46  ;;  %v1124_v57 = vld [vmem:[#allocation2 + $0xc2] sm:$0xff]  ;;  %v799_v41 = vadd.f32 %v798_v15, %v3719_v33  ;;  %v1297_v46 = vadd.f32 %v1265_v5, %v1199_v30  ;;  %v1125_v37 = vld [vmem:[#allocation2 + $0xca] sm:$0xff]  ;;  %v801_v58 = vpop.f32.mrf.mxu3 }
 0x11a   : > { %v4458_v15 = vld [vmem:[%s5730_s5 + $0x2] ss:$0 sm:$0xff]  ;;  %5952 = vst [vmem:[#allocation65_spill] sm:$0xff] %v4471_v20  ;;  %v4639_v55 = vld [vmem:[#allocation2 + $0xa9] sm:$0xff] }
 0x11b   : > { %v1158_v53 = vmul.f32 %v4458_v15, %v1124_v57  ;;  %835 = vst.msk [vmem:[#allocation2 + $0x181] sm:$0xff] %vm503_vm1, %v799_v41  ;;  %v1093_v24 = vadd.f32 %v1061_v22, %v963_v9  ;;  %v5950_v5 = vld [vmem:[#allocation17_spill] sm:$0xff]  ;;  %v1395_v13 = vadd.f32 %v1363_v34, %v1297_v46  ;;  %v1159_v9 = vmul.f32 %v4458_v15, %v1125_v37 }
 0x11c   : > { %v4466_v30 = vmul.f32 %v3820_v12, %v5950_v5  ;;  %5951 = vst [vmem:[#allocation17_spill] sm:$0xff] %v4469_v6  ;;  %v4475_v57 = vld [vmem:[#allocation2 + $0x9a] sm:$0xff]  ;;  %v1576_v12 = vadd.f32 %v1544_v32, %v1477_v52  ;;  %v802_v22 = vadd.f32 %v801_v58, %v3719_v33  ;;  %v4489_v46 = vld [vmem:[%s5730_s5 + $0x6] ss:$0 sm:$0xff]  ;;  %v1787_v52 = vadd.f32 %v1755_v60, %v1689_v0  ;;  %v4502_v37 = vld [vmem:[%s5730_s5 + $0x3] ss:$0 sm:$0xff] }
 0x11d   : > { %5953 = vst [vmem:[#allocation66_spill] sm:$0xff] %v4473_v31  ;;  %v1493_v41 = vadd.f32 %v1461_v3, %v1395_v13  ;;  %v1560_v18 = vmul.f32 %v4489_v46, %v4471_v20  ;;  %v1190_v5 = vadd.f32 %v1158_v53, %v1092_v14  ;;  %v1642_v32 = vmul.f32 %v3836_v28, %v4473_v31 }
 0x11e   : > { %5954 = vst [vmem:[#allocation67_spill] sm:$0xff] %v4475_v57  ;;  %v1740_v33 = vmul.f32 %v3841_v29, %v4475_v57  ;;  %v1191_v13 = vadd.f32 %v1159_v9, %v1093_v24  ;;  %v4513_v29 = vld [vmem:[%s5730_s5 + $0x7] ss:$0 sm:$0xff] }
 0x11f   : > { %5956 = vst [vmem:[#allocation15_spill] sm:$0xff] %v4493_v40  ;;  %v1658_v24 = vmul.f32 %v4513_v29, %v4493_v40  ;;  %v1674_v0 = vadd.f32 %v1642_v32, %v1576_v12  ;;  %v1592_v20 = vadd.f32 %v1560_v18, %v1493_v41  ;;  %v4528_v40 = vadd.f32 %v3866_v61, %v1787_v52  ;;  %v4534_v32 = vld [vmem:[%s5730_s5 + $0x5] ss:$0 sm:$0xff]  ;;  %v5958_v41 = vld [vmem:[#allocation16_spill] sm:$0xff]  ;;  %v4543_v61 = vld [vmem:[%s5730_s5 + $0x8] ss:$0 sm:$0xff] }
 0x120   : > { %v1223_v34 = vld [vmem:[#allocation2 + $0xe0] sm:$0xff]  ;;  %v1222_v47 = vld [vmem:[#allocation2 + $0xd8] sm:$0xff]  ;;  %836 = vst.msk [vmem:[#allocation2 + $0x189] sm:$0xff] %vm503_vm1, %v802_v22  ;;  %v956_v18 = vmul.f32 %v4433_v35, %v5958_v41 }
 0x121   : > { %v1320_v19 = vld [vmem:[#allocation2 + $0xd9] sm:$0xff]  ;;  %v1257_v3 = vmul.f32 %v4502_v37, %v1223_v34  ;;  %v1256_v58 = vmul.f32 %v4502_v37, %v1222_v47  ;;  %v964_v14 = vmul.f32 %v4433_v35, %v1222_v47  ;;  %v965_v60 = vmul.f32 %v4433_v35, %v1223_v34  ;;  %v4520_v47 = vld [vmem:[%s5730_s5 + $0x4] ss:$0 sm:$0xff]  ;;  %5957 = vst [vmem:[#allocation68_spill] sm:$0xff] %v4528_v40 }
 0x122   : > { %v1418_v53 = vld [vmem:[#allocation2 + $0xda] sm:$0xff]  ;;  %v1062_v28 = vmul.f32 %v4439_v27, %v1320_v19  ;;  %v1354_v22 = vmul.f32 %v4520_v47, %v1320_v19 }
 0x123   : > { %v1289_v9 = vadd.f32 %v1257_v3, %v1191_v13  ;;  %v1288_v11 = vadd.f32 %v1256_v58, %v1190_v5  ;;  %v4523_v34 = vld [vmem:[#allocation2 + $0x15a] sm:$0xff]  ;;  %v1160_v57 = vmul.f32 %v4458_v15, %v1418_v53  ;;  %v1095_v31 = vadd.f32 %v4290_v26, %v965_v60 }
 0x124   : > { %v1094_v2 = vadd.f32 %v1062_v28, %v964_v14  ;;  %v1452_v19 = vmul.f32 %v4534_v32, %v1418_v53  ;;  %v1054_v26 = vmul.f32 %v4439_v27, %v4047_v42  ;;  %v1690_v58 = vadd.f32 %v1658_v24, %v1592_v20  ;;  %v5959_v42 = vld [vmem:[#allocation20_spill] sm:$0xff] }
 0x125   : > { %v1387_v12 = vadd.f32 %v4269_v44, %v1289_v9  ;;  %v1386_v5 = vadd.f32 %v1354_v22, %v1288_v11  ;;  %v1193_v3 = vadd.f32 %v4301_v45, %v1095_v31  ;;  %v1756_v44 = vmul.f32 %v4543_v61, %v4523_v34 }
 0x126   : > { %v1192_v13 = vadd.f32 %v1160_v57, %v1094_v2  ;;  %v1772_v53 = vadd.f32 %v1740_v33, %v1674_v0  ;;  %v4553_v45 = vand.u32 2147483647, %v4469_v6  ;;  %v1152_v57 = vmul.f32 %v4458_v15, %v4068_v48 }
 0x127   : > { %v1485_v11 = vadd.f32 %v4279_v59, %v1387_v12  ;;  %v1484_v52 = vadd.f32 %v1452_v19, %v1386_v5  ;;  %v1291_v31 = vadd.f32 %v4373_v51, %v1193_v3  ;;  %v1652_v59 = vmul.f32 %v4513_v29, %v5959_v42  ;;  %v5962_v12 = vld [vmem:[#allocation19_spill] sm:$0xff]  ;;  %v5963_v19 = vld [vmem:[#allocation21_spill] sm:$0xff] }
 0x128   : > { %v1290_v2 = vadd.f32 %v4358_v25, %v1192_v13  ;;  %v4562_v20 = vmul.f32 0.70710677, %v4528_v40  ;;  %v1086_v33 = vadd.f32 %v1054_v26, %v956_v18  ;;  %v1250_v60 = vmul.f32 %v4502_v37, %v4249_v36  ;;  %v4604_v26 = vld [vmem:[#allocation2 + $0xa8] sm:$0xff] }
 0x129   : > { %v1584_v14 = vadd.f32 %v4332_v17, %v1485_v11  ;;  %v1583_v28 = vadd.f32 %v4336_v16, %v1484_v52  ;;  %v1389_v51 = vadd.f32 %v4387_v8, %v1291_v31  ;;  %v1788_v24 = vadd.f32 %v1756_v44, %v1690_v58  ;;  %v4573_v16 = vld [vmem:[%s5731_s6] ss:$0 sm:$0xff]  ;;  %v5967_v58 = vld [vmem:[#allocation38_spill] sm:$0xff] }
 0x12a   : > { %5960 = vst [vmem:[#allocation16_spill] sm:$0xff] %v4562_v20  ;;  %v1388_v25 = vadd.f32 %v4362_v50, %v1290_v2  ;;  %v4576_v0 = vadd.f32 %v4573_v16, %v1772_v53  ;;  %v2014_v9 = vmul.f32 0.3275911, %v4482_v21  ;;  %v1184_v22 = vadd.f32 %v1152_v57, %v1086_v33 }
 0x12b   : > { %v1682_v48 = vadd.f32 %v4378_v49, %v1584_v14  ;;  %v1681_v17 = vadd.f32 %v4344_v56, %v1583_v28  ;;  %v1487_v8 = vadd.f32 %v4407_v43, %v1389_v51  ;;  %v1749_v5 = vmul.f32 %v4543_v61, %v5962_v12 }
 0x12c   : > { %5961 = vst [vmem:[#allocation20_spill] sm:$0xff] %v4576_v0  ;;  %v1486_v50 = vadd.f32 %v4369_v38, %v1388_v25  ;;  %v1750_v41 = vmul.f32 %v4543_v61, %v5963_v19  ;;  %v4590_v38 = vand.u32 2147483647, %v4562_v20  ;;  %v1282_v43 = vadd.f32 %v1250_v60, %v1184_v22  ;;  %v5975_v19 = vld [vmem:[#allocation22_spill] sm:$0xff] }
 0x12d   : > { %v1780_v49 = vadd.f32 %v4403_v54, %v1682_v48  ;;  %v1779_v56 = vadd.f32 %v4354_v63, %v1681_v17  ;;  %v1586_v13 = vadd.f32 %v4466_v30, %v1487_v8  ;;  %v4599_v63 = vadd.f32 %v4573_v16, %v1788_v24 }
 0x12e   : > { %v1585_v18 = vadd.f32 %v4416_v23, %v1486_v50  ;;  %v4602_v44 = vmul.f32 0.70710677, %v4576_v0  ;;  %v1348_v11 = vmul.f32 %v4520_v47, %v4294_v39  ;;  %v1446_v52 = vmul.f32 %v4534_v32, %v4296_v10  ;;  %v4641_v50 = vld [vmem:[#allocation2 + $0xaa] sm:$0xff] }
 0x12f   : > { %v4593_v3 = vadd.f32 %v4573_v16, %v1780_v49  ;;  %v4596_v54 = vadd.f32 %v4573_v16, %v1779_v56  ;;  %v1684_v30 = vadd.f32 %v1652_v59, %v1586_v13  ;;  %v2396_v53 = vsub.f32 0.0, %v5967_v58  ;;  %v4649_v56 = vpop.eup %3363 }
 0x130   : > { %5966 = vst [vmem:[#allocation69_spill] sm:$0xff] %v4602_v44  ;;  %v1683_v23 = vadd.f32 %v4479_v7, %v1585_v18  ;;  %v2046_v2 = vadd.f32 1.0, %v2014_v9  ;;  %v1999_v7 = vmul.f32 0.3275911, %v4553_v45  ;;  %v2015_v57 = vmul.f32 0.3275911, %v4590_v38 }
 0x131   : > { %5964 = vst [vmem:[#allocation19_spill] sm:$0xff] %v4593_v3  ;;  %2729 = vrot.lane.b32.xlu1 %v4593_v3, %s3508_s23  ;;  %2727 = vrot.lane.b32.xlu0 %v4596_v54, %s3508_s23  ;;  %v1380_v14 = vadd.f32 %v1348_v11, %v1282_v43  ;;  %v1545_v28 = vmul.f32 %v4489_v46, %v4604_v26  ;;  %v5968_v42 = vsub.f32 0.0, %v4190_v62  ;;  %v4628_v25 = vmul.f32 0.70710677, %v4599_v63  ;;  %v5976_v18 = vld [vmem:[#allocation27_spill] sm:$0xff] }
 0x132   : > { %5965 = vst [vmem:[#allocation21_spill] sm:$0xff] %v4596_v54  ;;  %v1781_v31 = vadd.f32 %v1749_v5, %v1683_v23  ;;  %v1968_v4 = vand.u32 2147483647, %v4602_v44  ;;  %v4632_v51 = vmul.f32 0.70710677, %v4593_v3  ;;  %v1782_v60 = vadd.f32 %v1750_v41, %v1684_v30 }
 0x133   : > { %v4624_v59 = vmul.f32 %v5968_v42, %v4190_v62  ;;  %5970 = vst [vmem:[#allocation70_spill] sm:$0xff] %v4628_v25  ;;  %v1478_v48 = vadd.f32 %v1446_v52, %v1380_v14  ;;  %v2397_v17 = vsub.f32 0.0, %v4347_v1  ;;  %3367 = vrcp.f32 %v2046_v2  ;;  %v4668_v52 = vpop.eup %3365  ;;  %v5979_v2 = vld [vmem:[#allocation5_spill] sm:$0xff] }
 0x134   : > { %5971 = vst [vmem:[#allocation71_spill] sm:$0xff] %v4632_v51  ;;  %v4635_v33 = vadd.f32 %v4573_v16, %v1781_v31  ;;  %v2031_v62 = vadd.f32 1.0, %v1999_v7  ;;  %v2383_v24 = vsub.f32 0.0, %v4553_v45  ;;  %v4644_v8 = vmul.f32 0.70710677, %v4596_v54  ;;  %v5980_v7 = vld [vmem:[#allocation3_spill] sm:$0xff] }
 0x135   : > { %5969 = vst [vmem:[#allocation38_spill] sm:$0xff] %v4624_v59  ;;  %v2398_v9 = vsub.f32 0.0, %v4482_v21  ;;  %v2047_v22 = vadd.f32 1.0, %v2015_v57  ;;  %v1577_v49 = vadd.f32 %v1545_v28, %v1478_v48  ;;  %v4652_v12 = vand.u32 2147483647, %v4628_v25 }
 0x136   : > { %5972 = vst [vmem:[#allocation72_spill] sm:$0xff] %v4635_v33  ;;  %2731 = vrot.lane.b32.xlu2 %v4635_v33, %s3508_s23  ;;  %v2000_v5 = vmul.f32 0.3275911, %v1968_v4  ;;  %v957_v41 = vmul.f32 %v4433_v35, %v5975_v19  ;;  %v1055_v13 = vmul.f32 %v4439_v27, %v5976_v18  ;;  %v4659_v43 = vand.u32 2147483647, %v4632_v51 }
 0x137   : > { %5973 = vst [vmem:[#allocation73_spill] sm:$0xff] %v4644_v8  ;;  %v4662_v23 = vadd.f32 %v4573_v16, %v1782_v60  ;;  %v1643_v30 = vmul.f32 %v4513_v29, %v4639_v55  ;;  %v1741_v11 = vmul.f32 %v4543_v61, %v4641_v50  ;;  %v4675_v31 = vmul.f32 %v2396_v53, %v5967_v58 }
 0x138   : > { %5974 = vst [vmem:[#allocation74_spill] sm:$0xff] %v4649_v56  ;;  %v4678_v57 = vmul.f32 %v2397_v17, %v4347_v1  ;;  %3369 = vrcp.f32 %v2031_v62  ;;  %v4681_v14 = vmul.f32 %v2383_v24, %v4553_v45  ;;  %v1975_v28 = vand.u32 2147483647, %v4644_v8  ;;  %v4790_v8 = vld [vmem:[#allocation2 + $0xb2] sm:$0xff] }
 0x139   : > { %5977 = vst [vmem:[#allocation22_spill] sm:$0xff] %v4662_v23  ;;  %2697 = vrot.lane.b32.xlu1 %v5979_v2, %s3508_s23  ;;  %2695 = vrot.lane.b32.xlu0 %v5980_v7, %s3508_s23  ;;  %v4685_v42 = vmul.f32 %v2398_v9, %v4482_v21  ;;  %v2384_v60 = vsub.f32 0.0, %v1968_v4  ;;  %v1675_v48 = vadd.f32 %v1643_v30, %v1577_v49  ;;  %v4687_v19 = vpop.eup %3367  ;;  %v4690_v18 = vmul.f32 0.70710677, %v4635_v33  ;;  %v5988_v21 = vld [vmem:[#allocation37_spill] sm:$0xff]  ;;  %v5989_v9 = vld [vmem:[#allocation39_spill] sm:$0xff] }
 0x13a   : > { %5978 = vst [vmem:[#allocation27_spill] sm:$0xff] %v4668_v52  ;;  %3371 = vrcp.f32 %v2047_v22  ;;  %v2032_v58 = vadd.f32 1.0, %v2000_v5  ;;  %v1087_v1 = vadd.f32 %v1055_v13, %v957_v41  ;;  %v2008_v53 = vmul.f32 0.3275911, %v4659_v43  ;;  %v5990_v30 = vld [vmem:[#allocation34_spill] sm:$0xff]  ;;  %v5992_v13 = vld [vmem:[#allocation7_spill] sm:$0xff] }
 0x13b   : > { %5981 = vst [vmem:[#allocation75_spill] sm:$0xff] %v4675_v31  ;;  %v4694_v45 = vmul.f32 0.70710677, %v4662_v23  ;;  %v2016_v17 = vmul.f32 0.3275911, %v4652_v12  ;;  %v1773_v62 = vadd.f32 %v1741_v11, %v1675_v48  ;;  %v972_v24 = vmul.f32 %v4433_v35, %v5988_v21  ;;  %v5991_v22 = vld [vmem:[#allocation14_spill] sm:$0xff] }
 0x13c   : > { %5982 = vst [vmem:[#allocation76_spill] sm:$0xff] %v4678_v57  ;;  %v1070_v49 = vmul.f32 %v4439_v27, %v5989_v9  ;;  %v1153_v44 = vmul.f32 %v4458_v15, %v5990_v30  ;;  %v1251_v5 = vmul.f32 %v4502_v37, %v5991_v22  ;;  %v2007_v41 = vmul.f32 0.3275911, %v1975_v28  ;;  %v5994_v11 = vld [vmem:[#allocation40_spill] sm:$0xff] }
 0x13d   : > { %5983 = vst [vmem:[#allocation77_spill] sm:$0xff] %v4681_v14  ;;  %v2399_v25 = vsub.f32 0.0, %v4590_v38  ;;  %v4708_v20 = vmul.f32 %v2384_v60, %v1968_v4  ;;  %v1168_v48 = vmul.f32 %v4458_v15, %v5994_v11  ;;  %v1977_v9 = vand.u32 2147483647, %v4690_v18  ;;  %v5996_v14 = vld [vmem:[#allocation60_spill] sm:$0xff]  ;;  %v5999_v11 = vld [vmem:[#allocation11_spill] sm:$0xff] }
 0x13e   : > { %5984 = vst [vmem:[#allocation78_spill] sm:$0xff] %v4685_v42  ;;  %2699 = vrot.lane.b32.xlu2 %v5992_v13, %s3508_s23  ;;  %v4712_v21 = vpop.eup %3369  ;;  %3373 = vrcp.f32 %v2032_v58  ;;  %v1102_v30 = vadd.f32 %v1070_v49, %v972_v24  ;;  %v1185_v56 = vadd.f32 %v1153_v44, %v1087_v1  ;;  %v1978_v57 = vand.u32 2147483647, %v4694_v45  ;;  %v6000_v44 = vld [vmem:[#allocation62_spill] sm:$0xff] }
 0x13f   : > { %5985 = vst [vmem:[#allocation79_spill] sm:$0xff] %v4687_v19  ;;  %v2048_v52 = vadd.f32 1.0, %v2016_v17  ;;  %v1266_v6 = vmul.f32 %v4502_v37, %v5996_v14  ;;  %v4719_v31 = vadd.f32 %v4573_v16, %v1773_v62  ;;  %v2040_v60 = vadd.f32 1.0, %v2008_v53 }
 0x140   : > { %5986 = vst [vmem:[#allocation80_spill] sm:$0xff] %v4690_v18  ;;  %v4721_v4 = vpop.eup %3371  ;;  %v1200_v58 = vadd.f32 %v1168_v48, %v1102_v30  ;;  %v1364_v1 = vmul.f32 %v4520_v47, %v6000_v44  ;;  %v1283_v17 = vadd.f32 %v1251_v5, %v1185_v56  ;;  %v2392_v24 = vsub.f32 0.0, %v4659_v43  ;;  %v6003_v48 = vld [vmem:[#allocation64_spill] sm:$0xff]  ;;  %v4737_v56 = vld [vmem:[#allocation2 + $0xb0] sm:$0xff] }
 0x141   : > { %5987 = vst [vmem:[#allocation81_spill] sm:$0xff] %v4694_v45  ;;  %2733 = vrot.lane.b32.xlu0 %v4662_v23, %s3508_s23  ;;  %2701 = vrot.lane.b32.xlu1 %v5999_v11, %s3508_s23  ;;  %v2039_v49 = vadd.f32 1.0, %v2007_v41  ;;  %v4731_v62 = vmul.f32 %v2399_v25, %v4590_v38  ;;  %v2393_v53 = vsub.f32 0.0, %v1977_v9  ;;  %v2010_v42 = vmul.f32 0.3275911, %v1978_v57  ;;  %v4741_v38 = vld [vmem:[#allocation2 + $0x168] sm:$0xff] }
 0x142   : > { %5993 = vst [vmem:[#allocation37_spill] sm:$0xff] %v4708_v20  ;;  %v2391_v20 = vsub.f32 0.0, %v1975_v28  ;;  %v1298_v45 = vadd.f32 %v1266_v6, %v1200_v58  ;;  %v2394_v11 = vsub.f32 0.0, %v1978_v57  ;;  %3375 = vrcp.f32 %v2048_v52 }
 0x143   : > { %5995 = vst [vmem:[#allocation39_spill] sm:$0xff] %v4712_v21  ;;  %v6002_v21 = vld [vmem:[#allocation66_spill] sm:$0xff]  ;;  %v1462_v30 = vmul.f32 %v4534_v32, %v6003_v48  ;;  %3377 = vrcp.f32 %v2040_v60  ;;  %v4744_v25 = vmul.f32 0.70710677, %v4719_v31  ;;  %v4747_v58 = vmul.f32 %v2392_v24, %v4659_v43  ;;  %v4766_v24 = vld [vmem:[#allocation2 + $0xb1] sm:$0xff] }
 0x144   : > { %5997 = vst [vmem:[#allocation34_spill] sm:$0xff] %v4719_v31  ;;  %v1349_v23 = vmul.f32 %v4520_v47, %v6002_v21  ;;  %v4739_v5 = vpop.eup %3373  ;;  %v1396_v41 = vadd.f32 %v1364_v1, %v1298_v45  ;;  %3379 = vrcp.f32 %v2039_v49  ;;  %v4749_v52 = vmul.f32 %v2391_v20, %v1975_v28  ;;  %v6010_v45 = vld [vmem:[#allocation67_spill] sm:$0xff] }
 0x145   : > { %5998 = vst [vmem:[#allocation14_spill] sm:$0xff] %v4721_v4  ;;  %v2009_v4 = vmul.f32 0.3275911, %v1977_v9  ;;  %v2400_v7 = vsub.f32 0.0, %v4652_v12  ;;  %v4754_v60 = vmul.f32 %v2393_v53, %v1977_v9  ;;  %v1447_v1 = vmul.f32 %v4534_v32, %v6010_v45  ;;  %v6013_v9 = vld [vmem:[#allocation30_spill] sm:$0xff] }
 0x146   : > { %6001 = vst [vmem:[#allocation40_spill] sm:$0xff] %v4731_v62  ;;  %v1381_v6 = vadd.f32 %v1349_v23, %v1283_v17  ;;  %v6008_v62 = vld [vmem:[#allocation28_spill] sm:$0xff]  ;;  %v1546_v23 = vmul.f32 %v4489_v46, %v4737_v56  ;;  %v4760_v17 = vadd.f32 1.0, %v2010_v42  ;;  %v4762_v43 = vmul.f32 %v2394_v11, %v1978_v57  ;;  %v4772_v49 = vld [vmem:[#allocation2 + $0x169] sm:$0xff] }
 0x147   : > { %6004 = vst [vmem:[#allocation60_spill] sm:$0xff] %v4739_v5  ;;  %2735 = vrot.lane.b32.xlu2 %v6008_v62, %s3508_s23  ;;  %v2041_v5 = vadd.f32 1.0, %v2009_v4  ;;  %v1494_v20 = vadd.f32 %v1462_v30, %v1396_v41  ;;  %v1561_v28 = vmul.f32 %v4489_v46, %v4741_v38  ;;  %v6012_v4 = vld [vmem:[#allocation23_spill] sm:$0xff]  ;;  %v4777_v42 = vand.u32 2147483647, %v4744_v25  ;;  %v6015_v30 = vld [vmem:[#allocation48_spill] sm:$0xff] }
 0x148   : > { %6005 = vst [vmem:[#allocation62_spill] sm:$0xff] %v4744_v25  ;;  %v4774_v53 = vld [vmem:[#allocation2 + $0x16a] sm:$0xff]  ;;  %v1071_v41 = vmul.f32 %v4439_v27, %v6015_v30  ;;  %v4783_v2 = vpop.eup %3375  ;;  %v958_v25 = vmul.f32 %v4433_v35, %v4249_v36  ;;  %v974_v3 = vmul.f32 %v4433_v35, %v5996_v14  ;;  %v1463_v51 = vmul.f32 %v4534_v32, %v4523_v34 }
 0x149   : > { %6006 = vst [vmem:[#allocation66_spill] sm:$0xff] %v4747_v58  ;;  %2703 = vrot.lane.b32.xlu0 %v6012_v4, %s3508_s23  ;;  %2737 = vrot.lane.b32.xlu1 %v6013_v9, %s3508_s23  ;;  %v6014_v57 = vld [vmem:[#allocation43_spill] sm:$0xff]  ;;  %v4786_v4 = vmul.f32 %v2400_v7, %v4652_v12  ;;  %v4796_v54 = vpop.eup %3377  ;;  %v1644_v12 = vmul.f32 %v4513_v29, %v4766_v24  ;;  %3381 = vrcp.f32 %v2041_v5 }
 0x14a   : > { %6007 = vst [vmem:[#allocation64_spill] sm:$0xff] %v4749_v52  ;;  %v973_v11 = vmul.f32 %v4433_v35, %v6014_v57  ;;  %v6018_v9 = vld [vmem:[#allocation51_spill] sm:$0xff]  ;;  %v1056_v57 = vmul.f32 %v4439_v27, %v4294_v39  ;;  %v4802_v7 = vpop.eup %3379  ;;  %v1757_v36 = vmul.f32 %v4543_v61, %v4774_v53  ;;  %v1154_v39 = vmul.f32 %v4458_v15, %v4296_v10 }
 0x14b   : > { %6009 = vst [vmem:[#allocation82_spill] sm:$0xff] %v4754_v60  ;;  %v1169_v19 = vmul.f32 %v4458_v15, %v6018_v9  ;;  %v1593_v9 = vadd.f32 %v1561_v28, %v1494_v20  ;;  %v6024_v20 = vld [vmem:[#allocation24_spill] sm:$0xff]  ;;  %v4818_v28 = vld [vmem:[#allocation2 + $0x170] sm:$0xff]  ;;  %v1072_v10 = vmul.f32 %v4439_v27, %v6000_v44  ;;  %v1268_v14 = vmul.f32 %v4502_v37, %v4741_v38  ;;  %v6025_v44 = vld [vmem:[#allocation53_spill] sm:$0xff] }
 0x14c   : > { %6011 = vst [vmem:[#allocation67_spill] sm:$0xff] %v4762_v43  ;;  %v1479_v43 = vadd.f32 %v1447_v1, %v1381_v6  ;;  %v1103_v30 = vadd.f32 %v1071_v41, %v973_v11  ;;  %v6021_v6 = vld [vmem:[#allocation65_spill] sm:$0xff]  ;;  %v6023_v41 = vld [vmem:[#allocation15_spill] sm:$0xff]  ;;  %v976_v13 = vmul.f32 %v4433_v35, %v4741_v38  ;;  %3383 = vrcp.f32 %v4760_v17 }
 0x14d   : > { %6016 = vst [vmem:[#allocation43_spill] sm:$0xff] %v4783_v2  ;;  %v1267_v1 = vmul.f32 %v4502_v37, %v6021_v6  ;;  %v1365_v52 = vmul.f32 %v4520_v47, %v6023_v41  ;;  %v1104_v59 = vadd.f32 %v1072_v10, %v974_v3  ;;  %v1529_v10 = vld [vmem:[#allocation2 + $0x180] sm:$0xff] }
 0x14e   : > { %6017 = vst [vmem:[#allocation48_spill] sm:$0xff] %v4786_v4  ;;  %v1578_v2 = vadd.f32 %v1546_v23, %v1479_v43  ;;  %v1659_v4 = vmul.f32 %v4513_v29, %v4772_v49  ;;  %v1201_v11 = vadd.f32 %v1169_v19, %v1103_v30  ;;  %v1742_v23 = vmul.f32 %v4543_v61, %v4790_v8 }
 0x14f   : > { %6019 = vst [vmem:[#allocation51_spill] sm:$0xff] %v4790_v8  ;;  %v1252_v43 = vmul.f32 %v4502_v37, %v4604_v26  ;;  %2705 = vrot.lane.b32.xlu2 %v6024_v20, %s3508_s23  ;;  %v1170_v19 = vmul.f32 %v4458_v15, %v6003_v48  ;;  %v1088_v30 = vadd.f32 %v1056_v57, %v958_v25  ;;  %v6026_v48 = vld [vmem:[#allocation26_spill] sm:$0xff] }
 0x150   : > { %6020 = vst [vmem:[#allocation83_spill] sm:$0xff] %v4796_v54  ;;  %v1299_v58 = vadd.f32 %v1267_v1, %v1201_v11  ;;  %v1676_v62 = vadd.f32 %v1644_v12, %v1578_v2  ;;  %v959_v20 = vmul.f32 %v4433_v35, %v5991_v22  ;;  %v1562_v2 = vmul.f32 %v4489_v46, %v4818_v28  ;;  %v4844_v1 = vld [vmem:[#allocation2 + $0xc0] sm:$0xff] }
 0x151   : > { %6022 = vst [vmem:[#allocation65_spill] sm:$0xff] %v4802_v7  ;;  %v1691_v7 = vadd.f32 %v1659_v4, %v1593_v9  ;;  %v1186_v33 = vadd.f32 %v1154_v39, %v1088_v30  ;;  %2739 = vrot.lane.b32.xlu0 %v6025_v44, %s3508_s23  ;;  %2707 = vrot.lane.b32.xlu1 %v6026_v48, %s3508_s23  ;;  %v4840_v4 = vld [vmem:[#allocation2 + $0x171] sm:$0xff]  ;;  %v4867_v30 = vpop.eup %3381 }
 0x152   : > { %v1397_v25 = vadd.f32 %v1365_v52, %v1299_v58  ;;  %v1057_v22 = vmul.f32 %v4439_v27, %v6002_v21  ;;  %v1202_v3 = vadd.f32 %v1170_v19, %v1104_v59  ;;  %v1366_v57 = vmul.f32 %v4520_v47, %v4772_v49  ;;  %6028 = vst [vmem:[#allocation15_spill] sm:$0xff] %v4867_v30 }
 0x153   : > { %v1284_v5 = vadd.f32 %v1252_v43, %v1186_v33  ;;  %v975_v12 = vmul.f32 %v4433_v35, %v6021_v6  ;;  %v1774_v58 = vadd.f32 %v1742_v23, %v1676_v62  ;;  %v1073_v52 = vmul.f32 %v4439_v27, %v6023_v41  ;;  %v6027_v41 = vld [vmem:[#allocation61_spill] sm:$0xff] }
 0x154   : > { %v1495_v9 = vadd.f32 %v1463_v51, %v1397_v25  ;;  %v1171_v21 = vmul.f32 %v4458_v15, %v4523_v34  ;;  %v1789_v39 = vadd.f32 %v1757_v36, %v1691_v7  ;;  %v1300_v11 = vadd.f32 %v1268_v14, %v1202_v3  ;;  %v4863_v7 = vld [vmem:[#allocation2 + $0x172] sm:$0xff] }
 0x155   : > { %v1350_v59 = vmul.f32 %v4520_v47, %v4639_v55  ;;  %v1448_v33 = vmul.f32 %v4534_v32, %v4641_v50  ;;  %v2001_v43 = vmul.f32 0.3275911, %v4777_v42  ;;  %v1660_v51 = vmul.f32 %v4513_v29, %v4840_v4 }
 0x156   : > { %v1547_v62 = vmul.f32 %v4489_v46, %v4844_v1  ;;  %v1105_v6 = vadd.f32 %v1073_v52, %v975_v12  ;;  %v1594_v34 = vadd.f32 %v1562_v2, %v1495_v9  ;;  %v1398_v36 = vadd.f32 %v1366_v57, %v1300_v11  ;;  %v4877_v57 = vld [vmem:[#allocation2 + $0xc1] sm:$0xff] }
 0x157   : > { %2741 = vrot.lane.b32.xlu2 %v6027_v41, %s3508_s23  ;;  %v1464_v23 = vmul.f32 %v4534_v32, %v4774_v53  ;;  %v1382_v19 = vadd.f32 %v1350_v59, %v1284_v5  ;;  %v4870_v14 = vadd.f32 %v4573_v16, %v1774_v58  ;;  %v1089_v3 = vadd.f32 %v1057_v22, %v959_v20  ;;  %v6029_v58 = vld [vmem:[#allocation41_spill] sm:$0xff] }
 0x158   : > { %v1203_v25 = vadd.f32 %v1171_v21, %v1105_v6  ;;  %v1155_v12 = vmul.f32 %v4458_v15, %v6010_v45  ;;  %v4875_v2 = vadd.f32 %v4573_v16, %v1789_v39  ;;  %v1269_v52 = vmul.f32 %v4502_v37, %v4818_v28  ;;  %v4891_v21 = vld [vmem:[#allocation2 + $0xc2] sm:$0xff] }
 0x159   : > { %v1480_v9 = vadd.f32 %v1448_v33, %v1382_v19  ;;  %v1253_v5 = vmul.f32 %v4502_v37, %v4737_v56  ;;  %2709 = vrot.lane.b32.xlu0 %v6029_v58, %s3508_s23  ;;  %2743 = vrot.lane.b32.xlu1 %v4528_v40, %s3508_s23  ;;  %v2385_v45 = vsub.f32 0.0, %v4777_v42  ;;  %v1758_v20 = vmul.f32 %v4543_v61, %v4863_v7  ;;  %v1627_v33 = vld [vmem:[#allocation2 + $0x181] sm:$0xff] }
 0x15a   : > { %v1563_v22 = vmul.f32 %v4489_v46, %v1529_v10  ;;  %v1367_v39 = vmul.f32 %v4520_v47, %v4840_v4  ;;  %v1692_v11 = vadd.f32 %v1660_v51, %v1594_v34  ;;  %v1496_v59 = vadd.f32 %v1464_v23, %v1398_v36  ;;  %v4912_v23 = vld [vmem:[#allocation2 + $0x188] sm:$0xff] }
 0x15b   : > { %v1579_v6 = vadd.f32 %v1547_v62, %v1480_v9  ;;  %v1301_v19 = vadd.f32 %v1269_v52, %v1203_v25  ;;  %v2033_v58 = vadd.f32 1.0, %v2001_v43  ;;  %v4896_v40 = vmul.f32 0.70710677, %v4870_v14 }
 0x15c   : > { %v1645_v48 = vmul.f32 %v4513_v29, %v4877_v57  ;;  %v1187_v44 = vadd.f32 %v1155_v12, %v1089_v3  ;;  %v4901_v41 = vmul.f32 0.70710677, %v4875_v2  ;;  %v1743_v54 = vmul.f32 %v4543_v61, %v4891_v21  ;;  %v4914_v3 = vld [vmem:[#allocation2 + $0xc8] sm:$0xff]  ;;  %v6030_v12 = vld [vmem:[#allocation63_spill] sm:$0xff] }
 0x15d   : > { %v1351_v51 = vmul.f32 %v4520_v47, %v4766_v24  ;;  %v1449_v62 = vmul.f32 %v4534_v32, %v4790_v8  ;;  %v1661_v43 = vmul.f32 %v4513_v29, %v1627_v33  ;;  %v1399_v34 = vadd.f32 %v1367_v39, %v1301_v19  ;;  %v1725_v39 = vld [vmem:[#allocation2 + $0x182] sm:$0xff] }
 0x15e   : > { %v1465_v36 = vmul.f32 %v4534_v32, %v4863_v7  ;;  %v1285_v25 = vadd.f32 %v1253_v5, %v1187_v44  ;;  %v1790_v9 = vadd.f32 %v1758_v20, %v1692_v11  ;;  %v1595_v52 = vadd.f32 %v1563_v22, %v1496_v59 }
 0x15f   : > { %2711 = vrot.lane.b32.xlu2 %v6030_v12, %s3508_s23  ;;  %v1677_v18 = vadd.f32 %v1645_v48, %v1579_v6  ;;  %v1970_v60 = vand.u32 2147483647, %v4896_v40  ;;  %v1074_v30 = vmul.f32 %v4439_v27, %v4772_v49  ;;  %v1172_v44 = vmul.f32 %v4458_v15, %v4774_v53  ;;  %v4935_v49 = vld [vmem:[#allocation2 + $0x189] sm:$0xff] }
 0x160   : > { %v1383_v19 = vadd.f32 %v1351_v51, %v1285_v25  ;;  %v1985_v5 = vand.u32 2147483647, %v4901_v41  ;;  %v1564_v20 = vmul.f32 %v4489_v46, %v4912_v23  ;;  %v1548_v48 = vmul.f32 %v4489_v46, %v4914_v3 }
 0x161   : > { %v1775_v8 = vadd.f32 %v1743_v54, %v1677_v18  ;;  %2745 = vrot.lane.b32.xlu0 %v4599_v63, %s3508_s23  ;;  %2713 = vrot.lane.b32.xlu1 %v4576_v0, %s3508_s23  ;;  %v1497_v38 = vadd.f32 %v1465_v36, %v1399_v34  ;;  %v1106_v53 = vadd.f32 %v1074_v30, %v976_v13  ;;  %3385 = vrcp.f32 %v2033_v58 }
 0x162   : > { %v1270_v54 = vmul.f32 %v4502_v37, %v1529_v10  ;;  %v4939_v18 = vmul.f32 %v2385_v45, %v4777_v42  ;;  %v4942_v22 = vadd.f32 %v4573_v16, %v1790_v9  ;;  %v1693_v11 = vadd.f32 %v1661_v43, %v1595_v52  ;;  %v4950_v10 = vld [vmem:[#allocation2 + $0xc9] sm:$0xff]  ;;  %v1531_v42 = vld [vmem:[#allocation2 + $0x198] sm:$0xff] }
 0x163   : > { %v1759_v17 = vmul.f32 %v4543_v61, %v1725_v39  ;;  %v1481_v59 = vadd.f32 %v1449_v62, %v1383_v19  ;;  %v1204_v6 = vadd.f32 %v1172_v44, %v1106_v53  ;;  %v2017_v51 = vmul.f32 0.3275911, %v1985_v5  ;;  %v4952_v45 = vld [vmem:[#allocation2 + $0x18a] sm:$0xff]  ;;  %v4962_v19 = vpop.eup %3383 }
 0x164   : > { %6031 = vst [vmem:[#allocation63_spill] sm:$0xff] %v4939_v18  ;;  %v2002_v25 = vmul.f32 0.3275911, %v1970_v60  ;;  %v4946_v34 = vadd.f32 %v4573_v16, %v1775_v8  ;;  %v1662_v13 = vmul.f32 %v4513_v29, %v4935_v49  ;;  %v1596_v30 = vadd.f32 %v1564_v20, %v1497_v38 }
 0x165   : > { %6032 = vst [vmem:[#allocation84_spill] sm:$0xff] %v4942_v22  ;;  %v1580_v43 = vadd.f32 %v1548_v48, %v1481_v59  ;;  %v1302_v36 = vadd.f32 %v1270_v54, %v1204_v6  ;;  %v1368_v58 = vmul.f32 %v4520_v47, %v1627_v33  ;;  %v4958_v62 = vmul.f32 0.70710677, %v4942_v22 }
 0x166   : > { %6033 = vst [vmem:[#allocation85_spill] sm:$0xff] %v4946_v34  ;;  %v2386_v8 = vsub.f32 0.0, %v1970_v60  ;;  %v1791_v9 = vadd.f32 %v1759_v17, %v1693_v11  ;;  %v960_v52 = vmul.f32 %v4433_v35, %v4604_v26  ;;  %v1646_v44 = vmul.f32 %v4513_v29, %v4950_v10  ;;  %v4970_v11 = vld [vmem:[#allocation2 + $0xca] sm:$0xff]  ;;  %v1629_v17 = vld [vmem:[#allocation2 + $0x199] sm:$0xff] }
 0x167   : > { %2747 = vrot.lane.b32.xlu2 %v4875_v2, %s3508_s23  ;;  %6034 = vst [vmem:[#allocation86_spill] sm:$0xff] %v4958_v62  ;;  %v1400_v20 = vadd.f32 %v1368_v58, %v1302_v36  ;;  %v1466_v48 = vmul.f32 %v4534_v32, %v1725_v39  ;;  %v1565_v33 = vmul.f32 %v4489_v46, %v1531_v42  ;;  %v2049_v38 = vadd.f32 1.0, %v2017_v51  ;;  %v4972_v26 = vpop.eup %3385 }
 0x168   : > { %v2401_v53 = vsub.f32 0.0, %v1985_v5  ;;  %v2034_v54 = vadd.f32 1.0, %v2002_v25  ;;  %v1760_v59 = vmul.f32 %v4543_v61, %v4952_v45  ;;  %v4979_v39 = vmul.f32 0.70710677, %v4946_v34 }
 0x169   : > { %2715 = vrot.lane.b32.xlu0 %v4719_v31, %s3508_s23  ;;  %2749 = vrot.lane.b32.xlu1 %v4942_v22, %s3508_s23  ;;  %v1694_v6 = vadd.f32 %v1662_v13, %v1596_v30  ;;  %v1678_v51 = vadd.f32 %v1646_v44, %v1580_v43  ;;  %v1498_v25 = vadd.f32 %v1466_v48, %v1400_v20  ;;  %v1986_v42 = vand.u32 2147483647, %v4958_v62  ;;  %v1727_v43 = vld [vmem:[#allocation2 + $0x19a] sm:$0xff] }
 0x16a   : > { %6035 = vst [vmem:[#allocation87_spill] sm:$0xff] %v4979_v39  ;;  %v4983_v36 = vadd.f32 %v4573_v16, %v1791_v9  ;;  %v1058_v58 = vmul.f32 %v4439_v27, %v4639_v55  ;;  %v1156_v31 = vmul.f32 %v4458_v15, %v4641_v50  ;;  %v4989_v18 = vmul.f32 %v2386_v8, %v1970_v60 }
 0x16b   : > { %v1744_v22 = vmul.f32 %v4543_v61, %v4970_v11  ;;  %v1597_v0 = vadd.f32 %v1565_v33, %v1498_v25  ;;  %v1663_v13 = vmul.f32 %v4513_v29, %v1629_v17  ;;  %v4994_v30 = vmul.f32 %v2401_v53, %v1985_v5 }
 0x16c   : > { %6036 = vst [vmem:[#allocation88_spill] sm:$0xff] %v4983_v36  ;;  %3387 = vrcp.f32 %v2034_v54  ;;  %v1090_v9 = vadd.f32 %v1058_v58, %v960_v52  ;;  %v1254_v44 = vmul.f32 %v4502_v37, %v4844_v1  ;;  %v1971_v55 = vand.u32 2147483647, %v4979_v39 }
 0x16d   : > { %3389 = vrcp.f32 %v2049_v38  ;;  %v1792_v50 = vadd.f32 %v1760_v59, %v1694_v6  ;;  %v1776_v60 = vadd.f32 %v1744_v22, %v1678_v51  ;;  %v2018_v8 = vmul.f32 0.3275911, %v1986_v42  ;;  %v1515_v38 = vld [vmem:[#allocation2 + $0xd8] sm:$0xff] }
 0x16e   : > { %v2402_v20 = vsub.f32 0.0, %v1986_v42  ;;  %v5002_v48 = vmul.f32 0.70710677, %v4983_v36  ;;  %v1188_v5 = vadd.f32 %v1156_v31, %v1090_v9  ;;  %v1695_v33 = vadd.f32 %v1663_v13, %v1597_v0 }
 0x16f   : > { %2717 = vrot.lane.b32.xlu2 %v4870_v14, %s3508_s23  ;;  %v1761_v52 = vmul.f32 %v4543_v61, %v1727_v43  ;;  %v1352_v1 = vmul.f32 %v4520_v47, %v4877_v57  ;;  %v977_v53 = vmul.f32 %v4433_v35, %v4818_v28  ;;  %v1450_v54 = vmul.f32 %v4534_v32, %v4891_v21 }
 0x170   : > { %6037 = vst [vmem:[#allocation89_spill] sm:$0xff] %v5002_v48  ;;  %v1286_v22 = vadd.f32 %v1254_v44, %v1188_v5  ;;  %v1075_v59 = vmul.f32 %v4439_v27, %v4840_v4  ;;  %v1173_v31 = vmul.f32 %v4458_v15, %v4863_v7  ;;  %v2003_v0 = vmul.f32 0.3275911, %v1971_v55  ;;  %v1613_v44 = vld [vmem:[#allocation2 + $0xd9] sm:$0xff] }
 0x171   : > { %2751 = vrot.lane.b32.xlu0 %v4983_v36, %s3508_s23  ;;  %v2387_v17 = vsub.f32 0.0, %v1971_v55  ;;  %2719 = vrot.lane.b32.xlu1 %v4946_v34, %s3508_s23  ;;  %v5020_v28 = vadd.f32 %v4573_v16, %v1792_v50  ;;  %v5023_v57 = vadd.f32 %v4573_v16, %v1776_v60  ;;  %v1549_v6 = vmul.f32 %v4489_v46, %v1515_v38  ;;  %v1711_v60 = vld [vmem:[#allocation2 + $0xda] sm:$0xff] }
 0x172   : > { %v5025_v21 = vpop.eup %3387  ;;  %v1384_v4 = vadd.f32 %v1352_v1, %v1286_v22  ;;  %v1107_v7 = vadd.f32 %v1075_v59, %v977_v53  ;;  %v1271_v51 = vmul.f32 %v4502_v37, %v4912_v23  ;;  %v2050_v58 = vadd.f32 1.0, %v2018_v8  ;;  %v1532_v8 = vld [vmem:[#allocation2 + $0x1a0] sm:$0xff]  ;;  %v6041_v59 = vld [vmem:[#allocation51_spill] sm:$0xff] }
 0x173   : > { %6038 = vst [vmem:[#allocation90_spill] sm:$0xff] %v5023_v57  ;;  %v5030_v25 = vpop.eup %3389  ;;  %v5032_v13 = vmul.f32 %v2402_v20, %v1986_v42  ;;  %v5035_v43 = vand.u32 2147483647, %v5002_v48  ;;  %v1793_v9 = vadd.f32 %v1761_v52, %v1695_v33  ;;  %v1369_v1 = vmul.f32 %v4520_v47, %v4935_v49  ;;  %v1630_v22 = vld [vmem:[#allocation2 + $0x1a1] sm:$0xff] }
 0x174   : > { %v1482_v50 = vadd.f32 %v1450_v54, %v1384_v4  ;;  %v1205_v5 = vadd.f32 %v1173_v31, %v1107_v7  ;;  %v961_v38 = vmul.f32 %v4433_v35, %v4737_v56  ;;  %v2035_v23 = vadd.f32 1.0, %v2003_v0 }
 0x175   : > { %v5042_v53 = vmul.f32 0.70710677, %v5020_v28  ;;  %v5045_v42 = vmul.f32 0.70710677, %v5023_v57  ;;  %v1059_v20 = vmul.f32 %v4439_v27, %v4766_v24  ;;  %v1647_v49 = vmul.f32 %v4513_v29, %v1613_v44  ;;  %v1516_v44 = vld [vmem:[#allocation2 + $0xe0] sm:$0xff] }
 0x176   : > { %v1581_v33 = vadd.f32 %v1549_v6, %v1482_v50  ;;  %v1303_v52 = vadd.f32 %v1271_v51, %v1205_v5  ;;  %v1467_v35 = vmul.f32 %v4534_v32, %v4952_v45  ;;  %v5055_v56 = vadd.f32 %v4573_v16, %v1793_v9  ;;  %v6043_v50 = vld [vmem:[#allocation15_spill] sm:$0xff] }
 0x177   : > { %6039 = vst [vmem:[#allocation91_spill] sm:$0xff] %v5045_v42  ;;  %2753 = vrot.lane.b32.xlu2 %v5020_v28, %s3508_s23  ;;  %v1091_v54 = vadd.f32 %v1059_v20, %v961_v38  ;;  %v1157_v31 = vmul.f32 %v4458_v15, %v6041_v59  ;;  %v1255_v27 = vmul.f32 %v4502_v37, %v4914_v3  ;;  %3391 = vrcp.f32 %v2050_v58  ;;  %v1728_v15 = vld [vmem:[#allocation2 + $0x1a2] sm:$0xff] }
 0x178   : > { %6040 = vst [vmem:[#allocation92_spill] sm:$0xff] %v5055_v56  ;;  %v1679_v24 = vadd.f32 %v1647_v49, %v1581_v33  ;;  %v1745_v0 = vmul.f32 %v4543_v61, %v1711_v60  ;;  %v1401_v4 = vadd.f32 %v1369_v1, %v1303_v52  ;;  %v1566_v6 = vmul.f32 %v4489_v46, %v1532_v8 }
 0x179   : > { %v2019_v45 = vmul.f32 0.3275911, %v5035_v43  ;;  %v5064_v7 = vmul.f32 %v2387_v17, %v1971_v55  ;;  %2721 = vrot.lane.b32.xlu0 %v5023_v57, %s3508_s23  ;;  %2755 = vrot.lane.b32.xlu1 %v5055_v56, %s3508_s23  ;;  %v1189_v51 = vadd.f32 %v1157_v31, %v1091_v54  ;;  %v1664_v9 = vmul.f32 %v4513_v29, %v1630_v22 }
 0x17a   : > { %v1777_v37 = vadd.f32 %v1745_v0, %v1679_v24  ;;  %v1499_v3 = vadd.f32 %v1467_v35, %v1401_v4  ;;  %v2105_v60 = vmul.f32 1.0614054, %v6043_v50  ;;  %v5073_v58 = vand.u32 2147483647, %v5042_v53  ;;  %v6045_v35 = vld [vmem:[#allocation42_spill] sm:$0xff] }
 0x17b   : > { %6042 = vst [vmem:[#allocation51_spill] sm:$0xff] %v5064_v7  ;;  %v5076_v55 = vand.u32 2147483647, %v5045_v42  ;;  %v1287_v17 = vadd.f32 %v1255_v27, %v1189_v51  ;;  %v1353_v5 = vmul.f32 %v4520_v47, %v4950_v10  ;;  %v1762_v8 = vmul.f32 %v4543_v61, %v1728_v15  ;;  %v1614_v10 = vld [vmem:[#allocation2 + $0xe1] sm:$0xff]  ;;  %v6068_v42 = vld [vmem:[#allocation71_spill] sm:$0xff] }
 0x17c   : > { %v5081_v1 = vadd.f32 %v4573_v16, %v1777_v37  ;;  %v1598_v38 = vadd.f32 %v1566_v6, %v1499_v3  ;;  %v2137_v20 = vadd.f32 -1.4531521, %v2105_v60  ;;  %v1451_v49 = vmul.f32 %v4534_v32, %v4970_v11 }
 0x17d   : > { %v1385_v33 = vadd.f32 %v1353_v5, %v1287_v17  ;;  %v1550_v52 = vmul.f32 %v4489_v46, %v1516_v44  ;;  %v2089_v22 = vmul.f32 1.0614054, %v6045_v35  ;;  %v2403_v54 = vsub.f32 0.0, %v5035_v43  ;;  %v5095_v27 = vpop.eup %3391  ;;  %v1712_v46 = vld [vmem:[#allocation2 + $0xe2] sm:$0xff] }
 0x17e   : > { %6044 = vst [vmem:[#allocation15_spill] sm:$0xff] %v5081_v1  ;;  %v5090_v59 = vmul.f32 0.70710677, %v5055_v56  ;;  %v1696_v47 = vadd.f32 %v1664_v9, %v1598_v38  ;;  %v2169_v31 = vmul.f32 %v6043_v50, %v2137_v20  ;;  %v2051_v24 = vadd.f32 1.0, %v2019_v45  ;;  %v6047_v9 = vld [vmem:[#allocation56_spill] sm:$0xff] }
 0x17f   : > { %2723 = vrot.lane.b32.xlu2 %v5081_v1, %s3508_s23  ;;  %3393 = vrcp.f32 %v2035_v23  ;;  %v1483_v32 = vadd.f32 %v1451_v49, %v1385_v33  ;;  %v2121_v11 = vadd.f32 -1.4531521, %v2089_v22  ;;  %v2020_v0 = vmul.f32 0.3275911, %v5073_v58 }
 0x180   : > { %6046 = vst [vmem:[#allocation42_spill] sm:$0xff] %v5090_v59  ;;  %v2004_v4 = vmul.f32 0.3275911, %v5076_v55  ;;  %v1794_v6 = vadd.f32 %v1762_v8, %v1696_v47  ;;  %v2201_v15 = vadd.f32 1.4214138, %v2169_v31  ;;  %v1648_v37 = vmul.f32 %v4513_v29, %v1614_v10 }
 0x181   : > { %v1582_v51 = vadd.f32 %v1550_v52, %v1483_v32  ;;  %v2153_v3 = vmul.f32 %v6045_v35, %v2121_v11  ;;  %v2107_v44 = vmul.f32 1.0614054, %v6047_v9  ;;  %v1989_v60 = vand.u32 2147483647, %v5090_v59  ;;  %v2824_v11 = vld [vmem:[%s5732_s7 + $0x8] sm:$0xff] }
 0x182   : > { %v5104_v23 = vadd.f32 %v4573_v16, %v1794_v6  ;;  %v1746_v45 = vmul.f32 %v4543_v61, %v1712_v46  ;;  %v2233_v17 = vmul.f32 %v6043_v50, %v2201_v15  ;;  %v5109_v5 = vmul.f32 0.70710677, %v5081_v1  ;;  %v2825_v61 = vld [vmem:[%s5732_s7 + $0x10] sm:$0x1f]  ;;  %v6065_v1 = vld [vmem:[#allocation65_spill] sm:$0xff] }
 0x183   : > { %v1680_v38 = vadd.f32 %v1648_v37, %v1582_v51  ;;  %v2185_v8 = vadd.f32 1.4214138, %v2153_v3  ;;  %v2139_v20 = vadd.f32 -1.4531521, %v2107_v44  ;;  %v5112_v29 = vmul.f32 %v2403_v54, %v5035_v43  ;;  %3304 = vmatpush.msk.msra.mxu2 %vm2927_vm3, %v2825_v61  ;;  %3263 = vmatpush.msk.msra.mxu1 %vm2927_vm3, %v2825_v61  ;;  %v6051_v37 = vld [vmem:[#allocation82_spill] sm:$0xff]  ;;  %v6052_v3 = vld [vmem:[#allocation7_spill] sm:$0xff] }
 0x184   : > { %6048 = vst [vmem:[#allocation56_spill] sm:$0xff] %v5104_v23  ;;  %v2052_v33 = vadd.f32 1.0, %v2020_v0  ;;  %v2404_v49 = vsub.f32 0.0, %v5073_v58  ;;  %2757 = vrot.lane.b32.xlu0 %v5104_v23, %s3508_s23  ;;  %v2265_v52 = vadd.f32 -0.28449672, %v2233_v17  ;;  %v2388_v47 = vsub.f32 0.0, %v5076_v55 }
 0x185   : > { %6049 = vst [vmem:[#allocation93_spill] sm:$0xff] %v5109_v5  ;;  %v5120_v22 = vpop.eup %3393  ;;  %v1778_v10 = vadd.f32 %v1746_v45, %v1680_v38  ;;  %v2217_v31 = vmul.f32 %v6045_v35, %v2185_v8  ;;  %v2171_v43 = vmul.f32 %v6047_v9, %v2139_v20  ;;  %v2036_v54 = vadd.f32 1.0, %v2004_v4  ;;  %3305 = vmatpush.msra.mxu2 %v2824_v11  ;;  %v6054_v8 = vld [vmem:[#allocation80_spill] sm:$0xff]  ;;  %v6055_v20 = vld [vmem:[#allocation83_spill] sm:$0xff] }
 0x186   : > { %v2021_v32 = vmul.f32 0.3275911, %v1989_v60  ;;  %v2405_v46 = vsub.f32 0.0, %v1989_v60  ;;  %v1973_v0 = vand.u32 2147483647, %v5109_v5  ;;  %v2297_v15 = vmul.f32 %v6043_v50, %v2265_v52  ;;  %2945 = vmatpush.msra.mxu1 %v2824_v11  ;;  %v6058_v61 = vld [vmem:[#allocation72_spill] sm:$0xff] }
 0x187   : > { %v5130_v6 = vadd.f32 %v4573_v16, %v1778_v10  ;;  %v2203_v51 = vadd.f32 1.4214138, %v2171_v43  ;;  %3395 = vrcp.f32 %v2051_v24  ;;  %v2475_v4 = vmul.f32 1.442695, %v6051_v37  ;;  %v2823_v43 = vld [vmem:[%s5732_s7] sm:$0xff] }
 0x188   : > { %v5135_v44 = vmul.f32 0.5, %v6052_v3  ;;  %v2249_v45 = vadd.f32 -0.28449672, %v2217_v31  ;;  %3397 = vrcp.f32 %v2052_v33  ;;  %v5138_v17 = vmul.f32 %v2404_v49, %v5073_v58  ;;  %3306 = vmatpush.msra.mxu2 %v2823_v43  ;;  %2946 = vmatpush.msra.mxu1 %v2823_v43  ;;  %v6063_v3 = vld [vmem:[#allocation38_spill] sm:$0xff] }
 0x189   : > { %6050 = vst [vmem:[#allocation94_spill] sm:$0xff] %v5130_v6  ;;  %v5141_v38 = vmul.f32 %v2388_v47, %v5076_v55  ;;  %2725 = vrot.lane.b32.xlu1 %v5130_v6, %s3508_s23  ;;  %v2235_v16 = vmul.f32 %v6047_v9, %v2203_v51  ;;  %3399 = vrcp.f32 %v2036_v54  ;;  %v2053_v24 = vadd.f32 1.0, %v2021_v32  ;;  %v6059_v32 = vld [vmem:[#allocation8_spill] sm:$0xff] }
 0x18a   : > { %vm1913_vm4 = vcmp.ge.f32.partialorder %v6054_v8, 0.0  ;;  %v2104_v52 = vmul.f32 1.0614054, %v6055_v20  ;;  %v5148_v33 = vmul.f32 %v2405_v46, %v1989_v60  ;;  %v2005_v58 = vmul.f32 0.3275911, %v1973_v0  ;;  %v6060_v46 = vld [vmem:[#allocation25_spill] sm:$0xff] }
 0x18b   : > { %6053 = vst [vmem:[#allocation82_spill] sm:$0xff] %v5141_v38  ;;  %v5151_v49 = vmul.f32 0.70710677, %v5104_v23  ;;  %v2329_v55 = vadd.f32 0.2548296, %v2297_v15  ;;  %v5154_v47 = vmul.f32 0.5, %v6058_v61  ;;  %3401 = vpow2.f32 %v2475_v4 }
 0x18c   : > { %6056 = vst [vmem:[#allocation7_spill] sm:$0xff] %v5148_v33  ;;  %v2281_v10 = vmul.f32 %v6045_v35, %v2249_v45  ;;  %v2136_v31 = vadd.f32 -1.4531521, %v2104_v52  ;;  %v5859_v54 = vmov -1.0   ;;  %vm1897_vm5 = vcmp.ge.f32.partialorder %v6059_v32, 0.0  ;;  %v6062_v4 = vld [vmem:[#allocation35_spill] sm:$0xff] }
 0x18d   : > { %6057 = vst [vmem:[#allocation80_spill] sm:$0xff] %v5151_v49  ;;  %v5161_v60 = vsel %vm1913_vm4, 1.0, %v5859_v54  ;;  %v2443_v11 = vmul.f32 1.442695, %v6060_v46  ;;  %v2267_v15 = vadd.f32 -0.28449672, %v2235_v16  ;;  %v5165_v51 = vpop.eup %3395  ;;  %v2361_v16 = vmul.f32 %v6043_v50, %v2329_v55 }
 0x18e   : > { %v5168_v37 = vmul.f32 0.70710677, %v5130_v6  ;;  %vm1915_vm6 = vcmp.ge.f32.partialorder %v6062_v4, 0.0  ;;  %v2479_v45 = vmul.f32 1.442695, %v6063_v3  ;;  %v2168_v8 = vmul.f32 %v6055_v20, %v2136_v31  ;;  %v5173_v52 = vpop.eup %3397  ;;  %v6067_v31 = vld [vmem:[#allocation28_spill] sm:$0xff] }
 0x18f   : > { %v2037_v61 = vadd.f32 1.0, %v2005_v58  ;;  %v2389_v54 = vsub.f32 0.0, %v1973_v0  ;;  %v1990_v46 = vand.u32 2147483647, %v5151_v49  ;;  %v5177_v43 = vpop.eup %3399  ;;  %3403 = vrcp.f32 %v2053_v24  ;;  %v6071_v4 = vld [vmem:[#allocation66_spill] sm:$0xff] }
 0x190   : > { %6061 = vst [vmem:[#allocation83_spill] sm:$0xff] %v5168_v37  ;;  %v2313_v23 = vadd.f32 0.2548296, %v2281_v10  ;;  %v2200_v6 = vadd.f32 1.4214138, %v2168_v8  ;;  %v6066_v57 = vmov -1.0   ;;  %3405 = vpow2.f32 %v2443_v11 }
 0x191   : > { %6064 = vst [vmem:[#allocation72_spill] sm:$0xff] %v5177_v43  ;;  %v2103_v56 = vmul.f32 1.0614054, %v6065_v1  ;;  %v5183_v3 = vsel %vm1897_vm5, 1.0, %v6066_v57  ;;  %v5186_v58 = vmul.f32 0.5, %v6067_v31  ;;  %v2299_v49 = vmul.f32 %v6047_v9, %v2267_v15  ;;  %v3402_v5 = vpop.eup %3401  ;;  %v6076_v43 = vld [vmem:[#allocation21_spill] sm:$0xff] }
 0x192   : > { %v1974_v50 = vand.u32 2147483647, %v5168_v37  ;;  %3407 = vpow2.f32 %v2479_v45  ;;  %v2232_v24 = vmul.f32 %v6055_v20, %v2200_v6  ;;  %v5191_v10 = vmul.f32 %v2389_v54, %v1973_v0 }
 0x193   : > { %v2135_v55 = vadd.f32 -1.4531521, %v2103_v56  ;;  %3409 = vrcp.f32 %v2037_v61  ;;  %v2521_v8 = vmul.f32 %v3402_v5, %v2361_v16  ;;  %v5196_v32 = vsel %vm1915_vm6, 1.0, %v6066_v57  ;;  %v6069_v56 = vld [vmem:[#allocation54_spill] sm:$0xff] }
 0x194   : > { %v2022_v11 = vmul.f32 0.3275911, %v1990_v46  ;;  %v2345_v31 = vmul.f32 %v6045_v35, %v2313_v23  ;;  %v2264_v15 = vadd.f32 -0.28449672, %v2232_v24  ;;  %v2406_v37 = vsub.f32 0.0, %v1990_v46  ;;  %v6072_v35 = vld [vmem:[#allocation19_spill] sm:$0xff] }
 0x195   : > { %v2167_v59 = vmul.f32 %v6065_v1, %v2135_v55  ;;  %v2331_v45 = vadd.f32 0.2548296, %v2299_v49  ;;  %vm1912_vm7 = vcmp.ge.f32.partialorder %v6068_v42, 0.0  ;;  %v2092_v6 = vmul.f32 1.0614054, %v6069_v56  ;;  %v5202_v0 = vpop.eup %3403  ;;  %v6073_v24 = vld [vmem:[#allocation64_spill] sm:$0xff] }
 0x196   : > { %6070 = vst [vmem:[#allocation8_spill] sm:$0xff] %v5202_v0  ;;  %v2006_v5 = vmul.f32 0.3275911, %v1974_v50  ;;  %v2296_v54 = vmul.f32 %v6055_v20, %v2264_v15  ;;  %v2473_v61 = vmul.f32 1.442695, %v6071_v4  ;;  %v3406_v34 = vpop.eup %3405  ;;  %v2553_v39 = vsub.f32 1.0, %v2521_v8 }
 0x197   : > { %v2199_v16 = vadd.f32 1.4214138, %v2167_v59  ;;  %v5207_v23 = vmul.f32 0.5, %v6072_v35  ;;  %v2471_v55 = vmul.f32 1.442695, %v6073_v24  ;;  %v2054_v42 = vadd.f32 1.0, %v2022_v11 }
 0x198   : > { %v2124_v49 = vadd.f32 -1.4531521, %v2092_v6  ;;  %v3408_v36 = vpop.eup %3407  ;;  %v2505_v33 = vmul.f32 %v3406_v34, %v2345_v31  ;;  %v5211_v38 = vsel %vm1912_vm7, 1.0, %v6066_v57  ;;  %v5216_v4 = vmul.f32 %v2406_v37, %v1990_v46  ;;  %v6075_v24 = vld [vmem:[#allocation32_spill] sm:$0xff] }
 0x199   : > { %v2231_v0 = vmul.f32 %v6065_v1, %v2199_v16  ;;  %v5214_v15 = vpop.eup %3409  ;;  %v2390_v59 = vsub.f32 0.0, %v1974_v50  ;;  %v2363_v8 = vmul.f32 %v6047_v9, %v2331_v45  ;;  %v2328_v48 = vadd.f32 0.2548296, %v2296_v54  ;;  %v6077_v45 = vld [vmem:[#allocation73_spill] sm:$0xff]  ;;  %v6078_v54 = vld [vmem:[#allocation12_spill] sm:$0xff] }
 0x19a   : > { %6074 = vst [vmem:[#allocation25_spill] sm:$0xff] %v5216_v4  ;;  %v2156_v35 = vmul.f32 %v6069_v56, %v2124_v49  ;;  %3411 = vpow2.f32 %v2473_v61  ;;  %v2088_v11 = vmul.f32 1.0614054, %v6075_v24  ;;  %v2038_v34 = vadd.f32 1.0, %v2006_v5 }
 0x19b   : > { %v2263_v6 = vadd.f32 -0.28449672, %v2231_v0  ;;  %v2585_v31 = vmul.f32 %v2553_v39, %v5161_v60  ;;  %3413 = vpow2.f32 %v2471_v55  ;;  %v2537_v16 = vsub.f32 1.0, %v2505_v33 }
 0x19c   : > { %v2188_v7 = vadd.f32 1.4214138, %v2156_v35  ;;  %3415 = vrcp.f32 %v2054_v42  ;;  %v2120_v46 = vadd.f32 -1.4531521, %v2088_v11  ;;  %v2523_v4 = vmul.f32 %v3408_v36, %v2363_v8 }
 0x19d   : > { %v2295_v37 = vmul.f32 %v6065_v1, %v2263_v6  ;;  %v1847_v9 = vmul.f32 0.5, %v6076_v43  ;;  %vm1911_vm8 = vcmp.ge.f32.partialorder %v6077_v45, 0.0  ;;  %v2087_v61 = vmul.f32 1.0614054, %v6078_v54  ;;  %v6080_v6 = vld [vmem:[#allocation24_spill] sm:$0xff] }
 0x19e   : > { %v5226_v0 = vmul.f32 %v2390_v59, %v1974_v50  ;;  %v2360_v5 = vmul.f32 %v6055_v20, %v2328_v48  ;;  %v2152_v39 = vmul.f32 %v6075_v24, %v2120_v46  ;;  %3417 = vrcp.f32 %v2038_v34  ;;  %v6081_v20 = vld [vmem:[#allocation10_spill] sm:$0xff] }
 0x19f   : > { %v2327_v49 = vadd.f32 0.2548296, %v2295_v37  ;;  %v2617_v60 = vadd.f32 1.0, %v2585_v31  ;;  %v2220_v33 = vmul.f32 %v6069_v56, %v2188_v7  ;;  %v2119_v55 = vadd.f32 -1.4531521, %v2087_v61  ;;  %v2732_v7 = vpop.permute.xlu2 %2731 }
 0x1a0   : > { %6079 = vst [vmem:[#allocation35_spill] sm:$0xff] %v5226_v0  ;;  %v3412_v42 = vpop.eup %3411  ;;  %v2569_v36 = vmul.f32 %v2537_v16, %v5183_v3  ;;  %v1943_v43 = vsel %vm1911_vm8, 1.0, %v6066_v57  ;;  %v2184_v35 = vadd.f32 1.4214138, %v2152_v39  ;;  %v2555_v59 = vsub.f32 1.0, %v2523_v4  ;;  %v6083_v16 = vld [vmem:[#allocation79_spill] sm:$0xff] }
 0x1a1   : > { %v2359_v8 = vmul.f32 %v6065_v1, %v2327_v49  ;;  %v3414_v50 = vpop.eup %3413  ;;  %v5235_v48 = vmul.f32 0.5, %v6080_v6  ;;  %v2441_v11 = vmul.f32 1.442695, %v6081_v20  ;;  %v2151_v34 = vmul.f32 %v6078_v54, %v2119_v55  ;;  %v6084_v49 = vld [vmem:[#allocation9_spill] sm:$0xff] }
 0x1a2   : > { %v5239_v31 = vpop.eup %3415  ;;  %v2520_v37 = vmul.f32 %v3412_v42, %v2360_v5  ;;  %v2216_v3 = vmul.f32 %v6075_v24, %v2184_v35  ;;  %v2110_v45 = vmul.f32 1.0614054, %v6083_v16  ;;  %v2649_v1 = vmul.f32 %v2617_v60, %v5154_v47  ;;  %v6085_v42 = vld [vmem:[#allocation31_spill] sm:$0xff] }
 0x1a3   : > { %6082 = vst [vmem:[#allocation38_spill] sm:$0xff] %v5239_v31  ;;  %v2519_v46 = vmul.f32 %v3414_v50, %v2359_v8  ;;  %v2252_v4 = vadd.f32 -0.28449672, %v2220_v33  ;;  %v2183_v61 = vadd.f32 1.4214138, %v2151_v34  ;;  %v2601_v6 = vadd.f32 1.0, %v2569_v36 }
 0x1a4   : > { %v2439_v39 = vmul.f32 1.442695, %v6084_v49  ;;  %v2248_v0 = vadd.f32 -0.28449672, %v2216_v3  ;;  %v2142_v55 = vadd.f32 -1.4531521, %v2110_v45  ;;  %v5245_v62 = vpop.eup %3417  ;;  %v5247_v31 = vmul.f32 %v2732_v7, %v2649_v1 }
 0x1a5   : > { %v2551_v20 = vsub.f32 1.0, %v2519_v46  ;;  %v2587_v5 = vmul.f32 %v2555_v59, %v5196_v32  ;;  %vm1900_vm10 = vcmp.ge.f32.partialorder %v6085_v42, 0.0  ;;  %v2215_v8 = vmul.f32 %v6078_v54, %v2183_v61  ;;  %v6086_v36 = vld [vmem:[#allocation49_spill] sm:$0xff]  ;;  %v2728_v59 = vpop.permute.xlu0 %2727 }
 0x1a6   : > { %v2552_v47 = vsub.f32 1.0, %v2520_v37  ;;  %v2280_v33 = vmul.f32 %v6075_v24, %v2248_v0  ;;  %v2174_v35 = vmul.f32 %v6083_v16, %v2142_v55  ;;  %v2449_v50 = vmul.f32 1.442695, %v6086_v36 }
 0x1a7   : > { %v2583_v60 = vmul.f32 %v2551_v20, %v1943_v43  ;;  %3419 = vpow2.f32 %v2441_v11  ;;  %v2247_v34 = vadd.f32 -0.28449672, %v2215_v8  ;;  %v2106_v46 = vmul.f32 1.0614054, %v4962_v19  ;;  %v6087_v20 = vld [vmem:[#allocation5_spill] sm:$0xff]  ;;  %v2700_v8 = vpop.permute.xlu2 %2699 }
 0x1a8   : > { %v2284_v3 = vmul.f32 %v6069_v56, %v2252_v4  ;;  %v2312_v32 = vadd.f32 0.2548296, %v2280_v33  ;;  %3421 = vpow2.f32 %v2439_v39  ;;  %v5258_v45 = vsel %vm1900_vm10, 1.0, %v6066_v57  ;;  %v6088_v4 = vld [vmem:[#allocation6_spill] sm:$0xff] }
 0x1a9   : > { %v2615_v7 = vadd.f32 1.0, %v2583_v60  ;;  %v2279_v43 = vmul.f32 %v6078_v54, %v2247_v34  ;;  %v2206_v0 = vadd.f32 1.4214138, %v2174_v35  ;;  %v2138_v37 = vadd.f32 -1.4531521, %v2106_v46  ;;  %v6090_v46 = vld [vmem:[#allocation67_spill] sm:$0xff] }
 0x1aa   : > { %v2633_v1 = vmul.f32 %v2601_v6, %v5135_v44  ;;  %v2584_v11 = vmul.f32 %v2552_v47, %v5211_v38  ;;  %v2344_v49 = vmul.f32 %v6075_v24, %v2312_v32  ;;  %v5265_v55 = vmul.f32 0.5, %v6087_v20  ;;  %v6089_v44 = vld [vmem:[#allocation4_spill] sm:$0xff]  ;;  %v6091_v32 = vld [vmem:[#allocation46_spill] sm:$0xff] }
 0x1ab   : > { %v2647_v61 = vmul.f32 %v2615_v7, %v1847_v9  ;;  %vm1896_vm11 = vcmp.ge.f32.partialorder %v6088_v4, 0.0  ;;  %v2311_v39 = vadd.f32 0.2548296, %v2279_v43  ;;  %v2170_v42 = vmul.f32 %v4962_v19, %v2138_v37  ;;  %v6092_v37 = vld [vmem:[#allocation3_spill] sm:$0xff] }
 0x1ac   : > { %v2619_v60 = vadd.f32 1.0, %v2587_v5  ;;  %v2316_v35 = vadd.f32 0.2548296, %v2284_v3  ;;  %3423 = vpow2.f32 %v2449_v50  ;;  %vm1895_vm12 = vcmp.ge.f32.partialorder %v6089_v44, 0.0 }
 0x1ad   : > { %v2807_v33 = vmul.f32 %v2728_v59, %v2647_v61  ;;  %v3420_v36 = vpop.eup %3419  ;;  %v2343_v38 = vmul.f32 %v6078_v54, %v2311_v39  ;;  %v2238_v24 = vmul.f32 %v6083_v16, %v2206_v0  ;;  %v2202_v9 = vadd.f32 1.4214138, %v2170_v42 }
 0x1ae   : > { %v3422_v6 = vpop.eup %3421  ;;  %v2616_v47 = vadd.f32 1.0, %v2584_v11  ;;  %v2504_v34 = vmul.f32 %v3420_v36, %v2344_v49  ;;  %v2477_v7 = vmul.f32 1.442695, %v6090_v46  ;;  %v2090_v5 = vmul.f32 1.0614054, %v6091_v32  ;;  %v2730_v49 = vpop.permute.xlu1 %2729 }
 0x1af   : > { %3280 = vmatmul.msk.f32.vlgmr.msra.gmra.mxu2 %vm2830_vm9, %v2807_v33  ;;  %v5275_v59 = vmul.f32 %v2700_v8, %v2633_v1  ;;  %v1928_v50 = vsel %vm1896_vm11, 1.0, %v6066_v57  ;;  %v2503_v3 = vmul.f32 %v3422_v6, %v2343_v38  ;;  %v2234_v54 = vmul.f32 %v4962_v19, %v2202_v9  ;;  %v6094_v38 = vld [vmem:[#allocation39_spill] sm:$0xff] }
 0x1b0   : > { %v2651_v43 = vmul.f32 %v2619_v60, %v5186_v58  ;;  %v2348_v0 = vmul.f32 %v6069_v56, %v2316_v35  ;;  %v1831_v11 = vmul.f32 0.5, %v6092_v37  ;;  %v2122_v61 = vadd.f32 -1.4531521, %v2090_v5  ;;  %v6093_v56 = vld [vmem:[#allocation78_spill] sm:$0xff]  ;;  %v6095_v5 = vld [vmem:[#allocation45_spill] sm:$0xff] }
 0x1b1   : > { %v1927_v1 = vsel %vm1895_vm12, 1.0, %v6066_v57  ;;  %v2535_v20 = vsub.f32 1.0, %v2503_v3  ;;  %v2270_v39 = vadd.f32 -0.28449672, %v2238_v24  ;;  %v2266_v42 = vadd.f32 -0.28449672, %v2234_v54 }
 0x1b2   : > { %v3424_v4 = vpop.eup %3423  ;;  %v2648_v8 = vmul.f32 %v2616_v47, %v5207_v23  ;;  %v2536_v33 = vsub.f32 1.0, %v2504_v34  ;;  %3425 = vpow2.f32 %v2477_v7  ;;  %v2154_v58 = vmul.f32 %v6091_v32, %v2122_v61  ;;  %v2696_v7 = vpop.permute.xlu0 %2695  ;;  %v6096_v37 = vld [vmem:[#allocation61_spill] sm:$0xff] }
 0x1b3   : > { %v2567_v60 = vmul.f32 %v2535_v20, %v1927_v1  ;;  %v2485_v35 = vmul.f32 1.442695, %v6093_v56  ;;  %v2298_v36 = vmul.f32 %v4962_v19, %v2266_v42  ;;  %v2095_v9 = vmul.f32 1.0614054, %v6094_v38  ;;  %v6097_v1 = vld [vmem:[#allocation13_spill] sm:$0xff] }
 0x1b4   : > { %v2808_v6 = vmul.f32 %v2730_v49, %v2648_v8  ;;  %v2508_v44 = vmul.f32 %v3424_v4, %v2348_v0  ;;  %v2186_v46 = vadd.f32 1.4214138, %v2154_v58  ;;  %v2445_v24 = vmul.f32 1.442695, %v6095_v5  ;;  %v2736_v0 = vpop.permute.xlu2 %2735  ;;  %v6099_v58 = vld [vmem:[#allocation52_spill] sm:$0xff] }
 0x1b5   : > { %v2599_v3 = vadd.f32 1.0, %v2567_v60  ;;  %v2302_v54 = vmul.f32 %v6083_v16, %v2270_v39  ;;  %v2330_v23 = vadd.f32 0.2548296, %v2298_v36  ;;  %v2127_v47 = vadd.f32 -1.4531521, %v2095_v9 }
 0x1b6   : > { %v2568_v34 = vmul.f32 %v2536_v33, %v1928_v50  ;;  %v5296_v61 = vmul.f32 0.5, %v6096_v37  ;;  %vm1918_vm13 = vcmp.ge.f32.partialorder %v6097_v1, 0.0  ;;  %v2218_v49 = vmul.f32 %v6091_v32, %v2186_v46  ;;  %v6098_v50 = vld [vmem:[#allocation81_spill] sm:$0xff] }
 0x1b7   : > { %3281 = vmatmul.msk.f32.gmra.mxu2 %vm2830_vm9, %v2808_v6  ;;  %v2631_v20 = vmul.f32 %v2599_v3, %v1831_v11  ;;  %3427 = vpow2.f32 %v2485_v35  ;;  %v2362_v42 = vmul.f32 %v4962_v19, %v2330_v23  ;;  %v2159_v39 = vmul.f32 %v6094_v38, %v2127_v47  ;;  %v6100_v3 = vld [vmem:[#allocation57_spill] sm:$0xff] }
 0x1b8   : > { %v3426_v4 = vpop.eup %3425  ;;  %v2540_v8 = vsub.f32 1.0, %v2508_v44  ;;  %vm1914_vm14 = vcmp.ge.f32.partialorder %v6098_v50, 0.0  ;;  %v2250_v33 = vadd.f32 -0.28449672, %v2218_v49  ;;  %v2091_v60 = vmul.f32 1.0614054, %v6099_v58 }
 0x1b9   : > { %v2791_v56 = vmul.f32 %v2696_v7, %v2631_v20  ;;  %v2334_v36 = vadd.f32 0.2548296, %v2302_v54  ;;  %v2522_v9 = vmul.f32 %v3426_v4, %v2362_v42  ;;  %3429 = vpow2.f32 %v2445_v24  ;;  %v6101_v54 = vld [vmem:[#allocation22_spill] sm:$0xff]  ;;  %v2698_v20 = vpop.permute.xlu1 %2697 }
 0x1ba   : > { %v5304_v6 = vmul.f32 %v2736_v0, %v2651_v43  ;;  %v2600_v46 = vadd.f32 1.0, %v2568_v34  ;;  %v2282_v11 = vmul.f32 %v6091_v32, %v2250_v33  ;;  %v2123_v35 = vadd.f32 -1.4531521, %v2091_v60 }
 0x1bb   : > { %3264 = vmatmul.msk.f32.vlgmr.msra.gmra.mxu1 %vm2830_vm9, %v2791_v56  ;;  %v5311_v19 = vsel %vm1918_vm13, 1.0, %v6066_v57  ;;  %v2554_v44 = vsub.f32 1.0, %v2522_v9  ;;  %v2191_v5 = vadd.f32 1.4214138, %v2159_v39  ;;  %v2108_v23 = vmul.f32 1.0614054, %v6100_v3 }
 0x1bc   : > { %v1850_v47 = vmul.f32 0.5, %v6101_v54  ;;  %v1946_v43 = vsel %vm1914_vm14, 1.0, %v6066_v57  ;;  %v2314_v24 = vadd.f32 0.2548296, %v2282_v11  ;;  %v2155_v34 = vmul.f32 %v6099_v58, %v2123_v35  ;;  %v6102_v39 = vld [vmem:[#allocation18_spill] sm:$0xff] }
 0x1bd   : > { %v3428_v7 = vpop.eup %3427  ;;  %v2572_v37 = vmul.f32 %v2540_v8, %v5258_v45  ;;  %v2366_v1 = vmul.f32 %v6083_v16, %v2334_v36  ;;  %v2586_v49 = vmul.f32 %v2554_v44, %v1946_v43  ;;  %v2140_v0 = vadd.f32 -1.4531521, %v2108_v23  ;;  %v6103_v45 = vld [vmem:[#allocation47_spill] sm:$0xff] }
 0x1be   : > { %v2632_v42 = vmul.f32 %v2600_v46, %v5265_v55  ;;  %vm1898_vm15 = vcmp.ge.f32.partialorder %v6102_v39, 0.0  ;;  %v2346_v4 = vmul.f32 %v6091_v32, %v2314_v24  ;;  %v2187_v50 = vadd.f32 1.4214138, %v2155_v34  ;;  %v6104_v55 = vld [vmem:[#allocation75_spill] sm:$0xff] }
 0x1bf   : > { %3282 = vmatmul.msk.f32.gmra.mxu2 %vm2830_vm9, %v5247_v31  ;;  %v3430_v33 = vpop.eup %3429  ;;  %v2618_v60 = vadd.f32 1.0, %v2586_v49  ;;  %v2223_v56 = vmul.f32 %v6094_v38, %v2191_v5  ;;  %v2447_v8 = vmul.f32 1.442695, %v6103_v45  ;;  %v2172_v16 = vmul.f32 %v6100_v3, %v2140_v0  ;;  %v2734_v31 = vpop.permute.xlu0 %2733 }
 0x1c0   : > { %v2506_v36 = vmul.f32 %v3430_v33, %v2346_v4  ;;  %v2219_v9 = vmul.f32 %v6099_v58, %v2187_v50  ;;  %v2481_v46 = vmul.f32 1.442695, %v6104_v55  ;;  %v2113_v11 = vmul.f32 1.0614054, %v5030_v25 }
 0x1c1   : > { %v2604_v32 = vadd.f32 1.0, %v2572_v37  ;;  %v2792_v35 = vmul.f32 %v2698_v20, %v2632_v42  ;;  %v2526_v44 = vmul.f32 %v3428_v7, %v2366_v1  ;;  %v2204_v23 = vadd.f32 1.4214138, %v2172_v16  ;;  %v2706_v1 = vpop.permute.xlu2 %2705  ;;  %v6105_v20 = vld [vmem:[#allocation17_spill] sm:$0xff] }
 0x1c2   : > { %v2650_v54 = vmul.f32 %v2618_v60, %v1850_v47  ;;  %v2538_v43 = vsub.f32 1.0, %v2506_v36  ;;  %v2251_v24 = vadd.f32 -0.28449672, %v2219_v9  ;;  %v2145_v5 = vadd.f32 -1.4531521, %v2113_v11  ;;  %v6106_v42 = vld [vmem:[#allocation77_spill] sm:$0xff] }
 0x1c3   : > { %v1930_v34 = vsel %vm1898_vm15, 1.0, %v6066_v57  ;;  %3265 = vmatmul.msk.f32.gmra.mxu1 %vm2830_vm9, %v2792_v35  ;;  %v2255_v49 = vadd.f32 -0.28449672, %v2223_v56  ;;  %3431 = vpow2.f32 %v2447_v8  ;;  %v2236_v0 = vmul.f32 %v6100_v3, %v2204_v23  ;;  %v6107_v8 = vld [vmem:[#allocation11_spill] sm:$0xff] }
 0x1c4   : > { %v2810_v4 = vmul.f32 %v2734_v31, %v2650_v54  ;;  %v2283_v37 = vmul.f32 %v6099_v58, %v2251_v24  ;;  %3433 = vpow2.f32 %v2481_v46  ;;  %v2177_v7 = vmul.f32 %v5030_v25, %v2145_v5  ;;  %v6109_v31 = vld [vmem:[#allocation29_spill] sm:$0xff]  ;;  %v2702_v24 = vpop.permute.xlu1 %2701 }
 0x1c5   : > { %v2636_v47 = vmul.f32 %v2604_v32, %v5235_v48  ;;  %vm1903_vm1 = vcmp.ge.f32.partialorder %v6105_v20, 0.0  ;;  %v2455_v39 = vmul.f32 1.442695, %v6106_v42  ;;  %v2268_v50 = vadd.f32 -0.28449672, %v2236_v0  ;;  %v6108_v48 = vld [vmem:[#allocation27_spill] sm:$0xff] }
 0x1c6   : > { %v2558_v33 = vsub.f32 1.0, %v2526_v44  ;;  %v2570_v60 = vmul.f32 %v2538_v43, %v1930_v34  ;;  %v2315_v56 = vadd.f32 0.2548296, %v2283_v37  ;;  %v2209_v45 = vadd.f32 1.4214138, %v2177_v7  ;;  %v6111_v37 = vld [vmem:[#allocation55_spill] sm:$0xff] }
 0x1c7   : > { %3283 = vmatmul.msk.f32.gmra.mxu2 %vm2830_vm9, %v2810_v4  ;;  %v1834_v16 = vmul.f32 0.5, %v6107_v8  ;;  %v5345_v36 = vmul.f32 0.5, %v6030_v12  ;;  %v2300_v9 = vmul.f32 %v6100_v3, %v2268_v50  ;;  %v2109_v55 = vmul.f32 1.0614054, %v6108_v48  ;;  %v6110_v4 = vld [vmem:[#allocation36_spill] sm:$0xff] }
 0x1c8   : > { %v5349_v46 = vmul.f32 %v2706_v1, %v2636_v47  ;;  %v5352_v11 = vsel %vm1903_vm1, 1.0, %v6066_v57  ;;  %v2287_v32 = vmul.f32 %v6094_v38, %v2255_v49  ;;  %v2347_v35 = vmul.f32 %v6099_v58, %v2315_v56  ;;  %v6112_v20 = vld [vmem:[#allocation76_spill] sm:$0xff] }
 0x1c9   : > { %v3432_v44 = vpop.eup %3431  ;;  %3435 = vpow2.f32 %v2455_v39  ;;  %vm1899_vm2 = vcmp.ge.f32.partialorder %v6109_v31, 0.0  ;;  %v2332_v23 = vadd.f32 0.2548296, %v2300_v9  ;;  %v2141_v12 = vadd.f32 -1.4531521, %v2109_v55  ;;  %v6113_v39 = vld [vmem:[#allocation30_spill] sm:$0xff] }
 0x1ca   : > { %v3434_v54 = vpop.eup %3433  ;;  %v2590_v43 = vmul.f32 %v2558_v33, %v5311_v19  ;;  %v2602_v5 = vadd.f32 1.0, %v2570_v60  ;;  %v2507_v34 = vmul.f32 %v3432_v44, %v2347_v35  ;;  %v2241_v0 = vmul.f32 %v5030_v25, %v2209_v45 }
 0x1cb   : > { %vm1916_vm3 = vcmp.ge.f32.partialorder %v6110_v4, 0.0  ;;  %v2364_v49 = vmul.f32 %v6100_v3, %v2332_v23  ;;  %3266 = vmatmul.msk.f32.gmra.mxu1 %vm2830_vm9, %v5275_v59  ;;  %v2173_v58 = vmul.f32 %v6108_v48, %v2141_v12  ;;  %v2093_v7 = vmul.f32 1.0614054, %v6111_v37  ;;  %v6115_v4 = vld [vmem:[#allocation50_spill] sm:$0xff] }
 0x1cc   : > { %v2319_v47 = vadd.f32 0.2548296, %v2287_v32  ;;  %v1931_v1 = vsel %vm1899_vm2, 1.0, %v6066_v57  ;;  %v2539_v19 = vsub.f32 1.0, %v2507_v34  ;;  %v2483_v42 = vmul.f32 1.442695, %v6112_v20 }
 0x1cd   : > { %v1852_v50 = vmul.f32 0.5, %v6113_v39  ;;  %v2524_v33 = vmul.f32 %v3434_v54, %v2364_v49  ;;  %v2205_v60 = vadd.f32 1.4214138, %v2173_v58  ;;  %v2125_v56 = vadd.f32 -1.4531521, %v2093_v7  ;;  %v6114_v34 = vld [vmem:[#allocation23_spill] sm:$0xff]  ;;  %v2742_v39 = vpop.permute.xlu2 %2741 }
 0x1ce   : > { %v2622_v45 = vadd.f32 1.0, %v2590_v43  ;;  %v2634_v3 = vmul.f32 %v2602_v5, %v1834_v16  ;;  %v1948_v8 = vsel %vm1916_vm3, 1.0, %v6066_v57  ;;  %v2273_v59 = vadd.f32 -0.28449672, %v2241_v0  ;;  %v6116_v20 = vld [vmem:[#allocation58_spill] sm:$0xff] }
 0x1cf   : > { %3284 = vmatmul.msk.f32.gmra.mxu2 %vm2830_vm9, %v5304_v6  ;;  %v3436_v9 = vpop.eup %3435  ;;  %v2571_v55 = vmul.f32 %v2539_v19, %v1931_v1  ;;  %v2556_v32 = vsub.f32 1.0, %v2524_v33  ;;  %v2237_v35 = vmul.f32 %v6108_v48, %v2205_v60  ;;  %v2157_v44 = vmul.f32 %v6111_v37, %v2125_v56  ;;  %v2738_v19 = vpop.permute.xlu1 %2737 }
 0x1d0   : > { %v2351_v31 = vmul.f32 %v6094_v38, %v2319_v47  ;;  %v2491_v23 = vmul.f32 1.442695, %v4994_v30  ;;  %3437 = vpow2.f32 %v2483_v42  ;;  %v2098_v16 = vmul.f32 1.0614054, %v5025_v21 }
 0x1d1   : > { %v2794_v12 = vmul.f32 %v2702_v24, %v2634_v3  ;;  %v2588_v54 = vmul.f32 %v2556_v32, %v1948_v8  ;;  %v2269_v43 = vadd.f32 -0.28449672, %v2237_v35  ;;  %v2189_v5 = vadd.f32 1.4214138, %v2157_v44  ;;  %v2704_v8 = vpop.permute.xlu0 %2703  ;;  %v6117_v32 = vld [vmem:[#allocation74_spill] sm:$0xff] }
 0x1d2   : > { %v1835_v6 = vmul.f32 0.5, %v6114_v34  ;;  %v2305_v0 = vmul.f32 %v5030_v25, %v2273_v59  ;;  %v2451_v49 = vmul.f32 1.442695, %v6115_v4  ;;  %v2130_v58 = vadd.f32 -1.4531521, %v2098_v16 }
 0x1d3   : > { %v2603_v7 = vadd.f32 1.0, %v2571_v55  ;;  %v2620_v1 = vadd.f32 1.0, %v2588_v54  ;;  %v2301_v38 = vmul.f32 %v6108_v48, %v2269_v43  ;;  %v2221_v30 = vmul.f32 %v6111_v37, %v2189_v5  ;;  %3267 = vmatmul.msk.f32.gmra.mxu1 %vm2830_vm9, %v2794_v12  ;;  %v6118_v5 = vld [vmem:[#allocation14_spill] sm:$0xff] }
 0x1d4   : > { %v2654_v24 = vmul.f32 %v2622_v45, %v5296_v61  ;;  %v2511_v47 = vmul.f32 %v3436_v9, %v2351_v31  ;;  %vm1917_vm4 = vcmp.ge.f32.partialorder %v6116_v20, 0.0  ;;  %v2162_v42 = vmul.f32 %v5025_v21, %v2130_v58 }
 0x1d5   : > { %v2652_v33 = vmul.f32 %v2620_v1, %v1852_v50  ;;  %3439 = vpow2.f32 %v2491_v23  ;;  %v2333_v60 = vadd.f32 0.2548296, %v2301_v38  ;;  %v2253_v56 = vadd.f32 -0.28449672, %v2221_v30  ;;  %v6119_v38 = vld [vmem:[#allocation53_spill] sm:$0xff] }
 0x1d6   : > { %v3438_v3 = vpop.eup %3437  ;;  %v2337_v59 = vadd.f32 0.2548296, %v2305_v0  ;;  %3441 = vpow2.f32 %v2451_v49  ;;  %v2194_v55 = vadd.f32 1.4214138, %v2162_v42  ;;  %v2094_v35 = vmul.f32 1.0614054, %v6117_v32 }
 0x1d7   : > { %v2635_v44 = vmul.f32 %v2603_v7, %v1835_v6  ;;  %v2812_v61 = vmul.f32 %v2738_v19, %v2652_v33  ;;  %v2365_v45 = vmul.f32 %v6108_v48, %v2333_v60  ;;  %v2285_v9 = vmul.f32 %v6111_v37, %v2253_v56  ;;  %v6122_v56 = vld [vmem:[#allocation40_spill] sm:$0xff] }
 0x1d8   : > { %v5388_v31 = vmul.f32 %v2742_v39, %v2654_v24  ;;  %v5391_v50 = vmul.f32 0.5, %v4875_v2  ;;  %v2226_v23 = vmul.f32 %v5025_v21, %v2194_v55  ;;  %v2126_v16 = vadd.f32 -1.4531521, %v2094_v35  ;;  %v6120_v24 = vld [vmem:[#allocation33_spill] sm:$0xff]  ;;  %v6121_v39 = vld [vmem:[#allocation59_spill] sm:$0xff] }
 0x1d9   : > { %v2795_v12 = vmul.f32 %v2704_v8, %v2635_v44  ;;  %v2525_v54 = vmul.f32 %v3438_v3, %v2365_v45  ;;  %v2317_v43 = vadd.f32 0.2548296, %v2285_v9  ;;  %v2111_v34 = vmul.f32 1.0614054, %v6118_v5  ;;  %3285 = vmatmul.msk.f32.gmra.mxu2 %vm2830_vm9, %v2812_v61  ;;  %v2740_v61 = vpop.permute.xlu0 %2739 }
 0x1da   : > { %v2543_v6 = vsub.f32 1.0, %v2511_v47  ;;  %vm1921_vm5 = vcmp.ge.f32.partialorder %v4901_v41, 0.0  ;;  %v1949_v48 = vsel %vm1917_vm4, 1.0, %v6066_v57  ;;  %v2158_v2 = vmul.f32 %v6117_v32, %v2126_v16 }
 0x1db   : > { %v3440_v0 = vpop.eup %3439  ;;  %v2369_v4 = vmul.f32 %v5030_v25, %v2337_v59  ;;  %v2557_v49 = vsub.f32 1.0, %v2525_v54  ;;  %v2349_v58 = vmul.f32 %v6111_v37, %v2317_v43  ;;  %v2143_v7 = vadd.f32 -1.4531521, %v2111_v34  ;;  %3268 = vmatmul.msk.f32.gmra.mxu1 %vm2830_vm9, %v2795_v12 }
 0x1dc   : > { %v3442_v1 = vpop.eup %3441  ;;  %v1853_v30 = vmul.f32 0.5, %v6119_v38  ;;  %vm1901_vm6 = vcmp.ge.f32.partialorder %v6120_v24, 0.0  ;;  %v2258_v47 = vadd.f32 -0.28449672, %v2226_v23  ;;  %v2190_v19 = vadd.f32 1.4214138, %v2158_v2 }
 0x1dd   : > { %v2589_v20 = vmul.f32 %v2557_v49, %v1949_v48  ;;  %v2509_v42 = vmul.f32 %v3442_v1, %v2349_v58  ;;  %v2453_v33 = vmul.f32 1.442695, %v6121_v39  ;;  %v2175_v60 = vmul.f32 %v6118_v5, %v2143_v7  ;;  %v2712_v49 = vpop.permute.xlu2 %2711  ;;  %v6123_v58 = vld [vmem:[#allocation26_spill] sm:$0xff] }
 0x1de   : > { %v2575_v25 = vmul.f32 %v2543_v6, %v5352_v11  ;;  %v2222_v37 = vmul.f32 %v6117_v32, %v2190_v19  ;;  %v2487_v3 = vmul.f32 1.442695, %v6122_v56  ;;  %v2116_v8 = vmul.f32 1.0614054, %v5173_v52 }
 0x1df   : > { %v2529_v59 = vmul.f32 %v3440_v0, %v2369_v4  ;;  %v2621_v55 = vadd.f32 1.0, %v2589_v20  ;;  %v2541_v35 = vsub.f32 1.0, %v2509_v42  ;;  %v2207_v44 = vadd.f32 1.4214138, %v2175_v60  ;;  %v2708_v20 = vpop.permute.xlu1 %2707  ;;  %v6125_v42 = vld [vmem:[#allocation44_spill] sm:$0xff] }
 0x1e0   : > { %v1933_v45 = vsel %vm1901_vm6, 1.0, %v6066_v57  ;;  %v2290_v9 = vmul.f32 %v5025_v21, %v2258_v47  ;;  %v2461_v23 = vmul.f32 1.442695, %v4989_v18  ;;  %v2254_v11 = vadd.f32 -0.28449672, %v2222_v37  ;;  %v6124_v47 = vld [vmem:[#allocation43_spill] sm:$0xff] }
 0x1e1   : > { %v2653_v16 = vmul.f32 %v2621_v55, %v1853_v30  ;;  %v2573_v12 = vmul.f32 %v2541_v35, %v1933_v45  ;;  %3443 = vpow2.f32 %v2453_v33  ;;  %v2239_v54 = vmul.f32 %v6118_v5, %v2207_v44  ;;  %v6127_v35 = vld [vmem:[#allocation60_spill] sm:$0xff] }
 0x1e2   : > { %v2607_v43 = vadd.f32 1.0, %v2575_v25  ;;  %v2286_v34 = vmul.f32 %v6117_v32, %v2254_v11  ;;  %3445 = vpow2.f32 %v2487_v3  ;;  %v2148_v6 = vadd.f32 -1.4531521, %v2116_v8 }
 0x1e3   : > { %v2561_v48 = vsub.f32 1.0, %v2529_v59  ;;  %v2813_v2 = vmul.f32 %v2740_v61, %v2653_v16  ;;  %v2605_v0 = vadd.f32 1.0, %v2573_v12  ;;  %v2271_v4 = vadd.f32 -0.28449672, %v2239_v54  ;;  %3269 = vmatmul.msk.f32.gmra.mxu1 %vm2830_vm9, %v5349_v46  ;;  %v6126_v59 = vld [vmem:[#allocation16_spill] sm:$0xff] }
 0x1e4   : > { %v1953_v18 = vsel %vm1921_vm5, 1.0, %v6066_v57  ;;  %v1837_v7 = vmul.f32 0.5, %v6123_v58  ;;  %v2322_v1 = vadd.f32 0.2548296, %v2290_v9  ;;  %v2318_v38 = vadd.f32 0.2548296, %v2286_v34 }
 0x1e5   : > { %v5426_v30 = vmul.f32 0.5, %v4870_v14  ;;  %3447 = vpow2.f32 %v2461_v23  ;;  %v2303_v24 = vmul.f32 %v6118_v5, %v2271_v4  ;;  %v2112_v19 = vmul.f32 1.0614054, %v6124_v47  ;;  %3286 = vmatmul.msk.f32.gmra.mxu2 %vm2830_vm9, %v2813_v2  ;;  %v6128_v23 = vld [vmem:[#allocation48_spill] sm:$0xff]  ;;  %v6129_v2 = vld [vmem:[#allocation41_spill] sm:$0xff] }
 0x1e6   : > { %v2639_v46 = vmul.f32 %v2607_v43, %v5345_v36  ;;  %vm1902_vm7 = vcmp.ge.f32.partialorder %v6125_v42, 0.0  ;;  %v2350_v41 = vmul.f32 %v6117_v32, %v2318_v38  ;;  %v2180_v39 = vmul.f32 %v5173_v52, %v2148_v6 }
 0x1e7   : > { %v3444_v33 = vpop.eup %3443  ;;  %v2593_v60 = vmul.f32 %v2561_v48, %v1953_v18  ;;  %v2637_v14 = vmul.f32 %v2605_v0, %v1837_v7  ;;  %v2335_v25 = vadd.f32 0.2548296, %v2303_v24  ;;  %v2144_v37 = vadd.f32 -1.4531521, %v2112_v19  ;;  %v2748_v7 = vpop.permute.xlu2 %2747 }
 0x1e8   : > { %v3446_v56 = vpop.eup %3445  ;;  %vm1906_vm8 = vcmp.ge.f32.partialorder %v4896_v40, 0.0  ;;  %v2354_v3 = vmul.f32 %v5025_v21, %v2322_v1  ;;  %v2510_v8 = vmul.f32 %v3444_v33, %v2350_v41  ;;  %vm1919_vm10 = vcmp.ge.f32.partialorder %v6126_v59, 0.0 }
 0x1e9   : > { %v2797_v36 = vmul.f32 %v2708_v20, %v2637_v14  ;;  %v2367_v55 = vmul.f32 %v6118_v5, %v2335_v25  ;;  %v2176_v32 = vmul.f32 %v6124_v47, %v2144_v37  ;;  %v2096_v44 = vmul.f32 1.0614054, %v6127_v35 }
 0x1ea   : > { %v1934_v61 = vsel %vm1902_vm7, 1.0, %v6066_v57  ;;  %v2542_v45 = vsub.f32 1.0, %v2510_v8  ;;  %v2212_v9 = vadd.f32 1.4214138, %v2180_v39  ;;  %v2489_v11 = vmul.f32 1.442695, %v6128_v23  ;;  %v2744_v8 = vpop.permute.xlu1 %2743 }
 0x1eb   : > { %v3448_v16 = vpop.eup %3447  ;;  %v2625_v21 = vadd.f32 1.0, %v2593_v60  ;;  %v2527_v12 = vmul.f32 %v3446_v56, %v2367_v55  ;;  %v2208_v54 = vadd.f32 1.4214138, %v2176_v32  ;;  %v2128_v43 = vadd.f32 -1.4531521, %v2096_v44  ;;  %3270 = vmatmul.msk.f32.gmra.mxu1 %vm2830_vm9, %v2797_v36 }
 0x1ec   : > { %v5446_v5 = vmul.f32 %v2712_v49, %v2639_v46  ;;  %v2514_v34 = vmul.f32 %v3448_v16, %v2354_v3  ;;  %v2574_v6 = vmul.f32 %v2542_v45, %v1934_v61  ;;  %v1951_v48 = vsel %vm1919_vm10, 1.0, %v6066_v57  ;;  %v6130_v49 = vld [vmem:[#allocation68_spill] sm:$0xff]  ;;  %v2710_v46 = vpop.permute.xlu0 %2709 }
 0x1ed   : > { %v1838_v0 = vmul.f32 0.5, %v6129_v2  ;;  %v2559_v4 = vsub.f32 1.0, %v2527_v12  ;;  %v2240_v18 = vmul.f32 %v6124_v47, %v2208_v54  ;;  %v2160_v58 = vmul.f32 %v6127_v35, %v2128_v43  ;;  %3287 = vmatmul.msk.f32.gmra.mxu2 %vm2830_vm9, %v5388_v31  ;;  %v6131_v31 = vld [vmem:[#allocation37_spill] sm:$0xff] }
 0x1ee   : > { %v2606_v1 = vadd.f32 1.0, %v2574_v6  ;;  %v1855_v38 = vmul.f32 0.5, %v6130_v49  ;;  %v2244_v24 = vmul.f32 %v5173_v52, %v2212_v9  ;;  %3449 = vpow2.f32 %v2489_v11  ;;  %v6134_v49 = vld [vmem:[#allocation20_spill] sm:$0xff] }
 0x1ef   : > { %v2657_v19 = vmul.f32 %v2625_v21, %v5391_v50  ;;  %v2591_v20 = vmul.f32 %v2559_v4, %v1951_v48  ;;  %v2272_v42 = vadd.f32 -0.28449672, %v2240_v18  ;;  %v2192_v41 = vadd.f32 1.4214138, %v2160_v58  ;;  %v6133_v18 = vld [vmem:[#allocation69_spill] sm:$0xff] }
 0x1f0   : > { %v1938_v39 = vsel %vm1906_vm8, 1.0, %v6066_v57  ;;  %v2546_v33 = vsub.f32 1.0, %v2514_v34  ;;  %v2638_v60 = vmul.f32 %v2606_v1, %v1838_v0  ;;  %v2457_v14 = vmul.f32 1.442695, %v6131_v31 }
 0x1f1   : > { %v5463_v25 = vmul.f32 %v2748_v7, %v2657_v19  ;;  %v2623_v37 = vadd.f32 1.0, %v2591_v20  ;;  %v2304_v56 = vmul.f32 %v6124_v47, %v2272_v42  ;;  %v2224_v3 = vmul.f32 %v6127_v35, %v2192_v41  ;;  %v6135_v42 = vld [vmem:[#allocation63_spill] sm:$0xff] }
 0x1f2   : > { %v2798_v50 = vmul.f32 %v2710_v46, %v2638_v60  ;;  %v5468_v59 = vmul.f32 0.5, %v5020_v28  ;;  %v2276_v36 = vadd.f32 -0.28449672, %v2244_v24  ;;  %v2101_v40 = vmul.f32 1.0614054, %v5214_v15  ;;  %v6132_v28 = vld [vmem:[#allocation70_spill] sm:$0xff] }
 0x1f3   : > { %v2655_v55 = vmul.f32 %v2623_v37, %v1855_v38  ;;  %vm1924_vm11 = vcmp.ge.f32.partialorder %v5042_v53, 0.0  ;;  %v2336_v32 = vadd.f32 0.2548296, %v2304_v56  ;;  %v2256_v44 = vadd.f32 -0.28449672, %v2224_v3  ;;  %v2718_v37 = vpop.permute.xlu2 %2717 }
 0x1f4   : > { %v3450_v61 = vpop.eup %3449  ;;  %v2578_v45 = vmul.f32 %v2546_v33, %v1938_v39  ;;  %v2497_v9 = vmul.f32 1.442695, %v5138_v17  ;;  %3451 = vpow2.f32 %v2457_v14  ;;  %v2097_v23 = vmul.f32 1.0614054, %v4972_v26  ;;  %3271 = vmatmul.msk.f32.gmra.mxu1 %vm2830_vm9, %v2798_v50 }
 0x1f5   : > { %v2815_v11 = vmul.f32 %v2744_v8, %v2655_v55  ;;  %vm1920_vm12 = vcmp.ge.f32.partialorder %v6132_v28, 0.0  ;;  %v2368_v16 = vmul.f32 %v6124_v47, %v2336_v32  ;;  %v2288_v21 = vmul.f32 %v6127_v35, %v2256_v44 }
 0x1f6   : > { %v5479_v53 = vsel %vm1924_vm11, 1.0, %v6066_v57  ;;  %v2308_v12 = vmul.f32 %v5173_v52, %v2276_v36  ;;  %v2133_v54 = vadd.f32 -1.4531521, %v2101_v40  ;;  %v2129_v43 = vadd.f32 -1.4531521, %v2097_v23  ;;  %v2746_v40 = vpop.permute.xlu0 %2745 }
 0x1f7   : > { %v1856_v17 = vmul.f32 0.5, %v4599_v63  ;;  %v2528_v34 = vmul.f32 %v3450_v61, %v2368_v16  ;;  %v2320_v6 = vadd.f32 0.2548296, %v2288_v21  ;;  %v2114_v48 = vmul.f32 1.0614054, %v5095_v27  ;;  %3288 = vmatmul.msk.f32.gmra.mxu2 %vm2830_vm9, %v2815_v11  ;;  %v2714_v21 = vpop.permute.xlu1 %2713 }
 0x1f8   : > { %v2610_v2 = vadd.f32 1.0, %v2578_v45  ;;  %3453 = vpow2.f32 %v2497_v9  ;;  %v1952_v47 = vsel %vm1920_vm12, 1.0, %v6066_v57  ;;  %v2161_v0 = vmul.f32 %v4972_v26, %v2129_v43 }
 0x1f9   : > { %v2560_v4 = vsub.f32 1.0, %v2528_v34  ;;  %vm1904_vm13 = vcmp.ge.f32.partialorder %v6133_v18, 0.0  ;;  %v2352_v58 = vmul.f32 %v6127_v35, %v2320_v6  ;;  %v2146_v7 = vadd.f32 -1.4531521, %v2114_v48 }
 0x1fa   : > { %v3452_v1 = vpop.eup %3451  ;;  %v2340_v63 = vadd.f32 0.2548296, %v2308_v12  ;;  %v1840_v38 = vmul.f32 0.5, %v6134_v49  ;;  %v2165_v24 = vmul.f32 %v5214_v15, %v2133_v54  ;;  %v2193_v19 = vadd.f32 1.4214138, %v2161_v0  ;;  %v6137_v0 = vld [vmem:[#allocation62_spill] sm:$0xff] }
 0x1fb   : > { %v2592_v46 = vmul.f32 %v2560_v4, %v1952_v47  ;;  %v2512_v20 = vmul.f32 %v3452_v1, %v2352_v58  ;;  %v2459_v41 = vmul.f32 1.442695, %v6135_v42  ;;  %v2178_v39 = vmul.f32 %v5095_v27, %v2146_v7  ;;  %v6138_v49 = vld [vmem:[#allocation86_spill] sm:$0xff] }
 0x1fc   : > { %v1936_v33 = vsel %vm1904_vm13, 1.0, %v6066_v57  ;;  %v2225_v60 = vmul.f32 %v4972_v26, %v2193_v19  ;;  %v2493_v35 = vmul.f32 1.442695, %v5032_v13  ;;  %v2115_v31 = vmul.f32 1.0614054, %v5165_v51  ;;  %3272 = vmatmul.msk.f32.gmra.mxu1 %vm2830_vm9, %v5446_v5 }
 0x1fd   : > { %v2642_v14 = vmul.f32 %v2610_v2, %v5426_v30  ;;  %v2624_v56 = vadd.f32 1.0, %v2592_v46  ;;  %v2544_v3 = vsub.f32 1.0, %v2512_v20  ;;  %v2210_v50 = vadd.f32 1.4214138, %v2178_v39  ;;  %v6136_v2 = vld [vmem:[#allocation34_spill] sm:$0xff]  ;;  %v6139_v20 = vld [vmem:[#allocation72_spill] sm:$0xff] }
 0x1fe   : > { %v3454_v8 = vpop.eup %3453  ;;  %v2372_v36 = vmul.f32 %v5173_v52, %v2340_v63  ;;  %v2197_v55 = vadd.f32 1.4214138, %v2165_v24  ;;  %v2257_v32 = vadd.f32 -0.28449672, %v2225_v60  ;;  %v2147_v44 = vadd.f32 -1.4531521, %v2115_v31 }
 0x1ff   : > { %v2656_v61 = vmul.f32 %v2624_v56, %v1856_v17  ;;  %v2576_v13 = vmul.f32 %v2544_v3, %v1936_v33  ;;  %3455 = vpow2.f32 %v2459_v41  ;;  %v2242_v45 = vmul.f32 %v5095_v27, %v2210_v50  ;;  %v6140_v31 = vld [vmem:[#allocation51_spill] sm:$0xff]  ;;  %v6141_v56 = vld [vmem:[#allocation84_spill] sm:$0xff] }
 0x200   : > { %v5502_v9 = vmul.f32 %v2718_v37, %v2642_v14  ;;  %v2289_v30 = vmul.f32 %v4972_v26, %v2257_v32  ;;  %3457 = vpow2.f32 %v2493_v35  ;;  %v2179_v5 = vmul.f32 %v5165_v51, %v2147_v44 }
 0x201   : > { %v2816_v23 = vmul.f32 %v2746_v40, %v2656_v61  ;;  %v2608_v11 = vadd.f32 1.0, %v2576_v13  ;;  %v2274_v28 = vadd.f32 -0.28449672, %v2242_v45  ;;  %v2495_v52 = vmul.f32 1.442695, %v5112_v29  ;;  %v6142_v45 = vld [vmem:[#allocation89_spill] sm:$0xff] }
 0x202   : > { %v5507_v16 = vmul.f32 %v3454_v8, %v2372_v36  ;;  %v2467_v12 = vmul.f32 1.442695, %v5191_v10  ;;  %v2321_v54 = vadd.f32 0.2548296, %v2289_v30  ;;  %v2211_v43 = vadd.f32 1.4214138, %v2179_v5 }
 0x203   : > { %v2640_v17 = vmul.f32 %v2608_v11, %v1840_v38  ;;  %v2229_v34 = vmul.f32 %v5214_v15, %v2197_v55  ;;  %v2306_v6 = vmul.f32 %v5095_v27, %v2274_v28  ;;  %v2099_v48 = vmul.f32 1.0614054, %v5120_v22  ;;  %3289 = vmatmul.msk.f32.gmra.mxu2 %vm2830_vm9, %v2816_v23  ;;  %v6143_v5 = vld [vmem:[#allocation8_spill] sm:$0xff]  ;;  %v2716_v11 = vpop.permute.xlu0 %2715 }
 0x204   : > { %v1841_v47 = vmul.f32 0.5, %v6136_v2  ;;  %vm1905_vm14 = vcmp.ge.f32.partialorder %v6137_v0, 0.0  ;;  %v2353_v29 = vmul.f32 %v4972_v26, %v2321_v54  ;;  %v2243_v4 = vmul.f32 %v5165_v51, %v2211_v43  ;;  %v6144_v43 = vld [vmem:[#allocation82_spill] sm:$0xff]  ;;  %v2750_v0 = vpop.permute.xlu1 %2749 }
 0x205   : > { %v3456_v10 = vpop.eup %3455  ;;  %v2800_v18 = vmul.f32 %v2714_v21, %v2640_v17  ;;  %v2338_v58 = vadd.f32 0.2548296, %v2306_v6  ;;  %3459 = vpow2.f32 %v2495_v52  ;;  %v2131_v7 = vadd.f32 -1.4531521, %v2099_v48 }
 0x206   : > { %v3458_v1 = vpop.eup %3457  ;;  %3461 = vpow2.f32 %v2467_v12  ;;  %v2513_v63 = vmul.f32 %v3456_v10, %v2353_v29  ;;  %vm1922_vm15 = vcmp.ge.f32.partialorder %v6138_v49, 0.0  ;;  %v2275_v38 = vadd.f32 -0.28449672, %v2243_v4  ;;  %v6145_v10 = vld [vmem:[#allocation7_spill] sm:$0xff] }
 0x207   : > { %v2261_v24 = vadd.f32 -0.28449672, %v2229_v34  ;;  %v2370_v19 = vmul.f32 %v5095_v27, %v2338_v58  ;;  %v2163_v46 = vmul.f32 %v5120_v22, %v2131_v7  ;;  %v2100_v26 = vmul.f32 1.0614054, %v6139_v20  ;;  %3273 = vmatmul.msk.f32.gmra.mxu1 %vm2830_vm9, %v2800_v18 }
 0x208   : > { %v2564_v42 = vsub.f32 1.0, %v5507_v16  ;;  %v1937_v41 = vsel %vm1905_vm14, 1.0, %v6066_v57  ;;  %v2545_v39 = vsub.f32 1.0, %v2513_v63  ;;  %v2307_v33 = vmul.f32 %v5165_v51, %v2275_v38 }
 0x209   : > { %v2530_v60 = vmul.f32 %v3458_v1, %v2370_v19  ;;  %v2195_v35 = vadd.f32 1.4214138, %v2163_v46  ;;  %v2463_v14 = vmul.f32 1.442695, %v6140_v31  ;;  %v2132_v27 = vadd.f32 -1.4531521, %v2100_v26 }
 0x20a   : > { %v2577_v37 = vmul.f32 %v2545_v39, %v1937_v41  ;;  %v1858_v3 = vmul.f32 0.5, %v6141_v56  ;;  %v1954_v50 = vsel %vm1922_vm15, 1.0, %v6066_v57  ;;  %v2339_v8 = vadd.f32 0.2548296, %v2307_v33 }
 0x20b   : > { %v3460_v36 = vpop.eup %3459  ;;  %v2293_v40 = vmul.f32 %v5214_v15, %v2261_v24  ;;  %v2562_v55 = vsub.f32 1.0, %v2530_v60  ;;  %v2227_v32 = vmul.f32 %v5120_v22, %v2195_v35  ;;  %v2164_v44 = vmul.f32 %v6139_v20, %v2132_v27  ;;  %3290 = vmatmul.msk.f32.gmra.mxu2 %vm2830_vm9, %v5463_v25  ;;  %v6147_v24 = vld [vmem:[#allocation38_spill] sm:$0xff]  ;;  %v6148_v60 = vld [vmem:[#allocation87_spill] sm:$0xff] }
 0x20c   : > { %v5538_v61 = vpop.eup %3461  ;;  %v2609_v13 = vadd.f32 1.0, %v2577_v37  ;;  %vm1923_vm1 = vcmp.ge.f32.partialorder %v6142_v45, 0.0  ;;  %v2371_v30 = vmul.f32 %v5165_v51, %v2339_v8  ;;  %v2117_v23 = vmul.f32 1.0614054, %v6143_v5  ;;  %v6149_v8 = vld [vmem:[#allocation25_spill] sm:$0xff]  ;;  %v2752_v45 = vpop.permute.xlu0 %2751 }
 0x20d   : > { %v2594_v28 = vmul.f32 %v2562_v55, %v1954_v50  ;;  %v2259_v52 = vadd.f32 -0.28449672, %v2227_v32  ;;  %3463 = vpow2.f32 %v2463_v14  ;;  %v2196_v21 = vadd.f32 1.4214138, %v2164_v44 }
 0x20e   : > { %v2641_v12 = vmul.f32 %v2609_v13, %v1841_v47  ;;  %v2531_v54 = vmul.f32 %v3460_v36, %v2371_v30  ;;  %v2465_v17 = vmul.f32 1.442695, %v6144_v43  ;;  %v2149_v34 = vadd.f32 -1.4531521, %v2117_v23  ;;  %v6146_v47 = vld [vmem:[#allocation88_spill] sm:$0xff]  ;;  %v6150_v30 = vld [vmem:[#allocation85_spill] sm:$0xff] }
 0x20f   : > { %v2626_v25 = vadd.f32 1.0, %v2594_v28  ;;  %v1955_v6 = vsel %vm1923_vm1, 1.0, %v6066_v57  ;;  %v2291_v48 = vmul.f32 %v5120_v22, %v2259_v52  ;;  %v2228_v2 = vmul.f32 %v6139_v20, %v2196_v21 }
 0x210   : > { %v2801_v51 = vmul.f32 %v2716_v11, %v2641_v12  ;;  %v2563_v29 = vsub.f32 1.0, %v2531_v54  ;;  %v2181_v4 = vmul.f32 %v6143_v5, %v2149_v34  ;;  %v2499_v18 = vmul.f32 1.442695, %v6145_v10  ;;  %v6151_v12 = vld [vmem:[#allocation91_spill] sm:$0xff]  ;;  %v2720_v10 = vpop.permute.xlu1 %2719 }
 0x211   : > { %v2658_v58 = vmul.f32 %v2626_v25, %v1858_v3  ;;  %v1859_v7 = vmul.f32 0.5, %v6146_v47  ;;  %v2323_v1 = vadd.f32 0.2548296, %v2291_v48  ;;  %v2260_v63 = vadd.f32 -0.28449672, %v2228_v2 }
 0x212   : > { %v2595_v49 = vmul.f32 %v2563_v29, %v1955_v6  ;;  %3465 = vpow2.f32 %v2465_v17  ;;  %v2213_v38 = vadd.f32 1.4214138, %v2181_v4  ;;  %v2118_v19 = vmul.f32 1.0614054, %v6147_v24  ;;  %3274 = vmatmul.msk.f32.gmra.mxu1 %vm2830_vm9, %v2801_v51  ;;  %v6152_v6 = vld [vmem:[#allocation42_spill] sm:$0xff]  ;;  %v6153_v51 = vld [vmem:[#allocation35_spill] sm:$0xff] }
 0x213   : > { %v3464_v46 = vpop.eup %3463  ;;  %v2325_v26 = vadd.f32 0.2548296, %v2293_v40  ;;  %v2818_v41 = vmul.f32 %v2750_v0, %v2658_v58  ;;  %v2355_v39 = vmul.f32 %v5120_v22, %v2323_v1  ;;  %v2292_v33 = vmul.f32 %v6139_v20, %v2260_v63 }
 0x214   : > { %vm1907_vm2 = vcmp.ge.f32.partialorder %v6148_v60, 0.0  ;;  %v2245_v35 = vmul.f32 %v6143_v5, %v2213_v38  ;;  %3467 = vpow2.f32 %v2499_v18  ;;  %v2150_v31 = vadd.f32 -1.4531521, %v2118_v19  ;;  %v2754_v38 = vpop.permute.xlu2 %2753 }
 0x215   : > { %v2627_v14 = vadd.f32 1.0, %v2595_v49  ;;  %v2515_v27 = vmul.f32 %v3464_v46, %v2355_v39  ;;  %v2324_v37 = vadd.f32 0.2548296, %v2292_v33  ;;  %v2102_v56 = vmul.f32 1.0614054, %v5245_v62  ;;  %3291 = vmatmul.msk.f32.gmra.mxu2 %vm2830_vm9, %v2818_v41  ;;  %v6154_v41 = vld [vmem:[#allocation93_spill] sm:$0xff] }
 0x216   : > { %v2596_v3 = vmul.f32 %v2564_v42, %v5479_v53  ;;  %v2277_v22 = vadd.f32 -0.28449672, %v2245_v35  ;;  %v2182_v50 = vmul.f32 %v6147_v24, %v2150_v31  ;;  %v2501_v36 = vmul.f32 1.442695, %v6149_v8  ;;  %v6157_v8 = vld [vmem:[#allocation92_spill] sm:$0xff] }
 0x217   : > { %v2357_v40 = vmul.f32 %v5214_v15, %v2325_v26  ;;  %v2547_v55 = vsub.f32 1.0, %v2515_v27  ;;  %v2356_v32 = vmul.f32 %v6139_v20, %v2324_v37  ;;  %v2134_v44 = vadd.f32 -1.4531521, %v2102_v56  ;;  %v6155_v27 = vld [vmem:[#allocation80_spill] sm:$0xff]  ;;  %v6156_v56 = vld [vmem:[#allocation90_spill] sm:$0xff] }
 0x218   : > { %v3466_v13 = vpop.eup %3465  ;;  %v1843_v23 = vmul.f32 0.5, %v6150_v30  ;;  %v1939_v16 = vsel %vm1907_vm2, 1.0, %v6066_v57  ;;  %v2309_v53 = vmul.f32 %v6143_v5, %v2277_v22  ;;  %v2214_v42 = vadd.f32 1.4214138, %v2182_v50  ;;  %v2722_v50 = vpop.permute.xlu0 %2721 }
 0x219   : > { %v2659_v11 = vmul.f32 %v2627_v14, %v1859_v7  ;;  %v2579_v28 = vmul.f32 %v2547_v55, %v1939_v16  ;;  %v2516_v52 = vmul.f32 %v3466_v13, %v2356_v32  ;;  %v2166_v15 = vmul.f32 %v5245_v62, %v2134_v44  ;;  %v2756_v16 = vpop.permute.xlu1 %2755 }
 0x21a   : > { %v3468_v21 = vpop.eup %3467  ;;  %vm1908_vm3 = vcmp.ge.f32.partialorder %v6151_v12, 0.0  ;;  %v2341_v20 = vadd.f32 0.2548296, %v2309_v53  ;;  %v2246_v54 = vmul.f32 %v6147_v24, %v2214_v42  ;;  %3469 = vpow2.f32 %v2501_v36  ;;  %3275 = vmatmul.msk.f32.gmra.mxu1 %vm2830_vm9, %v5502_v9 }
 0x21b   : > { %v2819_v43 = vmul.f32 %v2752_v45, %v2659_v11  ;;  %v2611_v17 = vadd.f32 1.0, %v2579_v28  ;;  %v2548_v34 = vsub.f32 1.0, %v2516_v52  ;;  %v2198_v25 = vadd.f32 1.4214138, %v2166_v15  ;;  %v6158_v28 = vld [vmem:[#allocation83_spill] sm:$0xff] }
 0x21c   : > { %vm1925_vm4 = vcmp.ge.f32.partialorder %v6152_v6, 0.0  ;;  %v2373_v48 = vmul.f32 %v6143_v5, %v2341_v20  ;;  %v2278_v2 = vadd.f32 -0.28449672, %v2246_v54  ;;  %v2469_v0 = vmul.f32 1.442695, %v6153_v51  ;;  %v6159_v15 = vld [vmem:[#allocation15_spill] sm:$0xff]  ;;  %v2724_v12 = vpop.permute.xlu2 %2723 }
 0x21d   : > { %v2628_v29 = vadd.f32 1.0, %v2596_v3  ;;  %v2517_v4 = vmul.f32 %v5538_v61, %v2357_v40  ;;  %v1940_v18 = vsel %vm1908_vm3, 1.0, %v6066_v57  ;;  %v2230_v9 = vmul.f32 %v5245_v62, %v2198_v25  ;;  %3292 = vmatmul.msk.f32.gmra.mxu2 %vm2830_vm9, %v2819_v43  ;;  %v6160_v20 = vld [vmem:[#allocation56_spill] sm:$0xff]  ;;  %v5607_v6 = vld [vmem:[%s5733_s8] ss:$0 sm:$0xff] }
 0x21e   : > { %v2643_v58 = vmul.f32 %v2611_v17, %v1843_v23  ;;  %v2580_v47 = vmul.f32 %v2548_v34, %v1940_v18  ;;  %v2533_v7 = vmul.f32 %v3468_v21, %v2373_v48  ;;  %v2310_v5 = vmul.f32 %v6147_v24, %v2278_v2 }
 0x21f   : > { %v1957_v1 = vsel %vm1925_vm4, 1.0, %v6066_v57  ;;  %v2262_v63 = vadd.f32 -0.28449672, %v2230_v9  ;;  %3471 = vpow2.f32 %v2469_v0  ;;  %v2660_v26 = vmul.f32 %v2628_v29, %v5468_v59 }
 0x220   : > { %v3470_v49 = vpop.eup %3469  ;;  %v2803_v61 = vmul.f32 %v2720_v10, %v2643_v58  ;;  %v2565_v19 = vsub.f32 1.0, %v2533_v7  ;;  %v2342_v46 = vadd.f32 0.2548296, %v2310_v5  ;;  %vm1909_vm5 = vcmp.ge.f32.partialorder %v6154_v41, 0.0  ;;  %v2758_v2 = vpop.permute.xlu0 %2757  ;;  %v6161_v10 = vld [vmem:[#allocation94_spill] sm:$0xff] }
 0x221   : > { %v2294_v39 = vmul.f32 %v5245_v62, %v2262_v63  ;;  %v2549_v33 = vsub.f32 1.0, %v2517_v4  ;;  %v2612_v60 = vadd.f32 1.0, %v2580_v47  ;;  %v2820_v14 = vmul.f32 %v2754_v38, %v2660_v26  ;;  %v2726_v9 = vpop.permute.xlu1 %2725 }
 0x222   : > { %v2597_v35 = vmul.f32 %v2565_v19, %v1957_v1  ;;  %v2374_v31 = vmul.f32 %v6147_v24, %v2342_v46  ;;  %3276 = vmatmul.msk.f32.gmra.mxu1 %vm2830_vm9, %v2803_v61  ;;  %vm1926_vm6 = vcmp.ge.f32.partialorder %v6155_v27, 0.0  ;;  %v1844_v3 = vmul.f32 0.5, %v6156_v56 }
 0x223   : > { %v2326_v37 = vadd.f32 0.2548296, %v2294_v39  ;;  %v1941_v59 = vsel %vm1909_vm5, 1.0, %v6066_v57  ;;  %v1861_v36 = vmul.f32 0.5, %v6157_v8  ;;  %v1958_v13 = vsel %vm1926_vm6, 1.0, %v6066_v57 }
 0x224   : > { %v2534_v22 = vmul.f32 %v3470_v49, %v2374_v31  ;;  %v2629_v40 = vadd.f32 1.0, %v2597_v35  ;;  %v2581_v32 = vmul.f32 %v2549_v33, %v1941_v59  ;;  %v2644_v44 = vmul.f32 %v2612_v60, %v1844_v3 }
 0x225   : > { %v2358_v55 = vmul.f32 %v5245_v62, %v2326_v37  ;;  %3293 = vmatmul.msk.f32.gmra.mxu2 %vm2830_vm9, %v2820_v14  ;;  %v3472_v24 = vpop.eup %3471  ;;  %vm1910_vm7 = vcmp.ge.f32.partialorder %v6158_v28, 0.0  ;;  %v1845_v21 = vmul.f32 0.5, %v6159_v15  ;;  %v1862_v54 = vmul.f32 0.5, %v6160_v20 }
 0x226   : > { %v2566_v45 = vsub.f32 1.0, %v2534_v22  ;;  %v2804_v23 = vmul.f32 %v2722_v50, %v2644_v44  ;;  %v2661_v53 = vmul.f32 %v2629_v40, %v1861_v36  ;;  %v2613_v11 = vadd.f32 1.0, %v2581_v32 }
 0x227   : > { %v2518_v30 = vmul.f32 %v3472_v24, %v2358_v55  ;;  %v1942_v17 = vsel %vm1910_vm7, 1.0, %v6066_v57  ;;  %v1846_v18 = vmul.f32 0.5, %v6161_v10 }
 0x228   : > { %v2598_v42 = vmul.f32 %v2566_v45, %v1958_v13  ;;  %v2821_v62 = vmul.f32 %v2756_v16, %v2661_v53  ;;  %v2645_v34 = vmul.f32 %v2613_v11, %v1845_v21 }
 0x229   : > { %v2550_v52 = vsub.f32 1.0, %v2518_v30 }
 0x22a   : > { %3277 = vmatmul.msk.f32.gmra.mxu1 %vm2830_vm9, %v2804_v23  ;;  %v2630_v43 = vadd.f32 1.0, %v2598_v42  ;;  %v2805_v48 = vmul.f32 %v2724_v12, %v2645_v34 }
 0x22b   : > { %v2582_v25 = vmul.f32 %v2550_v52, %v1942_v17 }
 0x22c   : > { %v2662_v51 = vmul.f32 %v2630_v43, %v1862_v54 }
 0x22d   : > { %3294 = vmatmul.msk.f32.gmra.mxu2 %vm2830_vm9, %v2821_v62  ;;  %v2614_v0 = vadd.f32 1.0, %v2582_v25 }
 0x22e   : > { %v2822_v4 = vmul.f32 %v2758_v2, %v2662_v51 }
 0x22f   : > { %v2646_v58 = vmul.f32 %v2614_v0, %v1846_v18 }
 0x231   : > { %v2806_v47 = vmul.f32 %v2726_v9, %v2646_v58 }
 0x232   : > { %v2996_v57 = vpop.f32.mrf.mxu2  ;;  %3278 = vmatmul.msk.f32.gmra.mxu1 %vm2830_vm9, %v2805_v48 }
 0x233   : > { %v2997_v29 = vadd.f32 %v5607_v6, %v2996_v57 }
 0x235   : > { %3060 = vst.msk [vmem:[%s5614_s16 + $0x80] sm:$0xff] %vm594_vm0, %v2997_v29  ;;  %3295 = vmatmul.msk.f32.gmra.mxu2 %vm2830_vm9, %v2822_v4 }
 0x238   : > { %v2948_v7 = vpop.f32.mrf.mxu1 }
 0x239   : > { %v2949_v5 = vadd.f32 %v5607_v6, %v2948_v7 }
 0x23a   : > { %v2999_v1 = vpop.f32.mrf.mxu2  ;;  %3279 = vmatmul.msk.f32.gmra.mxu1 %vm2830_vm9, %v2806_v47 }
 0x23b   : > { %v3000_v63 = vadd.f32 %v5607_v6, %v2999_v1  ;;  %3044 = vst.msk [vmem:[%s5614_s16] sm:$0xff] %vm594_vm0, %v2949_v5 }
 0x23d   : > { %3061 = vst.msk [vmem:[%s5614_s16 + $0x88] sm:$0xff] %vm594_vm0, %v3000_v63 }
 0x240   : > { %v2951_v49 = vpop.f32.mrf.mxu1 }
 0x241   : > { %v2952_v38 = vadd.f32 %v5607_v6, %v2951_v49 }
 0x242   : > { %v3002_v61 = vpop.f32.mrf.mxu2 }
 0x243   : > { %v3003_v19 = vadd.f32 %v5607_v6, %v3002_v61  ;;  %3045 = vst.msk [vmem:[%s5614_s16 + $0x8] sm:$0xff] %vm594_vm0, %v2952_v38 }
 0x245   : > { %3062 = vst.msk [vmem:[%s5614_s16 + $0x90] sm:$0xff] %vm594_vm0, %v3003_v19 }
 0x248   : > { %v2954_v46 = vpop.f32.mrf.mxu1 }
 0x249   : > { %v2955_v26 = vadd.f32 %v5607_v6, %v2954_v46 }
 0x24a   : > { %v3005_v41 = vpop.f32.mrf.mxu2 }
 0x24b   : > { %v3006_v39 = vadd.f32 %v5607_v6, %v3005_v41  ;;  %3046 = vst.msk [vmem:[%s5614_s16 + $0x10] sm:$0xff] %vm594_vm0, %v2955_v26 }
 0x24d   : > { %3063 = vst.msk [vmem:[%s5614_s16 + $0x98] sm:$0xff] %vm594_vm0, %v3006_v39 }
 0x250   : > { %v2957_v33 = vpop.f32.mrf.mxu1 }
 0x251   : > { %v2958_v60 = vadd.f32 %v5607_v6, %v2957_v33 }
 0x252   : > { %v3008_v35 = vpop.f32.mrf.mxu2 }
 0x253   : > { %v3009_v31 = vadd.f32 %v5607_v6, %v3008_v35  ;;  %3047 = vst.msk [vmem:[%s5614_s16 + $0x18] sm:$0xff] %vm594_vm0, %v2958_v60 }
 0x255   : > { %3064 = vst.msk [vmem:[%s5614_s16 + $0xa0] sm:$0xff] %vm594_vm0, %v3009_v31 }
 0x258   : > { %v2960_v14 = vpop.f32.mrf.mxu1 }
 0x259   : > { %v2961_v27 = vadd.f32 %v5607_v6, %v2960_v14 }
 0x25b   : > { %3048 = vst.msk [vmem:[%s5614_s16 + $0x20] sm:$0xff] %vm594_vm0, %v2961_v27 }
 0x25c   : > { %v3011_v37 = vpop.f32.mrf.mxu2 }
 0x25d   : > { %v3012_v56 = vadd.f32 %v5607_v6, %v3011_v37 }
 0x25f   : > { %3065 = vst.msk [vmem:[%s5614_s16 + $0xa8] sm:$0xff] %vm594_vm0, %v3012_v56 }
 0x260   : > { %v2963_v3 = vpop.f32.mrf.mxu1 }
 0x261   : > { %v2964_v22 = vadd.f32 %v5607_v6, %v2963_v3 }
 0x263   : > { %3049 = vst.msk [vmem:[%s5614_s16 + $0x28] sm:$0xff] %vm594_vm0, %v2964_v22 }
 0x268   : > { %v3014_v59 = vpop.f32.mrf.mxu2  ;;  %v2966_v50 = vpop.f32.mrf.mxu1 }
 0x269   : > { %v3015_v8 = vadd.f32 %v5607_v6, %v3014_v59  ;;  %v2967_v36 = vadd.f32 %v5607_v6, %v2966_v50 }
 0x26b   : > { %3066 = vst.msk [vmem:[%s5614_s16 + $0xb0] sm:$0xff] %vm594_vm0, %v3015_v8 }
 0x26c   : > { %3050 = vst.msk [vmem:[%s5614_s16 + $0x30] sm:$0xff] %vm594_vm0, %v2967_v36 }
 0x270   : > { %v3017_v40 = vpop.f32.mrf.mxu2 }
 0x271   : > { %v3018_v55 = vadd.f32 %v5607_v6, %v3017_v40  ;;  %v2969_v24 = vpop.f32.mrf.mxu1 }
 0x272   : > { %v2970_v32 = vadd.f32 %v5607_v6, %v2969_v24 }
 0x273   : > { %3067 = vst.msk [vmem:[%s5614_s16 + $0xb8] sm:$0xff] %vm594_vm0, %v3018_v55 }
 0x274   : > { %3051 = vst.msk [vmem:[%s5614_s16 + $0x38] sm:$0xff] %vm594_vm0, %v2970_v32 }
 0x279   : > { %v2972_v44 = vpop.f32.mrf.mxu1 }
 0x27a   : > { %v3020_v13 = vpop.f32.mrf.mxu2  ;;  %v2973_v45 = vadd.f32 %v5607_v6, %v2972_v44 }
 0x27b   : > { %v3021_v30 = vadd.f32 %v5607_v6, %v3020_v13 }
 0x27c   : > { %3052 = vst.msk [vmem:[%s5614_s16 + $0x40] sm:$0xff] %vm594_vm0, %v2973_v45 }
 0x27d   : > { %3068 = vst.msk [vmem:[%s5614_s16 + $0xc0] sm:$0xff] %vm594_vm0, %v3021_v30 }
 0x284   : > { %v2975_v23 = vpop.f32.mrf.mxu1 }
 0x285   : > { %v2976_v16 = vadd.f32 %v5607_v6, %v2975_v23 }
 0x286   : > { %v3023_v53 = vpop.f32.mrf.mxu2 }
 0x287   : > { %v3024_v42 = vadd.f32 %v5607_v6, %v3023_v53  ;;  %3053 = vst.msk [vmem:[%s5614_s16 + $0x48] sm:$0xff] %vm594_vm0, %v2976_v16 }
 0x289   : > { %3069 = vst.msk [vmem:[%s5614_s16 + $0xc8] sm:$0xff] %vm594_vm0, %v3024_v42 }
 0x28e   : > { %v3026_v11 = vpop.f32.mrf.mxu2 }
 0x28f   : > { %v3027_v28 = vadd.f32 %v5607_v6, %v3026_v11  ;;  %v2978_v52 = vpop.f32.mrf.mxu1 }
 0x290   : > { %v2979_v62 = vadd.f32 %v5607_v6, %v2978_v52 }
 0x291   : > { %3070 = vst.msk [vmem:[%s5614_s16 + $0xd0] sm:$0xff] %vm594_vm0, %v3027_v28 }
 0x292   : > { %3054 = vst.msk [vmem:[%s5614_s16 + $0x50] sm:$0xff] %vm594_vm0, %v2979_v62 }
 0x297   : > { %v2981_v15 = vpop.f32.mrf.mxu1 }
 0x298   : > { %v3029_v21 = vpop.f32.mrf.mxu2  ;;  %v2982_v12 = vadd.f32 %v5607_v6, %v2981_v15 }
 0x299   : > { %v3030_v20 = vadd.f32 %v5607_v6, %v3029_v21 }
 0x29a   : > { %3055 = vst.msk [vmem:[%s5614_s16 + $0x58] sm:$0xff] %vm594_vm0, %v2982_v12 }
 0x29b   : > { %3071 = vst.msk [vmem:[%s5614_s16 + $0xd8] sm:$0xff] %vm594_vm0, %v3030_v20 }
 0x29f   : > { %v2984_v54 = vpop.f32.mrf.mxu1 }
 0x2a0   : > { %v3032_v43 = vpop.f32.mrf.mxu2  ;;  %v2985_v17 = vadd.f32 %v5607_v6, %v2984_v54 }
 0x2a1   : > { %v3033_v34 = vadd.f32 %v5607_v6, %v3032_v43 }
 0x2a2   : > { %3056 = vst.msk [vmem:[%s5614_s16 + $0x60] sm:$0xff] %vm594_vm0, %v2985_v17 }
 0x2a3   : > { %3072 = vst.msk [vmem:[%s5614_s16 + $0xe0] sm:$0xff] %vm594_vm0, %v3033_v34 }
 0x2a7   : > { %v2987_v25 = vpop.f32.mrf.mxu1 }
 0x2a8   : > { %v3035_v48 = vpop.f32.mrf.mxu2  ;;  %v2988_v2 = vadd.f32 %v5607_v6, %v2987_v25 }
 0x2a9   : > { %v3036_v51 = vadd.f32 %v5607_v6, %v3035_v48 }
 0x2aa   : > { %3057 = vst.msk [vmem:[%s5614_s16 + $0x68] sm:$0xff] %vm594_vm0, %v2988_v2 }
 0x2ab   : > { %3073 = vst.msk [vmem:[%s5614_s16 + $0xe8] sm:$0xff] %vm594_vm0, %v3036_v51 }
 0x2af   : > { %v2990_v57 = vpop.f32.mrf.mxu1 }
 0x2b0   : > { %v3038_v0 = vpop.f32.mrf.mxu2  ;;  %v2991_v29 = vadd.f32 %v5607_v6, %v2990_v57 }
 0x2b1   : > { %v3039_v4 = vadd.f32 %v5607_v6, %v3038_v0 }
 0x2b2   : > { %3058 = vst.msk [vmem:[%s5614_s16 + $0x70] sm:$0xff] %vm594_vm0, %v2991_v29 }
 0x2b3   : > { %3074 = vst.msk [vmem:[%s5614_s16 + $0xf0] sm:$0xff] %vm594_vm0, %v3039_v4 }
 0x2b7   : > { %v2993_v10 = vpop.f32.mrf.mxu1 }
 0x2b8   : > { %v3041_v18 = vpop.f32.mrf.mxu2  ;;  %v2994_v9 = vadd.f32 %v5607_v6, %v2993_v10 }
 0x2b9   : > { %v3042_v58 = vadd.f32 %v5607_v6, %v3041_v18 }
 0x2ba   : > { %3059 = vst.msk [vmem:[%s5614_s16 + $0x78] sm:$0xff] %vm594_vm0, %v2994_v9 }
 0x2bb   : > { %3075 = vst.msk [vmem:[%s5614_s16 + $0xf8] sm:$0xff] %vm594_vm0, %v3042_v58 }
 0x2bc PF: > { %s19_s30 = sadd.s32 1, %s3505_s30   ;;  %s6162_s28 = smov %s3501_s29 }
 0x2bd   : > { %p16_p5 = scmp.ge.s32.totalorder %s19_s30, 4   ;;  %s6163_s29 = smov %s6165_s10 }
 0x2bf   :  { %18 = sbr.rel (!%p16_p5) target bundleno = 2 (0x2), region = 103 }

</bundles_post_ra>
